<compile_context>
chip_gen: v7x
topology: tpu7x:2x2x1
jax: 0.10.0
libtpu: 0.0.40
codegen_flags: <defaults>
</compile_context>

<pallas_src>
import functools

import jax
import jax.numpy as jnp
from jax import lax
from jax.experimental import pallas as pl
from jax.experimental.pallas import tpu as pltpu


# --------------------------------------------------------------------------
# Fused BasicBlock kernel (one grid step = one batch image)
# --------------------------------------------------------------------------
def _basic_block_kernel(x_ref, w1_ref, w2_ref, *rest, stride, has_shortcut):
    if has_shortcut:
        ws_ref, out_ref, xpad_ref, ypad_ref = rest
    else:
        out_ref, xpad_ref, ypad_ref = rest
        ws_ref = None

    _, H, W, Cin = x_ref.shape
    Cmid = w1_ref.shape[-1]
    Ho = (H - 1) // stride + 1
    Wo = (W - 1) // stride + 1
    cdt = x_ref.dtype

    # ---- stage x into the zero-padded scratch (border re-zeroed every step).
    xpad_ref[0:1] = jnp.zeros((1, W + 2, Cin), cdt)
    xpad_ref[H + 1:H + 2] = jnp.zeros((1, W + 2, Cin), cdt)
    xpad_ref[:, 0:1, :] = jnp.zeros((H + 2, 1, Cin), cdt)
    xpad_ref[:, W + 1:W + 2, :] = jnp.zeros((H + 2, 1, Cin), cdt)
    xpad_ref[1:H + 1, 1:W + 1, :] = x_ref[0]

    # ---- conv_cell1: 3x3 / stride / pad 1 / fused ReLU (9 per-tap matmuls).
    if stride == 1:
        def tap1(kh, kw):
            return xpad_ref[kh:kh + Ho, kw:kw + Wo, :].reshape(Ho * Wo, Cin)
    elif stride == 2:
        xp = xpad_ref[...]
        # Deinterleave once into 4 phase planes -> taps become plain slices.
        ph = [[xp[a::2, b::2, :] for b in range(2)] for a in range(2)]

        def tap1(kh, kw):
            p = ph[kh % 2][kw % 2]
            return p[kh // 2:kh // 2 + Ho,
                     kw // 2:kw // 2 + Wo, :].reshape(Ho * Wo, Cin)
    else:  # generic stride fallback (unused by ResNet18)
        xp = xpad_ref[...]

        def tap1(kh, kw):
            return xp[kh:kh + stride * (Ho - 1) + 1:stride,
                      kw:kw + stride * (Wo - 1) + 1:stride, :].reshape(Ho * Wo, Cin)

    acc1 = None
    x_center = None                                    # reused by the shortcut
    for t in range(9):
        kh, kw = divmod(t, 3)
        tap = tap1(kh, kw)
        if (kh, kw) == (1, 1):
            x_center = tap                             # == x[::stride, ::stride]
        part = jnp.dot(tap, w1_ref[t], preferred_element_type=jnp.float32)
        acc1 = part if acc1 is None else acc1 + part
    y1 = jnp.maximum(acc1, 0.0).astype(cdt)            # fused ReLU of cell1

    # ---- stage relu(conv1) into the second zero-padded scratch.
    ypad_ref[0:1] = jnp.zeros((1, Wo + 2, Cmid), cdt)
    ypad_ref[Ho + 1:Ho + 2] = jnp.zeros((1, Wo + 2, Cmid), cdt)
    ypad_ref[:, 0:1, :] = jnp.zeros((Ho + 2, 1, Cmid), cdt)
    ypad_ref[:, Wo + 1:Wo + 2, :] = jnp.zeros((Ho + 2, 1, Cmid), cdt)
    ypad_ref[1:Ho + 1, 1:Wo + 1, :] = y1.reshape(Ho, Wo, Cmid)

    # ---- conv_cell2: 3x3 / stride 1 / pad 1 / fused ReLU.
    acc2 = None
    for t in range(9):
        kh, kw = divmod(t, 3)
        tap = ypad_ref[kh:kh + Ho, kw:kw + Wo, :].reshape(Ho * Wo, Cmid)
        part = jnp.dot(tap, w2_ref[t], preferred_element_type=jnp.float32)
        acc2 = part if acc2 is None else acc2 + part
    out = jnp.maximum(acc2, 0.0)                       # fused ReLU of cell2

    # ---- 1x1 shortcut (no activation), added AFTER cell2's ReLU (per module).
    if has_shortcut:
        out = out + jnp.dot(x_center, ws_ref[...],
                            preferred_element_type=jnp.float32)

    out_ref[0] = out.astype(out_ref.dtype)


# --------------------------------------------------------------------------
# Per-chip scoped VMEM limit (guarded; None -> keep compiler default)
# --------------------------------------------------------------------------
def _maybe_vmem_limit():
    try:
        info = pltpu.get_tpu_info()
        cap = getattr(info, "vmem_capacity_bytes", None)
        if cap:
            return min((int(cap) * 3) // 4, 112 * 1024 * 1024)
    except Exception:
        pass
    return None


_VMEM_LIMIT_BYTES = _maybe_vmem_limit()


# --------------------------------------------------------------------------
# Wrapper: NCHW boundary, per-tap weight slabs, grid over batch
# --------------------------------------------------------------------------
@functools.partial(jax.jit, static_argnames=("stride",))
def basic_block_forward(x_nchw, w1, w2, ws, stride=1):
    """BasicBlock.forward.

    x_nchw : (N, Cin, H, W)      activations (NCHW, like the PyTorch module)
    w1     : (3, 3, Cin, Cmid)   conv_cell1 weight (HWIO)
    w2     : (3, 3, Cmid, Cout)  conv_cell2 weight (HWIO)
    ws     : (Cin, Cout) or None 1x1 shortcut weight
    """
    x = jnp.transpose(x_nchw, (0, 2, 3, 1))            # NCHW -> NHWC
    N, H, W, Cin = x.shape
    Cmid = w1.shape[-1]
    Cout = w2.shape[-1]
    Ho = (H - 1) // stride + 1
    Wo = (W - 1) // stride + 1
    cdt = x.dtype

    # Weights travel in the activation dtype; accumulation stays f32 in-kernel.
    w1r = w1.astype(cdt).reshape(9, Cin, Cmid)         # per-tap weight slabs
    w2r = w2.astype(cdt).reshape(9, Cmid, Cout)
    has_shortcut = ws is not None

    kernel = functools.partial(_basic_block_kernel, stride=stride,
                               has_shortcut=has_shortcut)

    in_specs = [
        pl.BlockSpec((1, H, W, Cin), lambda n: (n, 0, 0, 0)),
        pl.BlockSpec((9, Cin, Cmid), lambda n: (0, 0, 0)),   # broadcast weights
        pl.BlockSpec((9, Cmid, Cout), lambda n: (0, 0, 0)),
    ]
    args = [x, w1r, w2r]
    if has_shortcut:
        in_specs.append(pl.BlockSpec((Cin, Cout), lambda n: (0, 0)))
        args.append(ws.astype(cdt))

    compiler_kwargs = dict(dimension_semantics=("parallel",))
    if _VMEM_LIMIT_BYTES is not None:
        compiler_kwargs["vmem_limit_bytes"] = _VMEM_LIMIT_BYTES

    out_flat = pl.pallas_call(
        kernel,
        out_shape=jax.ShapeDtypeStruct((N, Ho * Wo, Cout), cdt),
        grid_spec=pltpu.PrefetchScalarGridSpec(
            num_scalar_prefetch=0,
            grid=(N,),
            in_specs=in_specs,
            out_specs=pl.BlockSpec((1, Ho * Wo, Cout), lambda n: (n, 0, 0)),
            scratch_shapes=[
                pltpu.VMEM((H + 2, W + 2, Cin), cdt),        # zero-padded x
                pltpu.VMEM((Ho + 2, Wo + 2, Cmid), cdt),     # zero-padded y1
            ],
        ),
        compiler_params=pltpu.CompilerParams(**compiler_kwargs),
    )(*args)

    out = out_flat.reshape(N, Ho, Wo, Cout)
    return jnp.transpose(out, (0, 3, 1, 2))            # NHWC -> NCHW


# --------------------------------------------------------------------------
# Pure-JAX reference (for correctness check only)
# --------------------------------------------------------------------------
def basic_block_ref(x, w1, w2, ws, stride=1):
    dn = ("NCHW", "HWIO", "NCHW")
    conv = lambda a, w, s, p: lax.conv_general_dilated(
        a, w, (s, s), p, dimension_numbers=dn)
    y1 = jax.nn.relu(conv(x, w1, stride, ((1, 1), (1, 1))))
    y2 = jax.nn.relu(conv(y1, w2, 1, ((1, 1), (1, 1))))
    if ws is not None:
        e = conv(x, ws.reshape(1, 1, *ws.shape), stride, ((0, 0), (0, 0)))
        return y2 + e
    return y2


if __name__ == "__main__":
    key = jax.random.PRNGKey(0)
    k1, k2, k3, k4, k5, k6, k7, k8, kx, kx2, kx3 = jax.random.split(key, 11)

    # --- case 1: in=4 -> out=8, stride=1  => shortcut path active -----------
    N, Cin, H, W = 2, 4, 16, 16
    Cout, stride = 8, 1
    x = jax.random.normal(kx, (N, Cin, H, W), jnp.float32)
    w1 = jax.random.normal(k1, (3, 3, Cin, Cout), jnp.float32) * 0.1   # HWIO
    w2 = jax.random.normal(k2, (3, 3, Cout, Cout), jnp.float32) * 0.1
    ws = jax.random.normal(k3, (Cin, Cout), jnp.float32) * 0.1

    out = jax.block_until_ready(basic_block_forward(x, w1, w2, ws, stride=stride))
    ref = basic_block_ref(x, w1, w2, ws, stride=stride)
    assert out.shape == (N, Cout, H, W), out.shape
    assert jnp.allclose(out, ref, atol=1e-4, rtol=1e-4), \
        float(jnp.max(jnp.abs(out - ref)))

    # --- case 2: in == out, stride=1  => no shortcut -------------------------
    C2 = 8
    x2 = jax.random.normal(kx2, (N, C2, H, W), jnp.float32)
    w1b = jax.random.normal(k4, (3, 3, C2, C2), jnp.float32) * 0.1
    w2b = jax.random.normal(k5, (3, 3, C2, C2), jnp.float32) * 0.1
    out2 = jax.block_until_ready(basic_block_forward(x2, w1b, w2b, None, stride=1))
    ref2 = basic_block_ref(x2, w1b, w2b, None, stride=1)
    assert out2.shape == (N, C2, H, W), out2.shape
    assert jnp.allclose(out2, ref2, atol=1e-4, rtol=1e-4), \
        float(jnp.max(jnp.abs(out2 - ref2)))

    # --- case 3: downsampling block, in=8 -> out=16, stride=2 ----------------
    C3i, C3o = 8, 16
    x3 = jax.random.normal(kx3, (N, C3i, H, W), jnp.float32)
    w1c = jax.random.normal(k6, (3, 3, C3i, C3o), jnp.float32) * 0.1
    w2c = jax.random.normal(k7, (3, 3, C3o, C3o), jnp.float32) * 0.1
    wsc = jax.random.normal(k8, (C3i, C3o), jnp.float32) * 0.1
    out3 = jax.block_until_ready(basic_block_forward(x3, w1c, w2c, wsc, stride=2))
    ref3 = basic_block_ref(x3, w1c, w2c, wsc, stride=2)
    assert out3.shape == (N, C3o, H // 2, W // 2), out3.shape
    assert jnp.allclose(out3, ref3, atol=1e-4, rtol=1e-4), \
        float(jnp.max(jnp.abs(out3 - ref3)))

    # --- case 4: bf16 activations + bf16 weights (f32 accumulation) ----------
    out4 = jax.block_until_ready(
        basic_block_forward(x.astype(jnp.bfloat16), w1, w2, ws, stride=1))
    assert out4.dtype == jnp.bfloat16 and out4.shape == (N, Cout, H, W)
    assert jnp.allclose(out4.astype(jnp.float32), ref, atol=5e-2, rtol=5e-2), \
        float(jnp.max(jnp.abs(out4.astype(jnp.float32) - ref)))

    print("KERNEL_OK")
</pallas_src>

<mosaic_0001>
module attributes {stable_mosaic.version = 11 : i64} {
  func.func @_basic_block_kernel(%arg0: i32, %arg1: memref<1x16x16x4xf32, #tpu.memory_space<vmem>>, %arg2: memref<9x4x8xf32, #tpu.memory_space<vmem>>, %arg3: memref<9x8x8xf32, #tpu.memory_space<vmem>>, %arg4: memref<4x8xf32, #tpu.memory_space<vmem>>, %arg5: memref<1x256x8xf32, #tpu.memory_space<vmem>>, %arg6: memref<18x18x4xf32, #tpu.memory_space<vmem>>, %arg7: memref<18x18x8xf32, #tpu.memory_space<vmem>>) attributes {dimension_semantics = [#tpu.dimension_semantics<parallel>], iteration_bounds = array<i64: 2>, scalar_prefetch = 0 : i64, scratch_operands = 2 : i64, tpu.core_type = #tpu.core_type<tc>, window_params = [{transform_indices = @transform_0, window_bounds = array<i64: 1, 16, 16, 4>}, {pipeline_mode = #tpu.pipeline_mode<synchronous>, transform_indices = @transform_1, window_bounds = array<i64: 9, 4, 8>}, {pipeline_mode = #tpu.pipeline_mode<synchronous>, transform_indices = @transform_2, window_bounds = array<i64: 9, 8, 8>}, {pipeline_mode = #tpu.pipeline_mode<synchronous>, transform_indices = @transform_3, window_bounds = array<i64: 4, 8>}, {transform_indices = @transform_4, window_bounds = array<i64: 1, 256, 8>}]} {
    %cst = arith.constant 0.000000e+00 : f32
    %0 = vector.broadcast %cst : f32 to vector<1x18x4xf32>
    %c0 = arith.constant 0 : index
    %c0_0 = arith.constant 0 : index
    %c0_1 = arith.constant 0 : index
    %1 = vector.load %arg6[%c0, %c0_0, %c0_1] : memref<18x18x4xf32, #tpu.memory_space<vmem>>, vector<1x18x4xf32>
    tpu.vector_store %arg6[%c0, %c0_0, %c0_1], %0 {strides = array<i32>} : memref<18x18x4xf32, #tpu.memory_space<vmem>>, vector<1x18x4xf32>,
    %cst_2 = arith.constant 0.000000e+00 : f32
    %2 = vector.broadcast %cst_2 : f32 to vector<1x18x4xf32>
    %c17 = arith.constant 17 : index
    %c0_3 = arith.constant 0 : index
    %c0_4 = arith.constant 0 : index
    %3 = vector.load %arg6[%c17, %c0_3, %c0_4] : memref<18x18x4xf32, #tpu.memory_space<vmem>>, vector<1x18x4xf32>
    tpu.vector_store %arg6[%c17, %c0_3, %c0_4], %2 {strides = array<i32>} : memref<18x18x4xf32, #tpu.memory_space<vmem>>, vector<1x18x4xf32>,
    %cst_5 = arith.constant 0.000000e+00 : f32
    %4 = vector.broadcast %cst_5 : f32 to vector<18x1x4xf32>
    %c0_6 = arith.constant 0 : index
    %c0_7 = arith.constant 0 : index
    %c0_8 = arith.constant 0 : index
    %5 = vector.load %arg6[%c0_6, %c0_7, %c0_8] : memref<18x18x4xf32, #tpu.memory_space<vmem>>, vector<18x1x4xf32>
    tpu.vector_store %arg6[%c0_6, %c0_7, %c0_8], %4 {strides = array<i32>} : memref<18x18x4xf32, #tpu.memory_space<vmem>>, vector<18x1x4xf32>,
    %cst_9 = arith.constant 0.000000e+00 : f32
    %6 = vector.broadcast %cst_9 : f32 to vector<18x1x4xf32>
    %c0_10 = arith.constant 0 : index
    %c17_11 = arith.constant 17 : index
    %c0_12 = arith.constant 0 : index
    %7 = vector.load %arg6[%c0_10, %c17_11, %c0_12] : memref<18x18x4xf32, #tpu.memory_space<vmem>>, vector<18x1x4xf32>
    tpu.vector_store %arg6[%c0_10, %c17_11, %c0_12], %6 {strides = array<i32>} : memref<18x18x4xf32, #tpu.memory_space<vmem>>, vector<18x1x4xf32>,
    %c0_13 = arith.constant 0 : index
    %c0_14 = arith.constant 0 : index
    %c0_15 = arith.constant 0 : index
    %c0_16 = arith.constant 0 : index
    %8 = vector.load %arg1[%c0_13, %c0_14, %c0_15, %c0_16] : memref<1x16x16x4xf32, #tpu.memory_space<vmem>>, vector<1x16x16x4xf32>
    %9 = vector.shape_cast %8 : vector<1x16x16x4xf32> to vector<16x16x4xf32>
    %c1 = arith.constant 1 : index
    %c1_17 = arith.constant 1 : index
    %c0_18 = arith.constant 0 : index
    %10 = vector.load %arg6[%c1, %c1_17, %c0_18] : memref<18x18x4xf32, #tpu.memory_space<vmem>>, vector<16x16x4xf32>
    tpu.vector_store %arg6[%c1, %c1_17, %c0_18], %9 {strides = array<i32>} : memref<18x18x4xf32, #tpu.memory_space<vmem>>, vector<16x16x4xf32>,
    %c0_19 = arith.constant 0 : index
    %c0_20 = arith.constant 0 : index
    %c0_21 = arith.constant 0 : index
    %11 = vector.load %arg6[%c0_19, %c0_20, %c0_21] : memref<18x18x4xf32, #tpu.memory_space<vmem>>, vector<16x16x4xf32>
    %12 = vector.shape_cast %11 : vector<16x16x4xf32> to vector<256x4xf32>
    %c0_22 = arith.constant 0 : index
    %c0_23 = arith.constant 0 : index
    %c0_24 = arith.constant 0 : index
    %13 = vector.load %arg2[%c0_22, %c0_23, %c0_24] : memref<9x4x8xf32, #tpu.memory_space<vmem>>, vector<1x4x8xf32>
    %14 = vector.shape_cast %13 : vector<1x4x8xf32> to vector<4x8xf32>
    %cst_25 = arith.constant dense<0.000000e+00> : vector<256x8xf32>
    %15 = tpu.matmul %12, %14, %cst_25 {dimension_numbers = #tpu.dot_dimension_numbers<[1], [0], [0], [1], [0, 0, 1, 1], [], []>} : vector<256x4xf32>, vector<4x8xf32>, vector<256x8xf32> -> vector<256x8xf32>
    %c0_26 = arith.constant 0 : index
    %c1_27 = arith.constant 1 : index
    %c0_28 = arith.constant 0 : index
    %16 = vector.load %arg6[%c0_26, %c1_27, %c0_28] : memref<18x18x4xf32, #tpu.memory_space<vmem>>, vector<16x16x4xf32>
    %17 = vector.shape_cast %16 : vector<16x16x4xf32> to vector<256x4xf32>
    %c1_29 = arith.constant 1 : index
    %c0_30 = arith.constant 0 : index
    %c0_31 = arith.constant 0 : index
    %18 = vector.load %arg2[%c1_29, %c0_30, %c0_31] : memref<9x4x8xf32, #tpu.memory_space<vmem>>, vector<1x4x8xf32>
    %19 = vector.shape_cast %18 : vector<1x4x8xf32> to vector<4x8xf32>
    %cst_32 = arith.constant dense<0.000000e+00> : vector<256x8xf32>
    %20 = tpu.matmul %17, %19, %cst_32 {dimension_numbers = #tpu.dot_dimension_numbers<[1], [0], [0], [1], [0, 0, 1, 1], [], []>} : vector<256x4xf32>, vector<4x8xf32>, vector<256x8xf32> -> vector<256x8xf32>
    %21 = arith.addf %15, %20 : vector<256x8xf32>
    %c0_33 = arith.constant 0 : index
    %c2 = arith.constant 2 : index
    %c0_34 = arith.constant 0 : index
    %22 = vector.load %arg6[%c0_33, %c2, %c0_34] : memref<18x18x4xf32, #tpu.memory_space<vmem>>, vector<16x16x4xf32>
    %23 = vector.shape_cast %22 : vector<16x16x4xf32> to vector<256x4xf32>
    %c2_35 = arith.constant 2 : index
    %c0_36 = arith.constant 0 : index
    %c0_37 = arith.constant 0 : index
    %24 = vector.load %arg2[%c2_35, %c0_36, %c0_37] : memref<9x4x8xf32, #tpu.memory_space<vmem>>, vector<1x4x8xf32>
    %25 = vector.shape_cast %24 : vector<1x4x8xf32> to vector<4x8xf32>
    %cst_38 = arith.constant dense<0.000000e+00> : vector<256x8xf32>
    %26 = tpu.matmul %23, %25, %cst_38 {dimension_numbers = #tpu.dot_dimension_numbers<[1], [0], [0], [1], [0, 0, 1, 1], [], []>} : vector<256x4xf32>, vector<4x8xf32>, vector<256x8xf32> -> vector<256x8xf32>
    %27 = arith.addf %21, %26 : vector<256x8xf32>
    %c1_39 = arith.constant 1 : index
    %c0_40 = arith.constant 0 : index
    %c0_41 = arith.constant 0 : index
    %28 = vector.load %arg6[%c1_39, %c0_40, %c0_41] : memref<18x18x4xf32, #tpu.memory_space<vmem>>, vector<16x16x4xf32>
    %29 = vector.shape_cast %28 : vector<16x16x4xf32> to vector<256x4xf32>
    %c3 = arith.constant 3 : index
    %c0_42 = arith.constant 0 : index
    %c0_43 = arith.constant 0 : index
    %30 = vector.load %arg2[%c3, %c0_42, %c0_43] : memref<9x4x8xf32, #tpu.memory_space<vmem>>, vector<1x4x8xf32>
    %31 = vector.shape_cast %30 : vector<1x4x8xf32> to vector<4x8xf32>
    %cst_44 = arith.constant dense<0.000000e+00> : vector<256x8xf32>
    %32 = tpu.matmul %29, %31, %cst_44 {dimension_numbers = #tpu.dot_dimension_numbers<[1], [0], [0], [1], [0, 0, 1, 1], [], []>} : vector<256x4xf32>, vector<4x8xf32>, vector<256x8xf32> -> vector<256x8xf32>
    %33 = arith.addf %27, %32 : vector<256x8xf32>
    %c1_45 = arith.constant 1 : index
    %c1_46 = arith.constant 1 : index
    %c0_47 = arith.constant 0 : index
    %34 = vector.load %arg6[%c1_45, %c1_46, %c0_47] : memref<18x18x4xf32, #tpu.memory_space<vmem>>, vector<16x16x4xf32>
    %35 = vector.shape_cast %34 : vector<16x16x4xf32> to vector<256x4xf32>
    %c4 = arith.constant 4 : index
    %c0_48 = arith.constant 0 : index
    %c0_49 = arith.constant 0 : index
    %36 = vector.load %arg2[%c4, %c0_48, %c0_49] : memref<9x4x8xf32, #tpu.memory_space<vmem>>, vector<1x4x8xf32>
    %37 = vector.shape_cast %36 : vector<1x4x8xf32> to vector<4x8xf32>
    %cst_50 = arith.constant dense<0.000000e+00> : vector<256x8xf32>
    %38 = tpu.matmul %35, %37, %cst_50 {dimension_numbers = #tpu.dot_dimension_numbers<[1], [0], [0], [1], [0, 0, 1, 1], [], []>} : vector<256x4xf32>, vector<4x8xf32>, vector<256x8xf32> -> vector<256x8xf32>
    %39 = arith.addf %33, %38 : vector<256x8xf32>
    %c1_51 = arith.constant 1 : index
    %c2_52 = arith.constant 2 : index
    %c0_53 = arith.constant 0 : index
    %40 = vector.load %arg6[%c1_51, %c2_52, %c0_53] : memref<18x18x4xf32, #tpu.memory_space<vmem>>, vector<16x16x4xf32>
    %41 = vector.shape_cast %40 : vector<16x16x4xf32> to vector<256x4xf32>
    %c5 = arith.constant 5 : index
    %c0_54 = arith.constant 0 : index
    %c0_55 = arith.constant 0 : index
    %42 = vector.load %arg2[%c5, %c0_54, %c0_55] : memref<9x4x8xf32, #tpu.memory_space<vmem>>, vector<1x4x8xf32>
    %43 = vector.shape_cast %42 : vector<1x4x8xf32> to vector<4x8xf32>
    %cst_56 = arith.constant dense<0.000000e+00> : vector<256x8xf32>
    %44 = tpu.matmul %41, %43, %cst_56 {dimension_numbers = #tpu.dot_dimension_numbers<[1], [0], [0], [1], [0, 0, 1, 1], [], []>} : vector<256x4xf32>, vector<4x8xf32>, vector<256x8xf32> -> vector<256x8xf32>
    %45 = arith.addf %39, %44 : vector<256x8xf32>
    %c2_57 = arith.constant 2 : index
    %c0_58 = arith.constant 0 : index
    %c0_59 = arith.constant 0 : index
    %46 = vector.load %arg6[%c2_57, %c0_58, %c0_59] : memref<18x18x4xf32, #tpu.memory_space<vmem>>, vector<16x16x4xf32>
    %47 = vector.shape_cast %46 : vector<16x16x4xf32> to vector<256x4xf32>
    %c6 = arith.constant 6 : index
    %c0_60 = arith.constant 0 : index
    %c0_61 = arith.constant 0 : index
    %48 = vector.load %arg2[%c6, %c0_60, %c0_61] : memref<9x4x8xf32, #tpu.memory_space<vmem>>, vector<1x4x8xf32>
    %49 = vector.shape_cast %48 : vector<1x4x8xf32> to vector<4x8xf32>
    %cst_62 = arith.constant dense<0.000000e+00> : vector<256x8xf32>
    %50 = tpu.matmul %47, %49, %cst_62 {dimension_numbers = #tpu.dot_dimension_numbers<[1], [0], [0], [1], [0, 0, 1, 1], [], []>} : vector<256x4xf32>, vector<4x8xf32>, vector<256x8xf32> -> vector<256x8xf32>
    %51 = arith.addf %45, %50 : vector<256x8xf32>
    %c2_63 = arith.constant 2 : index
    %c1_64 = arith.constant 1 : index
    %c0_65 = arith.constant 0 : index
    %52 = vector.load %arg6[%c2_63, %c1_64, %c0_65] : memref<18x18x4xf32, #tpu.memory_space<vmem>>, vector<16x16x4xf32>
    %53 = vector.shape_cast %52 : vector<16x16x4xf32> to vector<256x4xf32>
    %c7 = arith.constant 7 : index
    %c0_66 = arith.constant 0 : index
    %c0_67 = arith.constant 0 : index
    %54 = vector.load %arg2[%c7, %c0_66, %c0_67] : memref<9x4x8xf32, #tpu.memory_space<vmem>>, vector<1x4x8xf32>
    %55 = vector.shape_cast %54 : vector<1x4x8xf32> to vector<4x8xf32>
    %cst_68 = arith.constant dense<0.000000e+00> : vector<256x8xf32>
    %56 = tpu.matmul %53, %55, %cst_68 {dimension_numbers = #tpu.dot_dimension_numbers<[1], [0], [0], [1], [0, 0, 1, 1], [], []>} : vector<256x4xf32>, vector<4x8xf32>, vector<256x8xf32> -> vector<256x8xf32>
    %57 = arith.addf %51, %56 : vector<256x8xf32>
    %c2_69 = arith.constant 2 : index
    %c2_70 = arith.constant 2 : index
    %c0_71 = arith.constant 0 : index
    %58 = vector.load %arg6[%c2_69, %c2_70, %c0_71] : memref<18x18x4xf32, #tpu.memory_space<vmem>>, vector<16x16x4xf32>
    %59 = vector.shape_cast %58 : vector<16x16x4xf32> to vector<256x4xf32>
    %c8 = arith.constant 8 : index
    %c0_72 = arith.constant 0 : index
    %c0_73 = arith.constant 0 : index
    %60 = vector.load %arg2[%c8, %c0_72, %c0_73] : memref<9x4x8xf32, #tpu.memory_space<vmem>>, vector<1x4x8xf32>
    %61 = vector.shape_cast %60 : vector<1x4x8xf32> to vector<4x8xf32>
    %cst_74 = arith.constant dense<0.000000e+00> : vector<256x8xf32>
    %62 = tpu.matmul %59, %61, %cst_74 {dimension_numbers = #tpu.dot_dimension_numbers<[1], [0], [0], [1], [0, 0, 1, 1], [], []>} : vector<256x4xf32>, vector<4x8xf32>, vector<256x8xf32> -> vector<256x8xf32>
    %63 = arith.addf %57, %62 : vector<256x8xf32>
    %cst_75 = arith.constant 0.000000e+00 : f32
    %64 = vector.broadcast %cst_75 : f32 to vector<256x8xf32>
    %65 = arith.maximumf %63, %64 : vector<256x8xf32>
    %cst_76 = arith.constant 0.000000e+00 : f32
    %66 = vector.broadcast %cst_76 : f32 to vector<1x18x8xf32>
    %c0_77 = arith.constant 0 : index
    %c0_78 = arith.constant 0 : index
    %c0_79 = arith.constant 0 : index
    %67 = vector.load %arg7[%c0_77, %c0_78, %c0_79] : memref<18x18x8xf32, #tpu.memory_space<vmem>>, vector<1x18x8xf32>
    tpu.vector_store %arg7[%c0_77, %c0_78, %c0_79], %66 {strides = array<i32>} : memref<18x18x8xf32, #tpu.memory_space<vmem>>, vector<1x18x8xf32>,
    %cst_80 = arith.constant 0.000000e+00 : f32
    %68 = vector.broadcast %cst_80 : f32 to vector<1x18x8xf32>
    %c17_81 = arith.constant 17 : index
    %c0_82 = arith.constant 0 : index
    %c0_83 = arith.constant 0 : index
    %69 = vector.load %arg7[%c17_81, %c0_82, %c0_83] : memref<18x18x8xf32, #tpu.memory_space<vmem>>, vector<1x18x8xf32>
    tpu.vector_store %arg7[%c17_81, %c0_82, %c0_83], %68 {strides = array<i32>} : memref<18x18x8xf32, #tpu.memory_space<vmem>>, vector<1x18x8xf32>,
    %cst_84 = arith.constant 0.000000e+00 : f32
    %70 = vector.broadcast %cst_84 : f32 to vector<18x1x8xf32>
    %c0_85 = arith.constant 0 : index
    %c0_86 = arith.constant 0 : index
    %c0_87 = arith.constant 0 : index
    %71 = vector.load %arg7[%c0_85, %c0_86, %c0_87] : memref<18x18x8xf32, #tpu.memory_space<vmem>>, vector<18x1x8xf32>
    tpu.vector_store %arg7[%c0_85, %c0_86, %c0_87], %70 {strides = array<i32>} : memref<18x18x8xf32, #tpu.memory_space<vmem>>, vector<18x1x8xf32>,
    %cst_88 = arith.constant 0.000000e+00 : f32
    %72 = vector.broadcast %cst_88 : f32 to vector<18x1x8xf32>
    %c0_89 = arith.constant 0 : index
    %c17_90 = arith.constant 17 : index
    %c0_91 = arith.constant 0 : index
    %73 = vector.load %arg7[%c0_89, %c17_90, %c0_91] : memref<18x18x8xf32, #tpu.memory_space<vmem>>, vector<18x1x8xf32>
    tpu.vector_store %arg7[%c0_89, %c17_90, %c0_91], %72 {strides = array<i32>} : memref<18x18x8xf32, #tpu.memory_space<vmem>>, vector<18x1x8xf32>,
    %74 = vector.shape_cast %65 : vector<256x8xf32> to vector<16x16x8xf32>
    %c1_92 = arith.constant 1 : index
    %c1_93 = arith.constant 1 : index
    %c0_94 = arith.constant 0 : index
    %75 = vector.load %arg7[%c1_92, %c1_93, %c0_94] : memref<18x18x8xf32, #tpu.memory_space<vmem>>, vector<16x16x8xf32>
    tpu.vector_store %arg7[%c1_92, %c1_93, %c0_94], %74 {strides = array<i32>} : memref<18x18x8xf32, #tpu.memory_space<vmem>>, vector<16x16x8xf32>,
    %c0_95 = arith.constant 0 : index
    %c0_96 = arith.constant 0 : index
    %c0_97 = arith.constant 0 : index
    %76 = vector.load %arg7[%c0_95, %c0_96, %c0_97] : memref<18x18x8xf32, #tpu.memory_space<vmem>>, vector<16x16x8xf32>
    %77 = vector.shape_cast %76 : vector<16x16x8xf32> to vector<256x8xf32>
    %c0_98 = arith.constant 0 : index
    %c0_99 = arith.constant 0 : index
    %c0_100 = arith.constant 0 : index
    %78 = vector.load %arg3[%c0_98, %c0_99, %c0_100] : memref<9x8x8xf32, #tpu.memory_space<vmem>>, vector<1x8x8xf32>
    %79 = vector.shape_cast %78 : vector<1x8x8xf32> to vector<8x8xf32>
    %cst_101 = arith.constant dense<0.000000e+00> : vector<256x8xf32>
    %80 = tpu.matmul %77, %79, %cst_101 {dimension_numbers = #tpu.dot_dimension_numbers<[1], [0], [0], [1], [0, 0, 1, 1], [], []>} : vector<256x8xf32>, vector<8x8xf32>, vector<256x8xf32> -> vector<256x8xf32>
    %c0_102 = arith.constant 0 : index
    %c1_103 = arith.constant 1 : index
    %c0_104 = arith.constant 0 : index
    %81 = vector.load %arg7[%c0_102, %c1_103, %c0_104] : memref<18x18x8xf32, #tpu.memory_space<vmem>>, vector<16x16x8xf32>
    %82 = vector.shape_cast %81 : vector<16x16x8xf32> to vector<256x8xf32>
    %c1_105 = arith.constant 1 : index
    %c0_106 = arith.constant 0 : index
    %c0_107 = arith.constant 0 : index
    %83 = vector.load %arg3[%c1_105, %c0_106, %c0_107] : memref<9x8x8xf32, #tpu.memory_space<vmem>>, vector<1x8x8xf32>
    %84 = vector.shape_cast %83 : vector<1x8x8xf32> to vector<8x8xf32>
    %cst_108 = arith.constant dense<0.000000e+00> : vector<256x8xf32>
    %85 = tpu.matmul %82, %84, %cst_108 {dimension_numbers = #tpu.dot_dimension_numbers<[1], [0], [0], [1], [0, 0, 1, 1], [], []>} : vector<256x8xf32>, vector<8x8xf32>, vector<256x8xf32> -> vector<256x8xf32>
    %86 = arith.addf %80, %85 : vector<256x8xf32>
    %c0_109 = arith.constant 0 : index
    %c2_110 = arith.constant 2 : index
    %c0_111 = arith.constant 0 : index
    %87 = vector.load %arg7[%c0_109, %c2_110, %c0_111] : memref<18x18x8xf32, #tpu.memory_space<vmem>>, vector<16x16x8xf32>
    %88 = vector.shape_cast %87 : vector<16x16x8xf32> to vector<256x8xf32>
    %c2_112 = arith.constant 2 : index
    %c0_113 = arith.constant 0 : index
    %c0_114 = arith.constant 0 : index
    %89 = vector.load %arg3[%c2_112, %c0_113, %c0_114] : memref<9x8x8xf32, #tpu.memory_space<vmem>>, vector<1x8x8xf32>
    %90 = vector.shape_cast %89 : vector<1x8x8xf32> to vector<8x8xf32>
    %cst_115 = arith.constant dense<0.000000e+00> : vector<256x8xf32>
    %91 = tpu.matmul %88, %90, %cst_115 {dimension_numbers = #tpu.dot_dimension_numbers<[1], [0], [0], [1], [0, 0, 1, 1], [], []>} : vector<256x8xf32>, vector<8x8xf32>, vector<256x8xf32> -> vector<256x8xf32>
    %92 = arith.addf %86, %91 : vector<256x8xf32>
    %c1_116 = arith.constant 1 : index
    %c0_117 = arith.constant 0 : index
    %c0_118 = arith.constant 0 : index
    %93 = vector.load %arg7[%c1_116, %c0_117, %c0_118] : memref<18x18x8xf32, #tpu.memory_space<vmem>>, vector<16x16x8xf32>
    %94 = vector.shape_cast %93 : vector<16x16x8xf32> to vector<256x8xf32>
    %c3_119 = arith.constant 3 : index
    %c0_120 = arith.constant 0 : index
    %c0_121 = arith.constant 0 : index
    %95 = vector.load %arg3[%c3_119, %c0_120, %c0_121] : memref<9x8x8xf32, #tpu.memory_space<vmem>>, vector<1x8x8xf32>
    %96 = vector.shape_cast %95 : vector<1x8x8xf32> to vector<8x8xf32>
    %cst_122 = arith.constant dense<0.000000e+00> : vector<256x8xf32>
    %97 = tpu.matmul %94, %96, %cst_122 {dimension_numbers = #tpu.dot_dimension_numbers<[1], [0], [0], [1], [0, 0, 1, 1], [], []>} : vector<256x8xf32>, vector<8x8xf32>, vector<256x8xf32> -> vector<256x8xf32>
    %98 = arith.addf %92, %97 : vector<256x8xf32>
    %c1_123 = arith.constant 1 : index
    %c1_124 = arith.constant 1 : index
    %c0_125 = arith.constant 0 : index
    %99 = vector.load %arg7[%c1_123, %c1_124, %c0_125] : memref<18x18x8xf32, #tpu.memory_space<vmem>>, vector<16x16x8xf32>
    %100 = vector.shape_cast %99 : vector<16x16x8xf32> to vector<256x8xf32>
    %c4_126 = arith.constant 4 : index
    %c0_127 = arith.constant 0 : index
    %c0_128 = arith.constant 0 : index
    %101 = vector.load %arg3[%c4_126, %c0_127, %c0_128] : memref<9x8x8xf32, #tpu.memory_space<vmem>>, vector<1x8x8xf32>
    %102 = vector.shape_cast %101 : vector<1x8x8xf32> to vector<8x8xf32>
    %cst_129 = arith.constant dense<0.000000e+00> : vector<256x8xf32>
    %103 = tpu.matmul %100, %102, %cst_129 {dimension_numbers = #tpu.dot_dimension_numbers<[1], [0], [0], [1], [0, 0, 1, 1], [], []>} : vector<256x8xf32>, vector<8x8xf32>, vector<256x8xf32> -> vector<256x8xf32>
    %104 = arith.addf %98, %103 : vector<256x8xf32>
    %c1_130 = arith.constant 1 : index
    %c2_131 = arith.constant 2 : index
    %c0_132 = arith.constant 0 : index
    %105 = vector.load %arg7[%c1_130, %c2_131, %c0_132] : memref<18x18x8xf32, #tpu.memory_space<vmem>>, vector<16x16x8xf32>
    %106 = vector.shape_cast %105 : vector<16x16x8xf32> to vector<256x8xf32>
    %c5_133 = arith.constant 5 : index
    %c0_134 = arith.constant 0 : index
    %c0_135 = arith.constant 0 : index
    %107 = vector.load %arg3[%c5_133, %c0_134, %c0_135] : memref<9x8x8xf32, #tpu.memory_space<vmem>>, vector<1x8x8xf32>
    %108 = vector.shape_cast %107 : vector<1x8x8xf32> to vector<8x8xf32>
    %cst_136 = arith.constant dense<0.000000e+00> : vector<256x8xf32>
    %109 = tpu.matmul %106, %108, %cst_136 {dimension_numbers = #tpu.dot_dimension_numbers<[1], [0], [0], [1], [0, 0, 1, 1], [], []>} : vector<256x8xf32>, vector<8x8xf32>, vector<256x8xf32> -> vector<256x8xf32>
    %110 = arith.addf %104, %109 : vector<256x8xf32>
    %c2_137 = arith.constant 2 : index
    %c0_138 = arith.constant 0 : index
    %c0_139 = arith.constant 0 : index
    %111 = vector.load %arg7[%c2_137, %c0_138, %c0_139] : memref<18x18x8xf32, #tpu.memory_space<vmem>>, vector<16x16x8xf32>
    %112 = vector.shape_cast %111 : vector<16x16x8xf32> to vector<256x8xf32>
    %c6_140 = arith.constant 6 : index
    %c0_141 = arith.constant 0 : index
    %c0_142 = arith.constant 0 : index
    %113 = vector.load %arg3[%c6_140, %c0_141, %c0_142] : memref<9x8x8xf32, #tpu.memory_space<vmem>>, vector<1x8x8xf32>
    %114 = vector.shape_cast %113 : vector<1x8x8xf32> to vector<8x8xf32>
    %cst_143 = arith.constant dense<0.000000e+00> : vector<256x8xf32>
    %115 = tpu.matmul %112, %114, %cst_143 {dimension_numbers = #tpu.dot_dimension_numbers<[1], [0], [0], [1], [0, 0, 1, 1], [], []>} : vector<256x8xf32>, vector<8x8xf32>, vector<256x8xf32> -> vector<256x8xf32>
    %116 = arith.addf %110, %115 : vector<256x8xf32>
    %c2_144 = arith.constant 2 : index
    %c1_145 = arith.constant 1 : index
    %c0_146 = arith.constant 0 : index
    %117 = vector.load %arg7[%c2_144, %c1_145, %c0_146] : memref<18x18x8xf32, #tpu.memory_space<vmem>>, vector<16x16x8xf32>
    %118 = vector.shape_cast %117 : vector<16x16x8xf32> to vector<256x8xf32>
    %c7_147 = arith.constant 7 : index
    %c0_148 = arith.constant 0 : index
    %c0_149 = arith.constant 0 : index
    %119 = vector.load %arg3[%c7_147, %c0_148, %c0_149] : memref<9x8x8xf32, #tpu.memory_space<vmem>>, vector<1x8x8xf32>
    %120 = vector.shape_cast %119 : vector<1x8x8xf32> to vector<8x8xf32>
    %cst_150 = arith.constant dense<0.000000e+00> : vector<256x8xf32>
    %121 = tpu.matmul %118, %120, %cst_150 {dimension_numbers = #tpu.dot_dimension_numbers<[1], [0], [0], [1], [0, 0, 1, 1], [], []>} : vector<256x8xf32>, vector<8x8xf32>, vector<256x8xf32> -> vector<256x8xf32>
    %122 = arith.addf %116, %121 : vector<256x8xf32>
    %c2_151 = arith.constant 2 : index
    %c2_152 = arith.constant 2 : index
    %c0_153 = arith.constant 0 : index
    %123 = vector.load %arg7[%c2_151, %c2_152, %c0_153] : memref<18x18x8xf32, #tpu.memory_space<vmem>>, vector<16x16x8xf32>
    %124 = vector.shape_cast %123 : vector<16x16x8xf32> to vector<256x8xf32>
    %c8_154 = arith.constant 8 : index
    %c0_155 = arith.constant 0 : index
    %c0_156 = arith.constant 0 : index
    %125 = vector.load %arg3[%c8_154, %c0_155, %c0_156] : memref<9x8x8xf32, #tpu.memory_space<vmem>>, vector<1x8x8xf32>
    %126 = vector.shape_cast %125 : vector<1x8x8xf32> to vector<8x8xf32>
    %cst_157 = arith.constant dense<0.000000e+00> : vector<256x8xf32>
    %127 = tpu.matmul %124, %126, %cst_157 {dimension_numbers = #tpu.dot_dimension_numbers<[1], [0], [0], [1], [0, 0, 1, 1], [], []>} : vector<256x8xf32>, vector<8x8xf32>, vector<256x8xf32> -> vector<256x8xf32>
    %128 = arith.addf %122, %127 : vector<256x8xf32>
    %cst_158 = arith.constant 0.000000e+00 : f32
    %129 = vector.broadcast %cst_158 : f32 to vector<256x8xf32>
    %130 = arith.maximumf %128, %129 : vector<256x8xf32>
    %c0_159 = arith.constant 0 : index
    %c0_160 = arith.constant 0 : index
    %131 = vector.load %arg4[%c0_159, %c0_160] : memref<4x8xf32, #tpu.memory_space<vmem>>, vector<4x8xf32>
    %cst_161 = arith.constant dense<0.000000e+00> : vector<256x8xf32>
    %132 = tpu.matmul %35, %131, %cst_161 {dimension_numbers = #tpu.dot_dimension_numbers<[1], [0], [0], [1], [0, 0, 1, 1], [], []>} : vector<256x4xf32>, vector<4x8xf32>, vector<256x8xf32> -> vector<256x8xf32>
    %133 = arith.addf %130, %132 : vector<256x8xf32>
    %c0_162 = arith.constant 0 : index
    %c0_163 = arith.constant 0 : index
    %c0_164 = arith.constant 0 : index
    %134 = vector.load %arg5[%c0_162, %c0_163, %c0_164] : memref<1x256x8xf32, #tpu.memory_space<vmem>>, vector<1x256x8xf32>
    %135 = vector.shape_cast %134 : vector<1x256x8xf32> to vector<256x8xf32>
    %136 = vector.shape_cast %133 : vector<256x8xf32> to vector<1x256x8xf32>
    tpu.vector_store %arg5[%c0_162, %c0_163, %c0_164], %136 {strides = array<i32>} : memref<1x256x8xf32, #tpu.memory_space<vmem>>, vector<1x256x8xf32>,
    return
  }
  func.func @transform_0(%arg0: i32) -> (i32, i32, i32, i32) {
    %c0_i32 = arith.constant 0 : i32
    %c0_i32_0 = arith.constant 0 : i32
    %c0_i32_1 = arith.constant 0 : i32
    %c0_i32_2 = arith.constant 0 : i32
    return %arg0, %c0_i32, %c0_i32_0, %c0_i32_1 : i32, i32, i32, i32
  }
  func.func @transform_1(%arg0: i32) -> (i32, i32, i32) {
    %c0_i32 = arith.constant 0 : i32
    %c0_i32_0 = arith.constant 0 : i32
    %c0_i32_1 = arith.constant 0 : i32
    %c0_i32_2 = arith.constant 0 : i32
    return %c0_i32, %c0_i32_0, %c0_i32_1 : i32, i32, i32
  }
  func.func @transform_2(%arg0: i32) -> (i32, i32, i32) {
    %c0_i32 = arith.constant 0 : i32
    %c0_i32_0 = arith.constant 0 : i32
    %c0_i32_1 = arith.constant 0 : i32
    %c0_i32_2 = arith.constant 0 : i32
    return %c0_i32, %c0_i32_0, %c0_i32_1 : i32, i32, i32
  }
  func.func @transform_3(%arg0: i32) -> (i32, i32) {
    %c0_i32 = arith.constant 0 : i32
    %c0_i32_0 = arith.constant 0 : i32
    %c0_i32_1 = arith.constant 0 : i32
    return %c0_i32, %c0_i32_0 : i32, i32
  }
  func.func @transform_4(%arg0: i32) -> (i32, i32, i32) {
    %c0_i32 = arith.constant 0 : i32
    %c0_i32_0 = arith.constant 0 : i32
    %c0_i32_1 = arith.constant 0 : i32
    return %arg0, %c0_i32, %c0_i32_0 : i32, i32, i32
  }
}

</mosaic_0001>

<bundles_post_ra>
// kernel: basic_block_forward.1
= control target key start
LH: loop header
LB: loop body
LE: loop exit
PB: predicated region body
PF: predicated region fallthrough
CT: control target
= control target key end

     0   :  { %s10478_s15 = smov 0   ;;  %s12590_s0 = inlined_call_operand.vmem [shape: f32[2,16,16,4], index: 0, kind: input, shape index: {}]   ;;  %s12591_s1 = inlined_call_operand.vmem [shape: f32[9,4,8], index: 1, kind: input, shape index: {}]   ;;  %s12592_s2 = inlined_call_operand.vmem [shape: f32[9,8,8], index: 2, kind: input, shape index: {}]   ;;  %s12593_s3 = inlined_call_operand.vmem [shape: f32[4,8], index: 3, kind: input, shape index: {}]   ;;  %s12594_s4 = inlined_call_operand.vmem [shape: f32[2,256,8], index: 4, kind: output, shape index: {}]  }
   0x1 LB: > { %s7666_s16 = sadd.s32 4294967295, %s10450_s15   ;;  %p7670_p0 = scmp.ge.s32.totalorder %s10450_s15, 1  ;;  %s10450_s15 = sphi %s10478_s15, %s14_s15  }
   0x2   : > { %p162_p1 = scmp.lt.s32.totalorder %s10450_s15, 3 }
   0x4   : > { %p163_p2 = pnand %p7670_p0, %p162_p1 }
   0x6   : > { %166 = sbr.rel (%p163_p2) target bundleno = 1532 (0x5fc), region = 36 }
   0xd   : > { %v7675_v0 = vld [vmem:[%s12591_s1 + $0x4] sm:$0xf]  ;;  %vm472_vm0 = vcmask 1043456   ;;  %vm198_vm1 = vcmask 31744   ;;  %vm201_vm2 = vcmask 25600   ;;  %v12595_v1 = vmov 0.0  }
   0xe   : > { %8940 = vmatprep.subr.msk.mxu0 %vm472_vm0, %v7675_v0  ;;  %199 = vst.msk [vmem:[#allocation2] sm:$0xff] %vm198_vm1, %v12595_v1  ;;  %200 = vst.msk [vmem:[#allocation2 + $0x8] sm:$0xff] %vm198_vm1, %v12595_v1  ;;  %v10501_v2 = vld [vmem:[%s12591_s1] sm:$0xf]  ;;  %vm207_vm3 = vcmask 24576   ;;  %p10507_p3 = scmp.lt.s32.totalorder %s7666_s16, 1  ;;  %9890 = vmatprep.subr.msk.mxu1 %vm472_vm0, %v7675_v0 }
   0xf   : > { %204 = vst.msk [vmem:[#allocation2 + $0x198] sm:$0xff] %vm198_vm1, %v12595_v1  ;;  %205 = vst.msk [vmem:[#allocation2 + $0x1a0] sm:$0xff] %vm198_vm1, %v12595_v1  ;;  %8941 = vmatpush3.msk.msra.mxu0 %vm472_vm0, %v7675_v0  ;;  %9891 = vmatpush3.msk.msra.mxu1 %vm472_vm0, %v7675_v0  ;;  %v10608_v6 = vld [vmem:[%s12591_s1 + $0x8] sm:$0xf]  ;;  %v10735_v53 = vld [vmem:[%s12591_s1 + $0xc] sm:$0xf] }
  0x10   : > { %202 = vst.msk [vmem:[#allocation2 + $0x10] sm:$0x3] %vm201_vm2, %v12595_v1  ;;  %206 = vst.msk [vmem:[#allocation2 + $0x1a8] sm:$0x3] %vm201_vm2, %v12595_v1  ;;  %8990 = vmatprep.subr.msk.mxu0 %vm472_vm0, %v10501_v2  ;;  %s12880_s16 = smov (!%p10507_p3, %s7666_s16), 1  ;;  %vm3788_vm4 = vcmask 64512  }
  0x11   : > { %226 = vst.msk [vmem:[#allocation2 + $0x11] sm:$0x1] %vm207_vm3, %v12595_v1  ;;  %208 = vst.msk [vmem:[#allocation2] sm:$0x1] %vm207_vm3, %v12595_v1  ;;  %s8311_s22 = sshll.u32 %s12880_s16, 8  ;;  %vm3791_vm5 = vcmask 58368  }
  0x12   : > { %209 = vst.msk [vmem:[#allocation2 + $0x18] sm:$0x1] %vm207_vm3, %v12595_v1  ;;  %210 = vst.msk [vmem:[#allocation2 + $0x30] sm:$0x1] %vm207_vm3, %v12595_v1  ;;  %s10600_s25 = scalar_lea.vmem %s12590_s0, %s8311_s22  ;;  %vm3797_vm6 = vcmask 57344   ;;  %s12499_s13 = scalar_lea.vmem %s12594_s4, %s8311_s22 }
  0x13   : > { %211 = vst.msk [vmem:[#allocation2 + $0x48] sm:$0x1] %vm207_vm3, %v12595_v1  ;;  %212 = vst.msk [vmem:[#allocation2 + $0x60] sm:$0x1] %vm207_vm3, %v12595_v1  ;;  %v244_v3 = vld [vmem:[%s10600_s25] sm:$0xff]  ;;  %v245_v4 = vld [vmem:[%s10600_s25 + $0x8] sm:$0xff] }
  0x14   : > { %213 = vst.msk [vmem:[#allocation2 + $0x78] sm:$0x1] %vm207_vm3, %v12595_v1  ;;  %214 = vst.msk [vmem:[#allocation2 + $0x90] sm:$0x1] %vm207_vm3, %v12595_v1  ;;  %v246_v5 = vld [vmem:[%s10600_s25 + $0x10] sm:$0xff]  ;;  %v247_v9 = vld [vmem:[%s10600_s25 + $0x18] sm:$0xff] }
  0x15   : > { %215 = vst.msk [vmem:[#allocation2 + $0xa8] sm:$0x1] %vm207_vm3, %v12595_v1  ;;  %216 = vst.msk [vmem:[#allocation2 + $0xc0] sm:$0x1] %vm207_vm3, %v12595_v1  ;;  %v342_v7 = vld [vmem:[#allocation2 + $0x1] sm:$0xff]  ;;  %v250_v12 = vld [vmem:[%s10600_s25 + $0x30] sm:$0xff] }
  0x16   : > { %217 = vst.msk [vmem:[#allocation2 + $0xd8] sm:$0x1] %vm207_vm3, %v12595_v1  ;;  %218 = vst.msk [vmem:[#allocation2 + $0xf0] sm:$0x1] %vm207_vm3, %v12595_v1  ;;  %8942 = vmatprep.mubr.msk.f32.mxu0 %vm198_vm1, %v342_v7  ;;  %v248_v10 = vld [vmem:[%s10600_s25 + $0x20] sm:$0xff]  ;;  %v249_v11 = vld [vmem:[%s10600_s25 + $0x28] sm:$0xff] }
  0x17   : > { %219 = vst.msk [vmem:[#allocation2 + $0x108] sm:$0x1] %vm207_vm3, %v12595_v1  ;;  %220 = vst.msk [vmem:[#allocation2 + $0x120] sm:$0x1] %vm207_vm3, %v12595_v1  ;;  %v343_v8 = vld [vmem:[#allocation2 + $0x9] sm:$0xff]  ;;  %v251_v13 = vld [vmem:[%s10600_s25 + $0x38] sm:$0xff] }
  0x18   : > { %221 = vst.msk [vmem:[#allocation2 + $0x138] sm:$0x1] %vm207_vm3, %v12595_v1  ;;  %222 = vst.msk [vmem:[#allocation2 + $0x150] sm:$0x1] %vm207_vm3, %v12595_v1  ;;  %8943 = vmatmul.mubr.msk.f32.vlgmr.msra.gmra.mrb[0].mxu0 %vm198_vm1, %v343_v8  ;;  %v252_v14 = vld [vmem:[%s10600_s25 + $0x40] sm:$0xff]  ;;  %v253_v15 = vld [vmem:[%s10600_s25 + $0x48] sm:$0xff] }
  0x19   : > { %223 = vst.msk [vmem:[#allocation2 + $0x168] sm:$0x1] %vm207_vm3, %v12595_v1  ;;  %224 = vst.msk [vmem:[#allocation2 + $0x180] sm:$0x1] %vm207_vm3, %v12595_v1  ;;  %8991 = vmatpush3.msk.msra.mxu0 %vm472_vm0, %v10501_v2  ;;  %v254_v16 = vld [vmem:[%s10600_s25 + $0x50] sm:$0xff]  ;;  %v255_v17 = vld [vmem:[%s10600_s25 + $0x58] sm:$0xff] }
  0x1a   : > { %225 = vst.msk [vmem:[#allocation2 + $0x198] sm:$0x1] %vm207_vm3, %v12595_v1  ;;  %227 = vst.msk [vmem:[#allocation2 + $0x29] sm:$0x1] %vm207_vm3, %v12595_v1  ;;  %v256_v18 = vld [vmem:[%s10600_s25 + $0x60] sm:$0xff]  ;;  %v257_v19 = vld [vmem:[%s10600_s25 + $0x68] sm:$0xff]  ;;  %9040 = vmatprep.subr.msk.mxu0 %vm472_vm0, %v10608_v6 }
  0x1b   : > { %228 = vst.msk [vmem:[#allocation2 + $0x41] sm:$0x1] %vm207_vm3, %v12595_v1  ;;  %229 = vst.msk [vmem:[#allocation2 + $0x59] sm:$0x1] %vm207_vm3, %v12595_v1  ;;  %v258_v20 = vld [vmem:[%s10600_s25 + $0x70] sm:$0xff]  ;;  %v259_v21 = vld [vmem:[%s10600_s25 + $0x78] sm:$0xff] }
  0x1c   : > { %230 = vst.msk [vmem:[#allocation2 + $0x71] sm:$0x1] %vm207_vm3, %v12595_v1  ;;  %231 = vst.msk [vmem:[#allocation2 + $0x89] sm:$0x1] %vm207_vm3, %v12595_v1  ;;  %v260_v22 = vld [vmem:[%s10600_s25 + $0x80] sm:$0xff]  ;;  %v261_v23 = vld [vmem:[%s10600_s25 + $0x88] sm:$0xff] }
  0x1d   : > { %232 = vst.msk [vmem:[#allocation2 + $0xa1] sm:$0x1] %vm207_vm3, %v12595_v1  ;;  %233 = vst.msk [vmem:[#allocation2 + $0xb9] sm:$0x1] %vm207_vm3, %v12595_v1  ;;  %v262_v24 = vld [vmem:[%s10600_s25 + $0x90] sm:$0xff]  ;;  %v263_v25 = vld [vmem:[%s10600_s25 + $0x98] sm:$0xff] }
  0x1e   : > { %234 = vst.msk [vmem:[#allocation2 + $0xd1] sm:$0x1] %vm207_vm3, %v12595_v1  ;;  %235 = vst.msk [vmem:[#allocation2 + $0xe9] sm:$0x1] %vm207_vm3, %v12595_v1  ;;  %v264_v35 = vld [vmem:[%s10600_s25 + $0xa0] sm:$0xff]  ;;  %v265_v36 = vld [vmem:[%s10600_s25 + $0xa8] sm:$0xff] }
  0x1f   : > { %236 = vst.msk [vmem:[#allocation2 + $0x101] sm:$0x1] %vm207_vm3, %v12595_v1  ;;  %237 = vst.msk [vmem:[#allocation2 + $0x119] sm:$0x1] %vm207_vm3, %v12595_v1  ;;  %v266_v37 = vld [vmem:[%s10600_s25 + $0xb0] sm:$0xff]  ;;  %v267_v38 = vld [vmem:[%s10600_s25 + $0xb8] sm:$0xff] }
  0x20   : > { %238 = vst.msk [vmem:[#allocation2 + $0x131] sm:$0x1] %vm207_vm3, %v12595_v1  ;;  %239 = vst.msk [vmem:[#allocation2 + $0x149] sm:$0x1] %vm207_vm3, %v12595_v1  ;;  %v268_v39 = vld [vmem:[%s10600_s25 + $0xc0] sm:$0xff]  ;;  %v269_v40 = vld [vmem:[%s10600_s25 + $0xc8] sm:$0xff] }
  0x21   : > { %240 = vst.msk [vmem:[#allocation2 + $0x161] sm:$0x1] %vm207_vm3, %v12595_v1  ;;  %241 = vst.msk [vmem:[#allocation2 + $0x179] sm:$0x1] %vm207_vm3, %v12595_v1  ;;  %v270_v41 = vld [vmem:[%s10600_s25 + $0xd0] sm:$0xff]  ;;  %v271_v42 = vld [vmem:[%s10600_s25 + $0xd8] sm:$0xff] }
  0x22   : > { %242 = vst.msk [vmem:[#allocation2 + $0x191] sm:$0x1] %vm207_vm3, %v12595_v1  ;;  %243 = vst.msk [vmem:[#allocation2 + $0x1a9] sm:$0x1] %vm207_vm3, %v12595_v1  ;;  %v272_v43 = vld [vmem:[%s10600_s25 + $0xe0] sm:$0xff]  ;;  %v273_v44 = vld [vmem:[%s10600_s25 + $0xe8] sm:$0xff] }
  0x23   : > { %277 = vst.msk [vmem:[#allocation2 + $0x19] sm:$0xff] %vm198_vm1, %v244_v3  ;;  %278 = vst.msk [vmem:[#allocation2 + $0x21] sm:$0xff] %vm198_vm1, %v245_v4  ;;  %v309_v50 = vld [vmem:[#allocation2] sm:$0xff]  ;;  %v310_v51 = vld [vmem:[#allocation2 + $0x8] sm:$0xff] }
  0x24   : > { %279 = vst.msk [vmem:[#allocation2 + $0x31] sm:$0xff] %vm198_vm1, %v246_v5  ;;  %280 = vst.msk [vmem:[#allocation2 + $0x39] sm:$0xff] %vm198_vm1, %v247_v9 }
  0x25   : > { %281 = vst.msk [vmem:[#allocation2 + $0x49] sm:$0xff] %vm198_vm1, %v248_v10  ;;  %282 = vst.msk [vmem:[#allocation2 + $0x51] sm:$0xff] %vm198_vm1, %v249_v11 }
  0x26   : > { %283 = vst.msk [vmem:[#allocation2 + $0x61] sm:$0xff] %vm198_vm1, %v250_v12  ;;  %284 = vst.msk [vmem:[#allocation2 + $0x69] sm:$0xff] %vm198_vm1, %v251_v13 }
  0x27   : > { %285 = vst.msk [vmem:[#allocation2 + $0x79] sm:$0xff] %vm198_vm1, %v252_v14  ;;  %286 = vst.msk [vmem:[#allocation2 + $0x81] sm:$0xff] %vm198_vm1, %v253_v15 }
  0x28   : > { %287 = vst.msk [vmem:[#allocation2 + $0x91] sm:$0xff] %vm198_vm1, %v254_v16  ;;  %288 = vst.msk [vmem:[#allocation2 + $0x99] sm:$0xff] %vm198_vm1, %v255_v17  ;;  %v274_v17 = vld [vmem:[%s10600_s25 + $0xf0] sm:$0xff] }
  0x29   : > { %289 = vst.msk [vmem:[#allocation2 + $0xa9] sm:$0xff] %vm198_vm1, %v256_v18  ;;  %290 = vst.msk [vmem:[#allocation2 + $0xb1] sm:$0xff] %vm198_vm1, %v257_v19  ;;  %v275_v18 = vld [vmem:[%s10600_s25 + $0xf8] sm:$0xff] }
  0x2a   : > { %291 = vst.msk [vmem:[#allocation2 + $0xc1] sm:$0xff] %vm198_vm1, %v258_v20  ;;  %292 = vst.msk [vmem:[#allocation2 + $0xc9] sm:$0xff] %vm198_vm1, %v259_v21  ;;  %v10650_v26 = vld [vmem:[#allocation2 + $0x19] sm:$0xff]  ;;  %v10652_v27 = vld [vmem:[#allocation2 + $0x21] sm:$0xff] }
  0x2b   : > { %293 = vst.msk [vmem:[#allocation2 + $0xd9] sm:$0xff] %vm198_vm1, %v260_v22  ;;  %12716 = vst [vmem:[#allocation4_spill] sm:$0xff] %v10650_v26  ;;  %v10654_v28 = vld [vmem:[#allocation2 + $0x31] sm:$0xff]  ;;  %8945 = vmatprep.mubr.msk.f32.mxu0 %vm198_vm1, %v10650_v26  ;;  %v10665_v29 = vld [vmem:[#allocation2 + $0x39] sm:$0xff] }
  0x2c   : > { %294 = vst.msk [vmem:[#allocation2 + $0xe1] sm:$0xff] %vm198_vm1, %v261_v23  ;;  %295 = vst.msk [vmem:[#allocation2 + $0xf1] sm:$0xff] %vm198_vm1, %v262_v24  ;;  %8946 = vmatmul.mubr.msk.f32.gmra.mrb[2].mxu0 %vm198_vm1, %v10652_v27  ;;  %v10667_v30 = vld [vmem:[#allocation2 + $0x49] sm:$0xff]  ;;  %v10673_v31 = vld [vmem:[#allocation2 + $0x51] sm:$0xff] }
  0x2d   : > { %296 = vst.msk [vmem:[#allocation2 + $0xf9] sm:$0xff] %vm198_vm1, %v263_v25  ;;  %8948 = vmatprep.mubr.msk.f32.mxu0 %vm198_vm1, %v10654_v28  ;;  %v10675_v32 = vld [vmem:[#allocation2 + $0x61] sm:$0xff]  ;;  %v10679_v33 = vld [vmem:[#allocation2 + $0x69] sm:$0xff]  ;;  %297 = vst.msk [vmem:[#allocation2 + $0x109] sm:$0xff] %vm198_vm1, %v264_v35 }
  0x2e   : > { %v10683_v34 = vld [vmem:[#allocation2 + $0x79] sm:$0xff]  ;;  %298 = vst.msk [vmem:[#allocation2 + $0x111] sm:$0xff] %vm198_vm1, %v265_v36  ;;  %299 = vst.msk [vmem:[#allocation2 + $0x121] sm:$0xff] %vm198_vm1, %v266_v37  ;;  %v10707_v45 = vld [vmem:[#allocation2 + $0x81] sm:$0xff] }
  0x2f   : > { %300 = vst.msk [vmem:[#allocation2 + $0x129] sm:$0xff] %vm198_vm1, %v267_v38  ;;  %301 = vst.msk [vmem:[#allocation2 + $0x139] sm:$0xff] %vm198_vm1, %v268_v39  ;;  %v10711_v46 = vld [vmem:[#allocation2 + $0x91] sm:$0xff]  ;;  %v10717_v47 = vld [vmem:[#allocation2 + $0x99] sm:$0xff] }
  0x30   : > { %8949 = vmatmul.mubr.msk.f32.gmra.mrb[4].mxu0 %vm198_vm1, %v10665_v29  ;;  %302 = vst.msk [vmem:[#allocation2 + $0x141] sm:$0xff] %vm198_vm1, %v269_v40  ;;  %303 = vst.msk [vmem:[#allocation2 + $0x151] sm:$0xff] %vm198_vm1, %v270_v41  ;;  %v10719_v48 = vld [vmem:[#allocation2 + $0xa9] sm:$0xff]  ;;  %v10725_v49 = vld [vmem:[#allocation2 + $0xb1] sm:$0xff] }
  0x31   : > { %8951 = vmatprep.mubr.msk.f32.mxu0 %vm198_vm1, %v10667_v30  ;;  %304 = vst.msk [vmem:[#allocation2 + $0x159] sm:$0xff] %vm198_vm1, %v271_v42  ;;  %305 = vst.msk [vmem:[#allocation2 + $0x169] sm:$0xff] %vm198_vm1, %v272_v43  ;;  %v10730_v52 = vld [vmem:[#allocation2 + $0x18] sm:$0xff]  ;;  %v10742_v54 = vld [vmem:[#allocation2 + $0x20] sm:$0xff] }
  0x32   : > { %306 = vst.msk [vmem:[#allocation2 + $0x171] sm:$0xff] %vm198_vm1, %v273_v44  ;;  %v10744_v55 = vld [vmem:[#allocation2 + $0x30] sm:$0xff]  ;;  %v10752_v56 = vld [vmem:[#allocation2 + $0x38] sm:$0xff]  ;;  %v10754_v57 = vld [vmem:[#allocation2 + $0x48] sm:$0xff] }
  0x33   : > { %v10760_v58 = vld [vmem:[#allocation2 + $0x50] sm:$0xff]  ;;  %v10762_v59 = vld [vmem:[#allocation2 + $0x60] sm:$0xff]  ;;  %v10768_v60 = vld [vmem:[#allocation2 + $0x68] sm:$0xff]  ;;  %307 = vst.msk [vmem:[#allocation2 + $0x181] sm:$0xff] %vm198_vm1, %v274_v17 }
  0x34   : > { %8952 = vmatmul.mubr.msk.f32.gmra.mrb[6].mxu0 %vm198_vm1, %v10673_v31  ;;  %v10770_v61 = vld [vmem:[#allocation2 + $0x78] sm:$0xff]  ;;  %v10776_v62 = vld [vmem:[#allocation2 + $0x80] sm:$0xff]  ;;  %v10778_v63 = vld [vmem:[#allocation2 + $0x90] sm:$0xff]  ;;  %308 = vst.msk [vmem:[#allocation2 + $0x189] sm:$0xff] %vm198_vm1, %v275_v18 }
  0x35   : > { %8954 = vmatprep.mubr.msk.f32.mxu0 %vm198_vm1, %v10675_v32  ;;  %v10784_v0 = vld [vmem:[#allocation2 + $0x98] sm:$0xff]  ;;  %v10786_v2 = vld [vmem:[#allocation2 + $0xa8] sm:$0xff]  ;;  %v10792_v3 = vld [vmem:[#allocation2 + $0xb0] sm:$0xff] }
  0x36   : > { %v10794_v4 = vld [vmem:[#allocation2 + $0xc0] sm:$0xff]  ;;  %v10800_v5 = vld [vmem:[#allocation2 + $0xc8] sm:$0xff]  ;;  %v10810_v8 = vld [vmem:[#allocation2 + $0xf0] sm:$0xff] }
  0x37   : > { %v10808_v7 = vld [vmem:[#allocation2 + $0xe0] sm:$0xff]  ;;  %v10816_v9 = vld [vmem:[#allocation2 + $0xf8] sm:$0xff]  ;;  %v10818_v10 = vld [vmem:[#allocation2 + $0x108] sm:$0xff] }
  0x38   : > { %8955 = vmatmul.mubr.msk.f32.gmra.mrb[8].mxu0 %vm198_vm1, %v10679_v33  ;;  %v10824_v11 = vld [vmem:[#allocation2 + $0x110] sm:$0xff]  ;;  %v10826_v12 = vld [vmem:[#allocation2 + $0x120] sm:$0xff]  ;;  %v10832_v13 = vld [vmem:[#allocation2 + $0x128] sm:$0xff] }
  0x39   : > { %8957 = vmatprep.mubr.msk.f32.mxu0 %vm198_vm1, %v10683_v34  ;;  %v10834_v14 = vld [vmem:[#allocation2 + $0x138] sm:$0xff]  ;;  %v10840_v15 = vld [vmem:[#allocation2 + $0x140] sm:$0xff]  ;;  %v10842_v16 = vld [vmem:[#allocation2 + $0x150] sm:$0xff] }
  0x3a   : > { %v10852_v19 = vld [vmem:[#allocation2 + $0x158] sm:$0xff]  ;;  %v10854_v20 = vld [vmem:[#allocation2 + $0x168] sm:$0xff]  ;;  %v10860_v21 = vld [vmem:[#allocation2 + $0x170] sm:$0xff] }
  0x3b   : > { %v1025_v22 = vld [vmem:[#allocation2 + $0x2] sm:$0xff]  ;;  %v1026_v23 = vld [vmem:[#allocation2 + $0xa] sm:$0xff]  ;;  %v10865_v24 = vld [vmem:[#allocation2 + $0x1a] sm:$0xff] }
  0x3c   : > { %8958 = vmatmul.mubr.msk.f32.gmra.mrb[10].mxu0 %vm198_vm1, %v10707_v45  ;;  %12717 = vst [vmem:[#allocation5_spill] sm:$0xff] %v10865_v24  ;;  %v10870_v25 = vld [vmem:[%s12591_s1 + $0x10] sm:$0xf]  ;;  %v10877_v35 = vld [vmem:[#allocation2 + $0x22] sm:$0xff]  ;;  %v10887_v37 = vld [vmem:[#allocation2 + $0x3a] sm:$0xff] }
  0x3d   : > { %8960 = vmatprep.mubr.msk.f32.mxu0 %vm198_vm1, %v10711_v46  ;;  %12718 = vst [vmem:[#allocation6_spill] sm:$0xff] %v10877_v35  ;;  %v10879_v36 = vld [vmem:[#allocation2 + $0x32] sm:$0xff]  ;;  %12720 = vst [vmem:[#allocation8_spill] sm:$0xff] %v10887_v37  ;;  %v10889_v38 = vld [vmem:[#allocation2 + $0x4a] sm:$0xff] }
  0x3e   : > { %12719 = vst [vmem:[#allocation7_spill] sm:$0xff] %v10879_v36  ;;  %12721 = vst [vmem:[#allocation9_spill] sm:$0xff] %v10889_v38  ;;  %v10895_v39 = vld [vmem:[#allocation2 + $0x52] sm:$0xff]  ;;  %v10897_v40 = vld [vmem:[#allocation2 + $0x62] sm:$0xff] }
  0x3f   : > { %12722 = vst [vmem:[#allocation10_spill] sm:$0xff] %v10895_v39  ;;  %12723 = vst [vmem:[#allocation11_spill] sm:$0xff] %v10897_v40  ;;  %v10903_v41 = vld [vmem:[#allocation2 + $0x6a] sm:$0xff]  ;;  %v10905_v42 = vld [vmem:[#allocation2 + $0x7a] sm:$0xff] }
  0x40   : > { %8961 = vmatmul.mubr.msk.f32.gmra.mrb[12].mxu0 %vm198_vm1, %v10717_v47  ;;  %12724 = vst [vmem:[#allocation12_spill] sm:$0xff] %v10903_v41  ;;  %12725 = vst [vmem:[#allocation13_spill] sm:$0xff] %v10905_v42  ;;  %v10911_v43 = vld [vmem:[#allocation2 + $0x82] sm:$0xff]  ;;  %v10913_v44 = vld [vmem:[#allocation2 + $0x92] sm:$0xff] }
  0x41   : > { %8963 = vmatprep.mubr.msk.f32.mxu0 %vm198_vm1, %v10719_v48  ;;  %12726 = vst [vmem:[#allocation14_spill] sm:$0xff] %v10911_v43  ;;  %12727 = vst [vmem:[#allocation15_spill] sm:$0xff] %v10913_v44  ;;  %v10929_v17 = vld [vmem:[#allocation2 + $0xb2] sm:$0xff]  ;;  %v10931_v18 = vld [vmem:[#allocation2 + $0xc9] sm:$0xff] }
  0x42   : > { %12730 = vst [vmem:[#allocation18_spill] sm:$0xff] %v10929_v17  ;;  %v10945_v1 = vld [vmem:[#allocation2 + $0xca] sm:$0xff] }
  0x43   : > { %12732 = vst [vmem:[#allocation20_spill] sm:$0xff] %v10945_v1 }
  0x44   : > { %8964 = vmatmul.mubr.msk.f32.gmra.mrb[14].mxu0 %vm198_vm1, %v10725_v49 }
  0x45   : > { %8992 = vmatprep.mubr.msk.f32.mxu0 %vm198_vm1, %v309_v50  ;;  %v10919_v50 = vld [vmem:[#allocation2 + $0x9a] sm:$0xff] }
  0x46   : > { %12728 = vst [vmem:[#allocation16_spill] sm:$0xff] %v10919_v50 }
  0x48   : > { %8993 = vmatmul.mubr.msk.f32.vlgmr.msra.gmra.mrb[0].mxu0 %vm198_vm1, %v310_v51  ;;  %v10921_v51 = vld [vmem:[#allocation2 + $0xaa] sm:$0xff] }
  0x49   : > { %9041 = vmatpush3.msk.msra.mxu0 %vm472_vm0, %v10608_v6  ;;  %8995 = vmatprep.mubr.msk.f32.mxu0 %vm198_vm1, %v10730_v52  ;;  %v10802_v6 = vld [vmem:[#allocation2 + $0xd8] sm:$0xff]  ;;  %12729 = vst [vmem:[#allocation17_spill] sm:$0xff] %v10921_v51 }
  0x4a   : > { %9090 = vmatprep.subr.msk.mxu0 %vm472_vm0, %v10735_v53 }
  0x4c   : > { %8996 = vmatmul.mubr.msk.f32.gmra.mrb[2].mxu0 %vm198_vm1, %v10742_v54 }
  0x4d   : > { %8998 = vmatprep.mubr.msk.f32.mxu0 %vm198_vm1, %v10744_v55 }
  0x50   : > { %8999 = vmatmul.mubr.msk.f32.gmra.mrb[4].mxu0 %vm198_vm1, %v10752_v56 }
  0x51   : > { %9001 = vmatprep.mubr.msk.f32.mxu0 %vm198_vm1, %v10754_v57 }
  0x54   : > { %9002 = vmatmul.mubr.msk.f32.gmra.mrb[6].mxu0 %vm198_vm1, %v10760_v58 }
  0x55   : > { %9004 = vmatprep.mubr.msk.f32.mxu0 %vm198_vm1, %v10762_v59 }
  0x58   : > { %9005 = vmatmul.mubr.msk.f32.gmra.mrb[8].mxu0 %vm198_vm1, %v10768_v60 }
  0x59   : > { %9007 = vmatprep.mubr.msk.f32.mxu0 %vm198_vm1, %v10770_v61 }
  0x5c   : > { %9008 = vmatmul.mubr.msk.f32.gmra.mrb[10].mxu0 %vm198_vm1, %v10776_v62 }
  0x5d   : > { %9010 = vmatprep.mubr.msk.f32.mxu0 %vm198_vm1, %v10778_v63 }
  0x60   : > { %9011 = vmatmul.mubr.msk.f32.gmra.mrb[12].mxu0 %vm198_vm1, %v10784_v0 }
  0x61   : > { %9013 = vmatprep.mubr.msk.f32.mxu0 %vm198_vm1, %v10786_v2 }
  0x64   : > { %9014 = vmatmul.mubr.msk.f32.gmra.mrb[14].mxu0 %vm198_vm1, %v10792_v3 }
  0x65   : > { %9016 = vmatprep.mubr.msk.f32.mxu0 %vm198_vm1, %v10794_v4 }
  0x68   : > { %9017 = vmatmul.mubr.msk.f32.gmra.mrb[16].mxu0 %vm198_vm1, %v10800_v5 }
  0x69   : > { %9019 = vmatprep.mubr.msk.f32.mxu0 %vm198_vm1, %v10802_v6 }
  0x6c   : > { %9020 = vmatmul.mubr.msk.f32.gmra.mrb[18].mxu0 %vm198_vm1, %v10808_v7 }
  0x6d   : > { %9022 = vmatprep.mubr.msk.f32.mxu0 %vm198_vm1, %v10810_v8 }
  0x70   : > { %9023 = vmatmul.mubr.msk.f32.gmra.mrb[20].mxu0 %vm198_vm1, %v10816_v9 }
  0x71   : > { %9025 = vmatprep.mubr.msk.f32.mxu0 %vm198_vm1, %v10818_v10 }
  0x74   : > { %9026 = vmatmul.mubr.msk.f32.gmra.mrb[22].mxu0 %vm198_vm1, %v10824_v11 }
  0x75   : > { %9028 = vmatprep.mubr.msk.f32.mxu0 %vm198_vm1, %v10826_v12 }
  0x78   : > { %9029 = vmatmul.mubr.msk.f32.gmra.mrb[24].mxu0 %vm198_vm1, %v10832_v13 }
  0x79   : > { %9031 = vmatprep.mubr.msk.f32.mxu0 %vm198_vm1, %v10834_v14 }
  0x7c   : > { %9032 = vmatmul.mubr.msk.f32.gmra.mrb[26].mxu0 %vm198_vm1, %v10840_v15 }
  0x7d   : > { %9034 = vmatprep.mubr.msk.f32.mxu0 %vm198_vm1, %v10842_v16 }
  0x80   : > { %9035 = vmatmul.mubr.msk.f32.gmra.mrb[28].mxu0 %vm198_vm1, %v10852_v19 }
  0x81   : > { %9037 = vmatprep.mubr.msk.f32.mxu0 %vm198_vm1, %v10854_v20 }
  0x84   : > { %9038 = vmatmul.mubr.msk.f32.gmra.mrb[30].mxu0 %vm198_vm1, %v10860_v21 }
  0x85   : > { %9042 = vmatprep.mubr.msk.f32.mxu0 %vm198_vm1, %v1025_v22  ;;  %v10935_v22 = vld [vmem:[#allocation2 + $0xc2] sm:$0xff] }
  0x86   : > { %12731 = vst [vmem:[#allocation19_spill] sm:$0xff] %v10935_v22 }
  0x88   : > { %9043 = vmatmul.mubr.msk.f32.vlgmr.msra.gmra.mrb[0].mxu0 %vm198_vm1, %v1026_v23  ;;  %v10941_v23 = vld [vmem:[#allocation2 + $0xd9] sm:$0xff] }
  0x89   : > { %9091 = vmatpush3.msk.msra.mxu0 %vm472_vm0, %v10735_v53  ;;  %9045 = vmatprep.mubr.msk.f32.mxu0 %vm198_vm1, %v10865_v24  ;;  %v10925_v53 = vld [vmem:[#allocation2 + $0xc1] sm:$0xff]  ;;  %v11043_v24 = vld [vmem:[#allocation2 + $0x171] sm:$0xff] }
  0x8a   : > { %9140 = vmatprep.subr.msk.mxu0 %vm472_vm0, %v10870_v25  ;;  %8966 = vmatprep.mubr.msk.f32.mxu1 %vm198_vm1, %v10925_v53  ;;  %12749 = vst [vmem:[#allocation37_spill] sm:$0xff] %v11043_v24 }
  0x8b   : > { %8967 = vmatmul.mubr.msk.f32.vlgmr.msra.gmra.mrb[0].mxu1 %vm198_vm1, %v10931_v18 }
  0x8c   : > { %9046 = vmatmul.mubr.msk.f32.gmra.mrb[2].mxu0 %vm198_vm1, %v10877_v35  ;;  %8969 = vmatprep.mubr.msk.f32.mxu1 %vm198_vm1, %v10941_v23  ;;  %v11031_v35 = vld [vmem:[#allocation2 + $0x152] sm:$0xff] }
  0x8d   : > { %9048 = vmatprep.mubr.msk.f32.mxu0 %vm198_vm1, %v10879_v36  ;;  %v11027_v36 = vld [vmem:[#allocation2 + $0x159] sm:$0xff]  ;;  %12747 = vst [vmem:[#allocation35_spill] sm:$0xff] %v11031_v35 }
  0x8e   : > { %12746 = vst [vmem:[#allocation34_spill] sm:$0xff] %v11027_v36 }
  0x90   : > { %9049 = vmatmul.mubr.msk.f32.gmra.mrb[4].mxu0 %vm198_vm1, %v10887_v37  ;;  %v11015_v37 = vld [vmem:[#allocation2 + $0x13a] sm:$0xff] }
  0x91   : > { %9051 = vmatprep.mubr.msk.f32.mxu0 %vm198_vm1, %v10889_v38  ;;  %v11011_v38 = vld [vmem:[#allocation2 + $0x141] sm:$0xff]  ;;  %12743 = vst [vmem:[#allocation31_spill] sm:$0xff] %v11015_v37 }
  0x92   : > { %12742 = vst [vmem:[#allocation30_spill] sm:$0xff] %v11011_v38 }
  0x94   : > { %9052 = vmatmul.mubr.msk.f32.gmra.mrb[6].mxu0 %vm198_vm1, %v10895_v39  ;;  %v10999_v39 = vld [vmem:[#allocation2 + $0x122] sm:$0xff] }
  0x95   : > { %9054 = vmatprep.mubr.msk.f32.mxu0 %vm198_vm1, %v10897_v40  ;;  %v10995_v40 = vld [vmem:[#allocation2 + $0x129] sm:$0xff]  ;;  %12739 = vst [vmem:[#allocation27_spill] sm:$0xff] %v10999_v39 }
  0x98   : > { %9055 = vmatmul.mubr.msk.f32.gmra.mrb[8].mxu0 %vm198_vm1, %v10903_v41  ;;  %v10983_v41 = vld [vmem:[#allocation2 + $0x10a] sm:$0xff] }
  0x99   : > { %9057 = vmatprep.mubr.msk.f32.mxu0 %vm198_vm1, %v10905_v42  ;;  %v10979_v42 = vld [vmem:[#allocation2 + $0x111] sm:$0xff]  ;;  %12737 = vst [vmem:[#allocation25_spill] sm:$0xff] %v10983_v41 }
  0x9c   : > { %9058 = vmatmul.mubr.msk.f32.gmra.mrb[10].mxu0 %vm198_vm1, %v10911_v43  ;;  %v10967_v43 = vld [vmem:[#allocation2 + $0xf2] sm:$0xff] }
  0x9d   : > { %9060 = vmatprep.mubr.msk.f32.mxu0 %vm198_vm1, %v10913_v44  ;;  %v10963_v44 = vld [vmem:[#allocation2 + $0xf9] sm:$0xff]  ;;  %12735 = vst [vmem:[#allocation23_spill] sm:$0xff] %v10967_v43 }
  0xa0   : > { %9061 = vmatmul.mubr.msk.f32.gmra.mrb[12].mxu0 %vm198_vm1, %v10919_v50  ;;  %v10951_v50 = vld [vmem:[#allocation2 + $0xda] sm:$0xff] }
  0xa1   : > { %9063 = vmatprep.mubr.msk.f32.mxu0 %vm198_vm1, %v10921_v51  ;;  %v10947_v51 = vld [vmem:[#allocation2 + $0xe1] sm:$0xff]  ;;  %12733 = vst [vmem:[#allocation21_spill] sm:$0xff] %v10951_v50 }
  0xa2   : > { %8970 = vmatmul.mubr.msk.f32.gmra.mrb[2].mxu1 %vm198_vm1, %v10947_v51 }
  0xa4   : > { %9064 = vmatmul.mubr.msk.f32.gmra.mrb[14].mxu0 %vm198_vm1, %v10929_v17  ;;  %v10957_v17 = vld [vmem:[#allocation2 + $0xf1] sm:$0xff] }
  0xa5   : > { %9066 = vmatprep.mubr.msk.f32.mxu0 %vm198_vm1, %v10935_v22  ;;  %v10961_v22 = vld [vmem:[#allocation2 + $0xe2] sm:$0xff]  ;;  %8972 = vmatprep.mubr.msk.f32.mxu1 %vm198_vm1, %v10957_v17 }
  0xa6   : > { %12734 = vst [vmem:[#allocation22_spill] sm:$0xff] %v10961_v22  ;;  %8973 = vmatmul.mubr.msk.f32.gmra.mrb[4].mxu1 %vm198_vm1, %v10963_v44 }
  0xa8   : > { %9067 = vmatmul.mubr.msk.f32.gmra.mrb[16].mxu0 %vm198_vm1, %v10945_v1  ;;  %v10973_v1 = vld [vmem:[#allocation2 + $0x109] sm:$0xff] }
  0xa9   : > { %9069 = vmatprep.mubr.msk.f32.mxu0 %vm198_vm1, %v10951_v50  ;;  %v10977_v50 = vld [vmem:[#allocation2 + $0xfa] sm:$0xff]  ;;  %8975 = vmatprep.mubr.msk.f32.mxu1 %vm198_vm1, %v10973_v1 }
  0xaa   : > { %12736 = vst [vmem:[#allocation24_spill] sm:$0xff] %v10977_v50  ;;  %8976 = vmatmul.mubr.msk.f32.gmra.mrb[6].mxu1 %vm198_vm1, %v10979_v42 }
  0xac   : > { %9070 = vmatmul.mubr.msk.f32.gmra.mrb[18].mxu0 %vm198_vm1, %v10961_v22  ;;  %v10989_v22 = vld [vmem:[#allocation2 + $0x121] sm:$0xff] }
  0xad   : > { %9072 = vmatprep.mubr.msk.f32.mxu0 %vm198_vm1, %v10967_v43  ;;  %v10993_v43 = vld [vmem:[#allocation2 + $0x112] sm:$0xff]  ;;  %8978 = vmatprep.mubr.msk.f32.mxu1 %vm198_vm1, %v10989_v22 }
  0xae   : > { %12738 = vst [vmem:[#allocation26_spill] sm:$0xff] %v10993_v43  ;;  %8979 = vmatmul.mubr.msk.f32.gmra.mrb[8].mxu1 %vm198_vm1, %v10995_v40 }
  0xb0   : > { %9073 = vmatmul.mubr.msk.f32.gmra.mrb[20].mxu0 %vm198_vm1, %v10977_v50  ;;  %v11005_v50 = vld [vmem:[#allocation2 + $0x139] sm:$0xff] }
  0xb1   : > { %9075 = vmatprep.mubr.msk.f32.mxu0 %vm198_vm1, %v10983_v41  ;;  %12740 = vst [vmem:[#allocation28_spill] sm:$0xff] %v11005_v50  ;;  %v11009_v41 = vld [vmem:[#allocation2 + $0x12a] sm:$0xff]  ;;  %8981 = vmatprep.mubr.msk.f32.mxu1 %vm198_vm1, %v11005_v50 }
  0xb2   : > { %12741 = vst [vmem:[#allocation29_spill] sm:$0xff] %v11009_v41  ;;  %8982 = vmatmul.mubr.msk.f32.gmra.mrb[10].mxu1 %vm198_vm1, %v11011_v38 }
  0xb4   : > { %9076 = vmatmul.mubr.msk.f32.gmra.mrb[22].mxu0 %vm198_vm1, %v10993_v43  ;;  %v11021_v43 = vld [vmem:[#allocation2 + $0x151] sm:$0xff] }
  0xb5   : > { %9078 = vmatprep.mubr.msk.f32.mxu0 %vm198_vm1, %v10999_v39  ;;  %12744 = vst [vmem:[#allocation32_spill] sm:$0xff] %v11021_v43  ;;  %v11025_v39 = vld [vmem:[#allocation2 + $0x142] sm:$0xff]  ;;  %8984 = vmatprep.mubr.msk.f32.mxu1 %vm198_vm1, %v11021_v43  ;;  %v11047_v43 = vld [vmem:[#allocation2 + $0x16a] sm:$0xff] }
  0xb6   : > { %12745 = vst [vmem:[#allocation33_spill] sm:$0xff] %v11025_v39  ;;  %8985 = vmatmul.mubr.msk.f32.gmra.mrb[12].mxu1 %vm198_vm1, %v11027_v36  ;;  %12750 = vst [vmem:[#allocation38_spill] sm:$0xff] %v11047_v43 }
  0xb8   : > { %9079 = vmatmul.mubr.msk.f32.gmra.mrb[24].mxu0 %vm198_vm1, %v11009_v41  ;;  %v11037_v41 = vld [vmem:[#allocation2 + $0x169] sm:$0xff] }
  0xb9   : > { %9081 = vmatprep.mubr.msk.f32.mxu0 %vm198_vm1, %v11015_v37  ;;  %12748 = vst [vmem:[#allocation36_spill] sm:$0xff] %v11037_v41  ;;  %v11041_v37 = vld [vmem:[#allocation2 + $0x15a] sm:$0xff]  ;;  %8987 = vmatprep.mubr.msk.f32.mxu1 %vm198_vm1, %v11037_v41 }
  0xba   : > { %8988 = vmatmul.mubr.msk.f32.gmra.mrb[14].mxu1 %vm198_vm1, %v11043_v24 }
  0xbc   : > { %9082 = vmatmul.mubr.msk.f32.gmra.mrb[26].mxu0 %vm198_vm1, %v11025_v39  ;;  %v11055_v39 = vld [vmem:[#allocation2 + $0x172] sm:$0xff] }
  0xbd   : > { %9084 = vmatprep.mubr.msk.f32.mxu0 %vm198_vm1, %v11031_v35  ;;  %v7844_v35 = vld [vmem:[%s12591_s1 + $0x14] sm:$0xf] }
  0xc0   : > { %9085 = vmatmul.mubr.msk.f32.gmra.mrb[28].mxu0 %vm198_vm1, %v11041_v37 }
  0xc1   : > { %9087 = vmatprep.mubr.msk.f32.mxu0 %vm198_vm1, %v11047_v43 }
  0xc4   : > { %9088 = vmatmul.mubr.msk.f32.gmra.mrb[30].mxu0 %vm198_vm1, %v11055_v39 }
  0xc5   : > { %9092 = vmatprep.mubr.msk.f32.mxu0 %vm198_vm1, %v10730_v52  ;;  %v11123_v52 = vld [vmem:[#allocation2 + $0x180] sm:$0xff] }
  0xc8   : > { %9093 = vmatmul.mubr.msk.f32.vlgmr.msra.gmra.mrb[0].mxu0 %vm198_vm1, %v10742_v54  ;;  %v11129_v54 = vld [vmem:[#allocation2 + $0x188] sm:$0xff] }
  0xc9   : > { %9141 = vmatpush3.msk.msra.mxu0 %vm472_vm0, %v10870_v25  ;;  %9095 = vmatprep.mubr.msk.f32.mxu0 %vm198_vm1, %v10744_v55  ;;  %v7878_v25 = vld [vmem:[%s12591_s1 + $0x18] sm:$0xf] }
  0xca   : > { %9190 = vmatprep.subr.msk.mxu0 %vm472_vm0, %v7844_v35 }
  0xcc   : > { %9096 = vmatmul.mubr.msk.f32.gmra.mrb[2].mxu0 %vm198_vm1, %v10752_v56 }
  0xcd   : > { %9098 = vmatprep.mubr.msk.f32.mxu0 %vm198_vm1, %v10754_v57 }
  0xd0   : > { %9099 = vmatmul.mubr.msk.f32.gmra.mrb[4].mxu0 %vm198_vm1, %v10760_v58 }
  0xd1   : > { %9101 = vmatprep.mubr.msk.f32.mxu0 %vm198_vm1, %v10762_v59 }
  0xd4   : > { %9102 = vmatmul.mubr.msk.f32.gmra.mrb[6].mxu0 %vm198_vm1, %v10768_v60 }
  0xd5   : > { %9104 = vmatprep.mubr.msk.f32.mxu0 %vm198_vm1, %v10770_v61 }
  0xd8   : > { %9105 = vmatmul.mubr.msk.f32.gmra.mrb[8].mxu0 %vm198_vm1, %v10776_v62 }
  0xd9   : > { %9107 = vmatprep.mubr.msk.f32.mxu0 %vm198_vm1, %v10778_v63 }
  0xdc   : > { %9108 = vmatmul.mubr.msk.f32.gmra.mrb[10].mxu0 %vm198_vm1, %v10784_v0 }
  0xdd   : > { %9110 = vmatprep.mubr.msk.f32.mxu0 %vm198_vm1, %v10786_v2 }
  0xe0   : > { %9111 = vmatmul.mubr.msk.f32.gmra.mrb[12].mxu0 %vm198_vm1, %v10792_v3 }
  0xe1   : > { %9113 = vmatprep.mubr.msk.f32.mxu0 %vm198_vm1, %v10794_v4 }
  0xe4   : > { %9114 = vmatmul.mubr.msk.f32.gmra.mrb[14].mxu0 %vm198_vm1, %v10800_v5 }
  0xe5   : > { %9116 = vmatprep.mubr.msk.f32.mxu0 %vm198_vm1, %v10802_v6 }
  0xe8   : > { %9117 = vmatmul.mubr.msk.f32.gmra.mrb[16].mxu0 %vm198_vm1, %v10808_v7 }
  0xe9   : > { %9119 = vmatprep.mubr.msk.f32.mxu0 %vm198_vm1, %v10810_v8 }
  0xec   : > { %9120 = vmatmul.mubr.msk.f32.gmra.mrb[18].mxu0 %vm198_vm1, %v10816_v9 }
  0xed   : > { %9122 = vmatprep.mubr.msk.f32.mxu0 %vm198_vm1, %v10818_v10 }
  0xf0   : > { %9123 = vmatmul.mubr.msk.f32.gmra.mrb[20].mxu0 %vm198_vm1, %v10824_v11 }
  0xf1   : > { %9125 = vmatprep.mubr.msk.f32.mxu0 %vm198_vm1, %v10826_v12 }
  0xf4   : > { %9126 = vmatmul.mubr.msk.f32.gmra.mrb[22].mxu0 %vm198_vm1, %v10832_v13 }
  0xf5   : > { %9128 = vmatprep.mubr.msk.f32.mxu0 %vm198_vm1, %v10834_v14 }
  0xf8   : > { %9129 = vmatmul.mubr.msk.f32.gmra.mrb[24].mxu0 %vm198_vm1, %v10840_v15 }
  0xf9   : > { %9131 = vmatprep.mubr.msk.f32.mxu0 %vm198_vm1, %v10842_v16 }
  0xfc   : > { %9132 = vmatmul.mubr.msk.f32.gmra.mrb[26].mxu0 %vm198_vm1, %v10852_v19 }
  0xfd   : > { %9134 = vmatprep.mubr.msk.f32.mxu0 %vm198_vm1, %v10854_v20 }
 0x100   : > { %9135 = vmatmul.mubr.msk.f32.gmra.mrb[28].mxu0 %vm198_vm1, %v10860_v21 }
 0x101   : > { %9137 = vmatprep.mubr.msk.f32.mxu0 %vm198_vm1, %v11123_v52 }
 0x104   : > { %9138 = vmatmul.mubr.msk.f32.gmra.mrb[30].mxu0 %vm198_vm1, %v11129_v54 }
 0x105   : > { %9142 = vmatprep.mubr.msk.f32.mxu0 %vm198_vm1, %v10650_v26  ;;  %v11202_v26 = vld [vmem:[#allocation2 + $0x189] sm:$0xff] }
 0x106   : > { %12753 = vst [vmem:[#allocation40_spill] sm:$0xff] %v11202_v26 }
 0x108   : > { %9143 = vmatmul.mubr.msk.f32.vlgmr.msra.gmra.mrb[0].mxu0 %vm198_vm1, %v10652_v27  ;;  %v12751_v27 = vld [vmem:[#allocation32_spill] sm:$0xff] }
 0x109   : > { %9191 = vmatpush3.msk.msra.mxu0 %vm472_vm0, %v7844_v35  ;;  %9145 = vmatprep.mubr.msk.f32.mxu0 %vm198_vm1, %v10654_v28  ;;  %v11196_v35 = vld [vmem:[#allocation2 + $0x181] sm:$0xff] }
 0x10a   : > { %9240 = vmatprep.subr.msk.mxu0 %vm472_vm0, %v7878_v25  ;;  %12752 = vst [vmem:[#allocation39_spill] sm:$0xff] %v11196_v35 }
 0x10c   : > { %9146 = vmatmul.mubr.msk.f32.gmra.mrb[2].mxu0 %vm198_vm1, %v10665_v29 }
 0x10d   : > { %9148 = vmatprep.mubr.msk.f32.mxu0 %vm198_vm1, %v10667_v30 }
 0x110   : > { %9149 = vmatmul.mubr.msk.f32.gmra.mrb[4].mxu0 %vm198_vm1, %v10673_v31 }
 0x111   : > { %9151 = vmatprep.mubr.msk.f32.mxu0 %vm198_vm1, %v10675_v32 }
 0x114   : > { %9152 = vmatmul.mubr.msk.f32.gmra.mrb[6].mxu0 %vm198_vm1, %v10679_v33 }
 0x115   : > { %9154 = vmatprep.mubr.msk.f32.mxu0 %vm198_vm1, %v10683_v34 }
 0x118   : > { %9155 = vmatmul.mubr.msk.f32.gmra.mrb[8].mxu0 %vm198_vm1, %v10707_v45 }
 0x119   : > { %9157 = vmatprep.mubr.msk.f32.mxu0 %vm198_vm1, %v10711_v46 }
 0x11c   : > { %9158 = vmatmul.mubr.msk.f32.gmra.mrb[10].mxu0 %vm198_vm1, %v10717_v47 }
 0x11d   : > { %9160 = vmatprep.mubr.msk.f32.mxu0 %vm198_vm1, %v10719_v48 }
 0x120   : > { %9161 = vmatmul.mubr.msk.f32.gmra.mrb[12].mxu0 %vm198_vm1, %v10725_v49 }
 0x121   : > { %9163 = vmatprep.mubr.msk.f32.mxu0 %vm198_vm1, %v10925_v53 }
 0x124   : > { %9164 = vmatmul.mubr.msk.f32.gmra.mrb[14].mxu0 %vm198_vm1, %v10931_v18 }
 0x125   : > { %9166 = vmatprep.mubr.msk.f32.mxu0 %vm198_vm1, %v10941_v23 }
 0x128   : > { %9167 = vmatmul.mubr.msk.f32.gmra.mrb[16].mxu0 %vm198_vm1, %v10947_v51 }
 0x129   : > { %9169 = vmatprep.mubr.msk.f32.mxu0 %vm198_vm1, %v10957_v17 }
 0x12c   : > { %9170 = vmatmul.mubr.msk.f32.gmra.mrb[18].mxu0 %vm198_vm1, %v10963_v44 }
 0x12d   : > { %9172 = vmatprep.mubr.msk.f32.mxu0 %vm198_vm1, %v10973_v1 }
 0x130   : > { %9173 = vmatmul.mubr.msk.f32.gmra.mrb[20].mxu0 %vm198_vm1, %v10979_v42 }
 0x131   : > { %9175 = vmatprep.mubr.msk.f32.mxu0 %vm198_vm1, %v10989_v22 }
 0x134   : > { %9176 = vmatmul.mubr.msk.f32.gmra.mrb[22].mxu0 %vm198_vm1, %v10995_v40 }
 0x135   : > { %9178 = vmatprep.mubr.msk.f32.mxu0 %vm198_vm1, %v11005_v50  ;;  %v12764_v50 = vld [vmem:[#allocation15_spill] sm:$0xff] }
 0x138   : > { %9179 = vmatmul.mubr.msk.f32.gmra.mrb[24].mxu0 %vm198_vm1, %v11011_v38  ;;  %v12760_v38 = vld [vmem:[#allocation11_spill] sm:$0xff] }
 0x139   : > { %9181 = vmatprep.mubr.msk.f32.mxu0 %vm198_vm1, %v12751_v27  ;;  %v12754_v27 = vld [vmem:[#allocation5_spill] sm:$0xff] }
 0x13c   : > { %9182 = vmatmul.mubr.msk.f32.gmra.mrb[26].mxu0 %vm198_vm1, %v11027_v36  ;;  %v12755_v36 = vld [vmem:[#allocation6_spill] sm:$0xff] }
 0x13d   : > { %9184 = vmatprep.mubr.msk.f32.mxu0 %vm198_vm1, %v11037_v41  ;;  %v7912_v41 = vld [vmem:[%s12591_s1 + $0x1c] sm:$0xf] }
 0x140   : > { %9185 = vmatmul.mubr.msk.f32.gmra.mrb[28].mxu0 %vm198_vm1, %v11043_v24  ;;  %v12756_v24 = vld [vmem:[#allocation7_spill] sm:$0xff] }
 0x141   : > { %9187 = vmatprep.mubr.msk.f32.mxu0 %vm198_vm1, %v11196_v35  ;;  %v12757_v35 = vld [vmem:[#allocation8_spill] sm:$0xff] }
 0x144   : > { %9188 = vmatmul.mubr.msk.f32.gmra.mrb[30].mxu0 %vm198_vm1, %v11202_v26  ;;  %v12758_v26 = vld [vmem:[#allocation9_spill] sm:$0xff] }
 0x145   : > { %9192 = vmatprep.mubr.msk.f32.mxu0 %vm198_vm1, %v12754_v27  ;;  %v12759_v27 = vld [vmem:[#allocation10_spill] sm:$0xff] }
 0x148   : > { %9193 = vmatmul.mubr.msk.f32.vlgmr.msra.gmra.mrb[0].mxu0 %vm198_vm1, %v12755_v36  ;;  %v12761_v36 = vld [vmem:[#allocation12_spill] sm:$0xff] }
 0x149   : > { %9241 = vmatpush3.msk.msra.mxu0 %vm472_vm0, %v7878_v25  ;;  %9195 = vmatprep.mubr.msk.f32.mxu0 %vm198_vm1, %v12756_v24  ;;  %v12762_v25 = vld [vmem:[#allocation13_spill] sm:$0xff]  ;;  %v12763_v24 = vld [vmem:[#allocation14_spill] sm:$0xff] }
 0x14a   : > { %9290 = vmatprep.subr.msk.mxu0 %vm472_vm0, %v7912_v41 }
 0x14c   : > { %9196 = vmatmul.mubr.msk.f32.gmra.mrb[2].mxu0 %vm198_vm1, %v12757_v35  ;;  %v12765_v35 = vld [vmem:[#allocation16_spill] sm:$0xff] }
 0x14d   : > { %9198 = vmatprep.mubr.msk.f32.mxu0 %vm198_vm1, %v12758_v26  ;;  %v12766_v26 = vld [vmem:[#allocation17_spill] sm:$0xff] }
 0x150   : > { %9199 = vmatmul.mubr.msk.f32.gmra.mrb[4].mxu0 %vm198_vm1, %v12759_v27  ;;  %v12767_v27 = vld [vmem:[#allocation18_spill] sm:$0xff] }
 0x151   : > { %9201 = vmatprep.mubr.msk.f32.mxu0 %vm198_vm1, %v12760_v38  ;;  %v12768_v38 = vld [vmem:[#allocation19_spill] sm:$0xff] }
 0x154   : > { %9202 = vmatmul.mubr.msk.f32.gmra.mrb[6].mxu0 %vm198_vm1, %v12761_v36  ;;  %v12769_v36 = vld [vmem:[#allocation20_spill] sm:$0xff] }
 0x155   : > { %9204 = vmatprep.mubr.msk.f32.mxu0 %vm198_vm1, %v12762_v25  ;;  %v12770_v25 = vld [vmem:[#allocation21_spill] sm:$0xff] }
 0x158   : > { %9205 = vmatmul.mubr.msk.f32.gmra.mrb[8].mxu0 %vm198_vm1, %v12763_v24  ;;  %v12771_v24 = vld [vmem:[#allocation22_spill] sm:$0xff] }
 0x159   : > { %9207 = vmatprep.mubr.msk.f32.mxu0 %vm198_vm1, %v12764_v50  ;;  %v12772_v50 = vld [vmem:[#allocation23_spill] sm:$0xff] }
 0x15c   : > { %9208 = vmatmul.mubr.msk.f32.gmra.mrb[10].mxu0 %vm198_vm1, %v12765_v35  ;;  %v12773_v35 = vld [vmem:[#allocation24_spill] sm:$0xff] }
 0x15d   : > { %9210 = vmatprep.mubr.msk.f32.mxu0 %vm198_vm1, %v12766_v26  ;;  %v12774_v26 = vld [vmem:[#allocation25_spill] sm:$0xff] }
 0x160   : > { %9211 = vmatmul.mubr.msk.f32.gmra.mrb[12].mxu0 %vm198_vm1, %v12767_v27  ;;  %v12775_v27 = vld [vmem:[#allocation26_spill] sm:$0xff] }
 0x161   : > { %9213 = vmatprep.mubr.msk.f32.mxu0 %vm198_vm1, %v12768_v38  ;;  %v12776_v38 = vld [vmem:[#allocation27_spill] sm:$0xff] }
 0x164   : > { %9214 = vmatmul.mubr.msk.f32.gmra.mrb[14].mxu0 %vm198_vm1, %v12769_v36  ;;  %v12777_v36 = vld [vmem:[#allocation29_spill] sm:$0xff] }
 0x165   : > { %9216 = vmatprep.mubr.msk.f32.mxu0 %vm198_vm1, %v12770_v25  ;;  %v12778_v25 = vld [vmem:[#allocation31_spill] sm:$0xff] }
 0x168   : > { %9217 = vmatmul.mubr.msk.f32.gmra.mrb[16].mxu0 %vm198_vm1, %v12771_v24  ;;  %v12779_v24 = vld [vmem:[#allocation33_spill] sm:$0xff] }
 0x169   : > { %9219 = vmatprep.mubr.msk.f32.mxu0 %vm198_vm1, %v12772_v50  ;;  %v12780_v50 = vld [vmem:[#allocation35_spill] sm:$0xff] }
 0x16c   : > { %9220 = vmatmul.mubr.msk.f32.gmra.mrb[18].mxu0 %vm198_vm1, %v12773_v35 }
 0x16d   : > { %9222 = vmatprep.mubr.msk.f32.mxu0 %vm198_vm1, %v12774_v26 }
 0x170   : > { %9223 = vmatmul.mubr.msk.f32.gmra.mrb[20].mxu0 %vm198_vm1, %v12775_v27  ;;  %v11269_v27 = vld [vmem:[#allocation2 + $0x182] sm:$0xff] }
 0x171   : > { %9225 = vmatprep.mubr.msk.f32.mxu0 %vm198_vm1, %v12776_v38 }
 0x174   : > { %9226 = vmatmul.mubr.msk.f32.gmra.mrb[22].mxu0 %vm198_vm1, %v12777_v36 }
 0x175   : > { %9228 = vmatprep.mubr.msk.f32.mxu0 %vm198_vm1, %v12778_v25  ;;  %v11275_v25 = vld [vmem:[#allocation2 + $0x18a] sm:$0xff] }
 0x178   : > { %9229 = vmatmul.mubr.msk.f32.gmra.mrb[24].mxu0 %vm198_vm1, %v12779_v24 }
 0x179   : > { %9231 = vmatprep.mubr.msk.f32.mxu0 %vm198_vm1, %v12780_v50 }
 0x17c   : > { %9232 = vmatmul.mubr.msk.f32.gmra.mrb[26].mxu0 %vm198_vm1, %v11041_v37 }
 0x17d   : > { %9234 = vmatprep.mubr.msk.f32.mxu0 %vm198_vm1, %v11047_v43  ;;  %v7946_v43 = vld [vmem:[%s12591_s1 + $0x20] sm:$0xf] }
 0x180   : > { %9235 = vmatmul.mubr.msk.f32.gmra.mrb[28].mxu0 %vm198_vm1, %v11055_v39 }
 0x181   : > { %9237 = vmatprep.mubr.msk.f32.mxu0 %vm198_vm1, %v11269_v27 }
 0x184   : > { %9238 = vmatmul.mubr.msk.f32.gmra.mrb[30].mxu0 %vm198_vm1, %v11275_v25 }
 0x185   : > { %9242 = vmatprep.mubr.msk.f32.mxu0 %vm198_vm1, %v10744_v55  ;;  %v2616_v55 = vld [vmem:[#allocation2 + $0x198] sm:$0xff] }
 0x188   : > { %9243 = vmatmul.mubr.msk.f32.vlgmr.msra.gmra.mrb[0].mxu0 %vm198_vm1, %v10752_v56  ;;  %v2617_v56 = vld [vmem:[#allocation2 + $0x1a0] sm:$0xff] }
 0x189   : > { %9291 = vmatpush3.msk.msra.mxu0 %vm472_vm0, %v7912_v41  ;;  %9245 = vmatprep.mubr.msk.f32.mxu0 %vm198_vm1, %v10754_v57  ;;  %v7980_v57 = vld [vmem:[%s12592_s2 + $0x8] sm:$0xff] }
 0x18a   : > { %9340 = vmatprep.subr.msk.mxu0 %vm472_vm0, %v7946_v43  ;;  %9390 = vmatprep.subr.mxu1 %v7980_v57 }
 0x18b   : > { %9391 = vmatpush3.msra.mxu1 %v7980_v57 }
 0x18c   : > { %9246 = vmatmul.mubr.msk.f32.gmra.mrb[2].mxu0 %vm198_vm1, %v10760_v58  ;;  %v12792_v58 = vld [vmem:[#allocation10_spill] sm:$0xff] }
 0x18d   : > { %9248 = vmatprep.mubr.msk.f32.mxu0 %vm198_vm1, %v10762_v59  ;;  %v12793_v59 = vld [vmem:[#allocation11_spill] sm:$0xff] }
 0x190   : > { %9249 = vmatmul.mubr.msk.f32.gmra.mrb[4].mxu0 %vm198_vm1, %v10768_v60  ;;  %v12794_v60 = vld [vmem:[#allocation12_spill] sm:$0xff] }
 0x191   : > { %9251 = vmatprep.mubr.msk.f32.mxu0 %vm198_vm1, %v10770_v61  ;;  %v12795_v61 = vld [vmem:[#allocation13_spill] sm:$0xff] }
 0x194   : > { %9252 = vmatmul.mubr.msk.f32.gmra.mrb[6].mxu0 %vm198_vm1, %v10776_v62  ;;  %v12796_v62 = vld [vmem:[#allocation14_spill] sm:$0xff] }
 0x195   : > { %9254 = vmatprep.mubr.msk.f32.mxu0 %vm198_vm1, %v10778_v63  ;;  %v12797_v63 = vld [vmem:[#allocation15_spill] sm:$0xff] }
 0x198   : > { %9255 = vmatmul.mubr.msk.f32.gmra.mrb[8].mxu0 %vm198_vm1, %v10784_v0  ;;  %v12798_v0 = vld [vmem:[#allocation16_spill] sm:$0xff] }
 0x199   : > { %9257 = vmatprep.mubr.msk.f32.mxu0 %vm198_vm1, %v10786_v2  ;;  %v12799_v2 = vld [vmem:[#allocation17_spill] sm:$0xff] }
 0x19c   : > { %9258 = vmatmul.mubr.msk.f32.gmra.mrb[10].mxu0 %vm198_vm1, %v10792_v3  ;;  %v12800_v3 = vld [vmem:[#allocation18_spill] sm:$0xff] }
 0x19d   : > { %9260 = vmatprep.mubr.msk.f32.mxu0 %vm198_vm1, %v10794_v4  ;;  %v12801_v4 = vld [vmem:[#allocation19_spill] sm:$0xff] }
 0x1a0   : > { %9261 = vmatmul.mubr.msk.f32.gmra.mrb[12].mxu0 %vm198_vm1, %v10800_v5  ;;  %v12802_v5 = vld [vmem:[#allocation20_spill] sm:$0xff] }
 0x1a1   : > { %9263 = vmatprep.mubr.msk.f32.mxu0 %vm198_vm1, %v10802_v6  ;;  %v12803_v6 = vld [vmem:[#allocation21_spill] sm:$0xff] }
 0x1a4   : > { %9264 = vmatmul.mubr.msk.f32.gmra.mrb[14].mxu0 %vm198_vm1, %v10808_v7  ;;  %v12804_v7 = vld [vmem:[#allocation22_spill] sm:$0xff] }
 0x1a5   : > { %9266 = vmatprep.mubr.msk.f32.mxu0 %vm198_vm1, %v10810_v8  ;;  %v12805_v8 = vld [vmem:[#allocation23_spill] sm:$0xff] }
 0x1a8   : > { %9267 = vmatmul.mubr.msk.f32.gmra.mrb[16].mxu0 %vm198_vm1, %v10816_v9  ;;  %v12806_v9 = vld [vmem:[#allocation26_spill] sm:$0xff] }
 0x1a9   : > { %9269 = vmatprep.mubr.msk.f32.mxu0 %vm198_vm1, %v10818_v10  ;;  %v12807_v10 = vld [vmem:[#allocation31_spill] sm:$0xff] }
 0x1ac   : > { %9270 = vmatmul.mubr.msk.f32.gmra.mrb[18].mxu0 %vm198_vm1, %v10824_v11  ;;  %v3396_v11 = vld [vmem:[#allocation2 + $0x19a] sm:$0xff] }
 0x1ad   : > { %9272 = vmatprep.mubr.msk.f32.mxu0 %vm198_vm1, %v10826_v12  ;;  %v3397_v12 = vld [vmem:[#allocation2 + $0x1a2] sm:$0xff] }
 0x1b0   : > { %9273 = vmatmul.mubr.msk.f32.gmra.mrb[20].mxu0 %vm198_vm1, %v10832_v13  ;;  %v12809_v13 = vld [vmem:[#allocation4_spill] sm:$0xff] }
 0x1b1   : > { %9275 = vmatprep.mubr.msk.f32.mxu0 %vm198_vm1, %v10834_v14  ;;  %v12810_v14 = vmov 0.0  }
 0x1b2   : > { %3789 = vst.msk [vmem:[#allocation3] sm:$0xff] %vm3788_vm4, %v12810_v14  ;;  %3790 = vst.msk [vmem:[#allocation3 + $0x8] sm:$0xff] %vm3788_vm4, %v12810_v14 }
 0x1b3   : > { %3794 = vst.msk [vmem:[#allocation3 + $0x198] sm:$0xff] %vm3788_vm4, %v12810_v14  ;;  %3795 = vst.msk [vmem:[#allocation3 + $0x1a0] sm:$0xff] %vm3788_vm4, %v12810_v14 }
 0x1b4   : > { %9276 = vmatmul.mubr.msk.f32.gmra.mrb[22].mxu0 %vm198_vm1, %v10840_v15  ;;  %3792 = vst.msk [vmem:[#allocation3 + $0x10] sm:$0x3] %vm3791_vm5, %v12810_v14  ;;  %3796 = vst.msk [vmem:[#allocation3 + $0x1a8] sm:$0x3] %vm3791_vm5, %v12810_v14 }
 0x1b5   : > { %9278 = vmatprep.mubr.msk.f32.mxu0 %vm198_vm1, %v10842_v16  ;;  %3798 = vst.msk [vmem:[#allocation3] sm:$0x1] %vm3797_vm6, %v12810_v14  ;;  %3799 = vst.msk [vmem:[#allocation3 + $0x18] sm:$0x1] %vm3797_vm6, %v12810_v14 }
 0x1b6   : > { %3800 = vst.msk [vmem:[#allocation3 + $0x30] sm:$0x1] %vm3797_vm6, %v12810_v14  ;;  %3801 = vst.msk [vmem:[#allocation3 + $0x48] sm:$0x1] %vm3797_vm6, %v12810_v14 }
 0x1b7   : > { %3802 = vst.msk [vmem:[#allocation3 + $0x60] sm:$0x1] %vm3797_vm6, %v12810_v14  ;;  %3803 = vst.msk [vmem:[#allocation3 + $0x78] sm:$0x1] %vm3797_vm6, %v12810_v14 }
 0x1b8   : > { %9279 = vmatmul.mubr.msk.f32.gmra.mrb[24].mxu0 %vm198_vm1, %v10852_v19  ;;  %3804 = vst.msk [vmem:[#allocation3 + $0x90] sm:$0x1] %vm3797_vm6, %v12810_v14  ;;  %3805 = vst.msk [vmem:[#allocation3 + $0xa8] sm:$0x1] %vm3797_vm6, %v12810_v14  ;;  %v3899_v19 = vld [vmem:[%s12592_s2] sm:$0xff] }
 0x1b9   : > { %9281 = vmatprep.mubr.msk.f32.mxu0 %vm198_vm1, %v10854_v20  ;;  %3806 = vst.msk [vmem:[#allocation3 + $0xc0] sm:$0x1] %vm3797_vm6, %v12810_v14  ;;  %3807 = vst.msk [vmem:[#allocation3 + $0xd8] sm:$0x1] %vm3797_vm6, %v12810_v14  ;;  %v3900_v15 = vld [vmem:[#allocation3 + $0x1] sm:$0xff]  ;;  %9440 = vmatprep.subr.mxu1 %v3899_v19  ;;  %v11563_v20 = vpop.f32.mrb[0].mxu1 }
 0x1ba   : > { %3808 = vst.msk [vmem:[#allocation3 + $0xf0] sm:$0x1] %vm3797_vm6, %v12810_v14  ;;  %3809 = vst.msk [vmem:[#allocation3 + $0x108] sm:$0x1] %vm3797_vm6, %v12810_v14  ;;  %9392 = vmatprep.mubr.msk.f32.mxu1 %vm3788_vm4, %v3900_v15 }
 0x1bb   : > { %3810 = vst.msk [vmem:[#allocation3 + $0x120] sm:$0x1] %vm3797_vm6, %v12810_v14  ;;  %3811 = vst.msk [vmem:[#allocation3 + $0x138] sm:$0x1] %vm3797_vm6, %v12810_v14  ;;  %v3901_v16 = vld [vmem:[#allocation3 + $0x9] sm:$0xff] }
 0x1bc   : > { %9282 = vmatmul.mubr.msk.f32.gmra.mrb[26].mxu0 %vm198_vm1, %v10860_v21  ;;  %3812 = vst.msk [vmem:[#allocation3 + $0x150] sm:$0x1] %vm3797_vm6, %v12810_v14  ;;  %3813 = vst.msk [vmem:[#allocation3 + $0x168] sm:$0x1] %vm3797_vm6, %v12810_v14  ;;  %9393 = vmatmul.mubr.msk.f32.vlgmr.msra.gmra.mrb[16].mxu1 %vm3788_vm4, %v3901_v16  ;;  %v11565_v21 = vpop.f32.mrb[1].mxu1 }
 0x1bd   : > { %9284 = vmatprep.mubr.msk.f32.mxu0 %vm198_vm1, %v11123_v52  ;;  %3814 = vst.msk [vmem:[#allocation3 + $0x180] sm:$0x1] %vm3797_vm6, %v12810_v14  ;;  %3815 = vst.msk [vmem:[#allocation3 + $0x198] sm:$0x1] %vm3797_vm6, %v12810_v14  ;;  %9441 = vmatpush3.msra.mxu1 %v3899_v19 }
 0x1be   : > { %3816 = vst.msk [vmem:[#allocation3 + $0x11] sm:$0x1] %vm3797_vm6, %v12810_v14  ;;  %3817 = vst.msk [vmem:[#allocation3 + $0x29] sm:$0x1] %vm3797_vm6, %v12810_v14 }
 0x1bf   : > { %3818 = vst.msk [vmem:[#allocation3 + $0x41] sm:$0x1] %vm3797_vm6, %v12810_v14  ;;  %3819 = vst.msk [vmem:[#allocation3 + $0x59] sm:$0x1] %vm3797_vm6, %v12810_v14 }
 0x1c0   : > { %9285 = vmatmul.mubr.msk.f32.gmra.mrb[28].mxu0 %vm198_vm1, %v11129_v54  ;;  %3820 = vst.msk [vmem:[#allocation3 + $0x71] sm:$0x1] %vm3797_vm6, %v12810_v14  ;;  %3821 = vst.msk [vmem:[#allocation3 + $0x89] sm:$0x1] %vm3797_vm6, %v12810_v14 }
 0x1c1   : > { %9287 = vmatprep.mubr.msk.f32.mxu0 %vm198_vm1, %v2616_v55  ;;  %3822 = vst.msk [vmem:[#allocation3 + $0xa1] sm:$0x1] %vm3797_vm6, %v12810_v14  ;;  %3823 = vst.msk [vmem:[#allocation3 + $0xb9] sm:$0x1] %vm3797_vm6, %v12810_v14 }
 0x1c2   : > { %3824 = vst.msk [vmem:[#allocation3 + $0xd1] sm:$0x1] %vm3797_vm6, %v12810_v14  ;;  %3825 = vst.msk [vmem:[#allocation3 + $0xe9] sm:$0x1] %vm3797_vm6, %v12810_v14 }
 0x1c3   : > { %3826 = vst.msk [vmem:[#allocation3 + $0x101] sm:$0x1] %vm3797_vm6, %v12810_v14  ;;  %3827 = vst.msk [vmem:[#allocation3 + $0x119] sm:$0x1] %vm3797_vm6, %v12810_v14 }
 0x1c4   : > { %9288 = vmatmul.mubr.msk.f32.gmra.mrb[30].mxu0 %vm198_vm1, %v2617_v56  ;;  %3828 = vst.msk [vmem:[#allocation3 + $0x131] sm:$0x1] %vm3797_vm6, %v12810_v14  ;;  %3829 = vst.msk [vmem:[#allocation3 + $0x149] sm:$0x1] %vm3797_vm6, %v12810_v14 }
 0x1c5   : > { %9292 = vmatprep.mubr.msk.f32.mxu0 %vm198_vm1, %v10654_v28  ;;  %v12781_v28 = vld [vmem:[#allocation28_spill] sm:$0xff]  ;;  %3830 = vst.msk [vmem:[#allocation3 + $0x161] sm:$0x1] %vm3797_vm6, %v12810_v14  ;;  %3831 = vst.msk [vmem:[#allocation3 + $0x179] sm:$0x1] %vm3797_vm6, %v12810_v14 }
 0x1c6   : > { %3832 = vst.msk [vmem:[#allocation3 + $0x191] sm:$0x1] %vm3797_vm6, %v12810_v14  ;;  %3833 = vst.msk [vmem:[#allocation3 + $0x1a9] sm:$0x1] %vm3797_vm6, %v12810_v14 }
 0x1c8   : > { %9293 = vmatmul.mubr.msk.f32.vlgmr.msra.gmra.mrb[0].mxu0 %vm198_vm1, %v10665_v29  ;;  %v12782_v29 = vld [vmem:[#allocation30_spill] sm:$0xff] }
 0x1c9   : > { %9341 = vmatpush3.msk.msra.mxu0 %vm472_vm0, %v7946_v43  ;;  %9295 = vmatprep.mubr.msk.f32.mxu0 %vm198_vm1, %v10667_v30  ;;  %v12783_v30 = vld [vmem:[#allocation32_spill] sm:$0xff] }
 0x1cc   : > { %9296 = vmatmul.mubr.msk.f32.gmra.mrb[2].mxu0 %vm198_vm1, %v10673_v31  ;;  %v12784_v31 = vld [vmem:[#allocation34_spill] sm:$0xff] }
 0x1cd   : > { %9298 = vmatprep.mubr.msk.f32.mxu0 %vm198_vm1, %v10675_v32  ;;  %v12786_v32 = vld [vmem:[#allocation37_spill] sm:$0xff] }
 0x1d0   : > { %9299 = vmatmul.mubr.msk.f32.gmra.mrb[4].mxu0 %vm198_vm1, %v10679_v33  ;;  %v12787_v33 = vld [vmem:[#allocation39_spill] sm:$0xff] }
 0x1d1   : > { %9301 = vmatprep.mubr.msk.f32.mxu0 %vm198_vm1, %v10683_v34  ;;  %v3006_v34 = vld [vmem:[#allocation2 + $0x199] sm:$0xff] }
 0x1d4   : > { %9302 = vmatmul.mubr.msk.f32.gmra.mrb[6].mxu0 %vm198_vm1, %v10707_v45  ;;  %v12788_v45 = vld [vmem:[#allocation40_spill] sm:$0xff] }
 0x1d5   : > { %9304 = vmatprep.mubr.msk.f32.mxu0 %vm198_vm1, %v10711_v46  ;;  %v3007_v46 = vld [vmem:[#allocation2 + $0x1a1] sm:$0xff] }
 0x1d8   : > { %9305 = vmatmul.mubr.msk.f32.gmra.mrb[8].mxu0 %vm198_vm1, %v10717_v47  ;;  %v12789_v47 = vld [vmem:[#allocation7_spill] sm:$0xff] }
 0x1d9   : > { %9307 = vmatprep.mubr.msk.f32.mxu0 %vm198_vm1, %v10719_v48  ;;  %v12790_v48 = vld [vmem:[#allocation8_spill] sm:$0xff] }
 0x1dc   : > { %9308 = vmatmul.mubr.msk.f32.gmra.mrb[10].mxu0 %vm198_vm1, %v10725_v49  ;;  %v12791_v49 = vld [vmem:[#allocation9_spill] sm:$0xff] }
 0x1dd   : > { %9310 = vmatprep.mubr.msk.f32.mxu0 %vm198_vm1, %v10925_v53 }
 0x1e0   : > { %9311 = vmatmul.mubr.msk.f32.gmra.mrb[12].mxu0 %vm198_vm1, %v10931_v18 }
 0x1e1   : > { %9313 = vmatprep.mubr.msk.f32.mxu0 %vm198_vm1, %v10941_v23 }
 0x1e4   : > { %9314 = vmatmul.mubr.msk.f32.gmra.mrb[14].mxu0 %vm198_vm1, %v10947_v51 }
 0x1e5   : > { %9316 = vmatprep.mubr.msk.f32.mxu0 %vm198_vm1, %v10957_v17 }
 0x1e8   : > { %9317 = vmatmul.mubr.msk.f32.gmra.mrb[16].mxu0 %vm198_vm1, %v10963_v44 }
 0x1e9   : > { %9319 = vmatprep.mubr.msk.f32.mxu0 %vm198_vm1, %v10973_v1  ;;  %v12785_v1 = vld [vmem:[#allocation36_spill] sm:$0xff] }
 0x1ec   : > { %9320 = vmatmul.mubr.msk.f32.gmra.mrb[18].mxu0 %vm198_vm1, %v10979_v42 }
 0x1ed   : > { %9322 = vmatprep.mubr.msk.f32.mxu0 %vm198_vm1, %v10989_v22  ;;  %v11598_v22 = vld [vmem:[%s12592_s2 + $0x10] sm:$0xff] }
 0x1ee   : > { %9490 = vmatprep.subr.mxu1 %v11598_v22 }
 0x1f0   : > { %9323 = vmatmul.mubr.msk.f32.gmra.mrb[20].mxu0 %vm198_vm1, %v10995_v40 }
 0x1f1   : > { %9325 = vmatprep.mubr.msk.f32.mxu0 %vm198_vm1, %v12781_v28 }
 0x1f4   : > { %9326 = vmatmul.mubr.msk.f32.gmra.mrb[22].mxu0 %vm198_vm1, %v12782_v29 }
 0x1f5   : > { %9328 = vmatprep.mubr.msk.f32.mxu0 %vm198_vm1, %v12783_v30 }
 0x1f8   : > { %9329 = vmatmul.mubr.msk.f32.gmra.mrb[24].mxu0 %vm198_vm1, %v12784_v31 }
 0x1f9   : > { %9331 = vmatprep.mubr.msk.f32.mxu0 %vm198_vm1, %v12785_v1 }
 0x1fc   : > { %9332 = vmatmul.mubr.msk.f32.gmra.mrb[26].mxu0 %vm198_vm1, %v12786_v32 }
 0x1fd   : > { %9334 = vmatprep.mubr.msk.f32.mxu0 %vm198_vm1, %v12787_v33 }
 0x200   : > { %9335 = vmatmul.mubr.msk.f32.gmra.mrb[28].mxu0 %vm198_vm1, %v12788_v45 }
 0x201   : > { %9337 = vmatprep.mubr.msk.f32.mxu0 %vm198_vm1, %v3006_v34 }
 0x204   : > { %9338 = vmatmul.mubr.msk.f32.gmra.mrb[30].mxu0 %vm198_vm1, %v3007_v46 }
 0x205   : > { %9342 = vmatprep.mubr.msk.f32.mxu0 %vm198_vm1, %v12789_v47 }
 0x208   : > { %9343 = vmatmul.mubr.msk.f32.vlgmr.msra.gmra.mrb[0].mxu0 %vm198_vm1, %v12790_v48 }
 0x209   : > { %9345 = vmatprep.mubr.msk.f32.mxu0 %vm198_vm1, %v12791_v49 }
 0x20c   : > { %9346 = vmatmul.mubr.msk.f32.gmra.mrb[2].mxu0 %vm198_vm1, %v12792_v58 }
 0x20d   : > { %9348 = vmatprep.mubr.msk.f32.mxu0 %vm198_vm1, %v12793_v59 }
 0x210   : > { %9349 = vmatmul.mubr.msk.f32.gmra.mrb[4].mxu0 %vm198_vm1, %v12794_v60 }
 0x211   : > { %9351 = vmatprep.mubr.msk.f32.mxu0 %vm198_vm1, %v12795_v61 }
 0x214   : > { %9352 = vmatmul.mubr.msk.f32.gmra.mrb[6].mxu0 %vm198_vm1, %v12796_v62 }
 0x215   : > { %9354 = vmatprep.mubr.msk.f32.mxu0 %vm198_vm1, %v12797_v63 }
 0x218   : > { %9355 = vmatmul.mubr.msk.f32.gmra.mrb[8].mxu0 %vm198_vm1, %v12798_v0 }
 0x219   : > { %9357 = vmatprep.mubr.msk.f32.mxu0 %vm198_vm1, %v12799_v2 }
 0x21c   : > { %9358 = vmatmul.mubr.msk.f32.gmra.mrb[10].mxu0 %vm198_vm1, %v12800_v3 }
 0x21d   : > { %9360 = vmatprep.mubr.msk.f32.mxu0 %vm198_vm1, %v12801_v4 }
 0x220   : > { %9361 = vmatmul.mubr.msk.f32.gmra.mrb[12].mxu0 %vm198_vm1, %v12802_v5 }
 0x221   : > { %9363 = vmatprep.mubr.msk.f32.mxu0 %vm198_vm1, %v12803_v6 }
 0x224   : > { %9364 = vmatmul.mubr.msk.f32.gmra.mrb[14].mxu0 %vm198_vm1, %v12804_v7 }
 0x225   : > { %9366 = vmatprep.mubr.msk.f32.mxu0 %vm198_vm1, %v12805_v8 }
 0x228   : > { %9367 = vmatmul.mubr.msk.f32.gmra.mrb[16].mxu0 %vm198_vm1, %v12773_v35 }
 0x229   : > { %9369 = vmatprep.mubr.msk.f32.mxu0 %vm198_vm1, %v12774_v26  ;;  %v12808_v26 = vld [vmem:[#allocation38_spill] sm:$0xff] }
 0x22c   : > { %9370 = vmatmul.mubr.msk.f32.gmra.mrb[18].mxu0 %vm198_vm1, %v12806_v9 }
 0x22d   : > { %9372 = vmatprep.mubr.msk.f32.mxu0 %vm198_vm1, %v12776_v38 }
 0x230   : > { %9373 = vmatmul.mubr.msk.f32.gmra.mrb[20].mxu0 %vm198_vm1, %v12777_v36 }
 0x231   : > { %9375 = vmatprep.mubr.msk.f32.mxu0 %vm198_vm1, %v12807_v10 }
 0x234   : > { %9376 = vmatmul.mubr.msk.f32.gmra.mrb[22].mxu0 %vm198_vm1, %v12779_v24  ;;  %v11567_v24 = vpop.f32.mrb[2].mxu1 }
 0x235   : > { %9378 = vmatprep.mubr.msk.f32.mxu0 %vm198_vm1, %v12780_v50 }
 0x238   : > { %9379 = vmatmul.mubr.msk.f32.gmra.mrb[24].mxu0 %vm198_vm1, %v11041_v37  ;;  %v11569_v37 = vpop.f32.mrb[3].mxu1 }
 0x239   : > { %9381 = vmatprep.mubr.msk.f32.mxu0 %vm198_vm1, %v12808_v26  ;;  %v11571_v38 = vpop.f32.mrb[4].mxu1 }
 0x23c   : > { %9382 = vmatmul.mubr.msk.f32.gmra.mrb[26].mxu0 %vm198_vm1, %v11055_v39  ;;  %v11573_v39 = vpop.f32.mrb[5].mxu1 }
 0x23d   : > { %9384 = vmatprep.mubr.msk.f32.mxu0 %vm198_vm1, %v11269_v27  ;;  %v11575_v40 = vpop.f32.mrb[6].mxu1 }
 0x23e   : > { %v11577_v41 = vpop.f32.mrb[7].mxu1 }
 0x23f   : > { %v11579_v42 = vpop.f32.mrb[8].mxu1 }
 0x240   : > { %9385 = vmatmul.mubr.msk.f32.gmra.mrb[28].mxu0 %vm198_vm1, %v11275_v25  ;;  %v11581_v43 = vpop.f32.mrb[9].mxu1 }
 0x241   : > { %9387 = vmatprep.mubr.msk.f32.mxu0 %vm198_vm1, %v3396_v11  ;;  %v11583_v44 = vpop.f32.mrb[10].mxu1 }
 0x242   : > { %v11585_v50 = vpop.f32.mrb[11].mxu1 }
 0x243   : > { %v11587_v51 = vpop.f32.mrb[12].mxu1 }
 0x244   : > { %9388 = vmatmul.mubr.msk.f32.gmra.mrb[30].mxu0 %vm198_vm1, %v3397_v12  ;;  %v11589_v53 = vpop.f32.mrb[13].mxu1 }
 0x245   : > { %9842 = vmatprep.mubr.msk.f32.mxu0 %vm198_vm1, %v12809_v13  ;;  %v11591_v17 = vpop.f32.mrb[14].mxu1 }
 0x246   : > { %v11593_v18 = vpop.f32.mrb[15].mxu1 }
 0x2db   : > { %v9344_v23 = vpop.f32.mrb[0].mxu0 }
 0x2dc   : > { %v3757_v52 = vmax.f32 %v9344_v23, 0.0  ;;  %v3565_v54 = vpop.f32.mrb[1].mxu0 }
 0x2dd   : > { %v3756_v35 = vmax.f32 %v3565_v54, 0.0 }
 0x2de   : > { %3836 = vst.msk [vmem:[#allocation3 + $0x21] sm:$0xff] %vm3788_vm4, %v3757_v52 }
 0x2df   : > { %3835 = vst.msk [vmem:[#allocation3 + $0x19] sm:$0xff] %vm3788_vm4, %v3756_v35  ;;  %v9347_v27 = vpop.f32.mrb[2].mxu0 }
 0x2e0   : > { %v3759_v36 = vmax.f32 %v9347_v27, 0.0  ;;  %v3575_v25 = vpop.f32.mrb[3].mxu0 }
 0x2e1   : > { %v3758_v55 = vmax.f32 %v3575_v25, 0.0 }
 0x2e2   : > { %3838 = vst.msk [vmem:[#allocation3 + $0x39] sm:$0xff] %vm3788_vm4, %v3759_v36 }
 0x2e3   : > { %3837 = vst.msk [vmem:[#allocation3 + $0x31] sm:$0xff] %vm3788_vm4, %v3758_v55  ;;  %v9350_v56 = vpop.f32.mrb[4].mxu0 }
 0x2e4   : > { %v3761_v57 = vmax.f32 %v9350_v56, 0.0  ;;  %v3585_v28 = vpop.f32.mrb[5].mxu0 }
 0x2e5   : > { %v3760_v29 = vmax.f32 %v3585_v28, 0.0  ;;  %v11611_v1 = vld [vmem:[#allocation3 + $0x21] sm:$0xff] }
 0x2e6   : > { %3840 = vst.msk [vmem:[#allocation3 + $0x51] sm:$0xff] %vm3788_vm4, %v3761_v57  ;;  %v11606_v30 = vld [vmem:[#allocation3 + $0x19] sm:$0xff] }
 0x2e7   : > { %3839 = vst.msk [vmem:[#allocation3 + $0x49] sm:$0xff] %vm3788_vm4, %v3760_v29  ;;  %v9353_v31 = vpop.f32.mrb[6].mxu0  ;;  %9395 = vmatprep.mubr.msk.f32.mxu1 %vm3788_vm4, %v11606_v30 }
 0x2e8   : > { %v3763_v32 = vmax.f32 %v9353_v31, 0.0  ;;  %v3595_v33 = vpop.f32.mrb[7].mxu0  ;;  %9396 = vmatmul.mubr.msk.f32.gmra.mrb[18].mxu1 %vm3788_vm4, %v11611_v1 }
 0x2e9   : > { %v3762_v34 = vmax.f32 %v3595_v33, 0.0  ;;  %v11621_v47 = vld [vmem:[#allocation3 + $0x39] sm:$0xff] }
 0x2ea   : > { %3842 = vst.msk [vmem:[#allocation3 + $0x69] sm:$0xff] %vm3788_vm4, %v3763_v32  ;;  %v11616_v45 = vld [vmem:[#allocation3 + $0x31] sm:$0xff] }
 0x2eb   : > { %3841 = vst.msk [vmem:[#allocation3 + $0x61] sm:$0xff] %vm3788_vm4, %v3762_v34  ;;  %v9356_v46 = vpop.f32.mrb[8].mxu0  ;;  %9398 = vmatprep.mubr.msk.f32.mxu1 %vm3788_vm4, %v11616_v45 }
 0x2ec   : > { %v3765_v48 = vmax.f32 %v9356_v46, 0.0  ;;  %v3605_v49 = vpop.f32.mrb[9].mxu0  ;;  %9399 = vmatmul.mubr.msk.f32.gmra.mrb[20].mxu1 %vm3788_vm4, %v11621_v47 }
 0x2ed   : > { %v3764_v58 = vmax.f32 %v3605_v49, 0.0  ;;  %v11631_v61 = vld [vmem:[#allocation3 + $0x51] sm:$0xff] }
 0x2ee   : > { %3844 = vst.msk [vmem:[#allocation3 + $0x81] sm:$0xff] %vm3788_vm4, %v3765_v48  ;;  %v11626_v59 = vld [vmem:[#allocation3 + $0x49] sm:$0xff] }
 0x2ef   : > { %3843 = vst.msk [vmem:[#allocation3 + $0x79] sm:$0xff] %vm3788_vm4, %v3764_v58  ;;  %v9359_v60 = vpop.f32.mrb[10].mxu0  ;;  %9401 = vmatprep.mubr.msk.f32.mxu1 %vm3788_vm4, %v11626_v59 }
 0x2f0   : > { %v3767_v62 = vmax.f32 %v9359_v60, 0.0  ;;  %v3615_v63 = vpop.f32.mrb[11].mxu0  ;;  %9402 = vmatmul.mubr.msk.f32.gmra.mrb[22].mxu1 %vm3788_vm4, %v11631_v61 }
 0x2f1   : > { %v3766_v0 = vmax.f32 %v3615_v63, 0.0  ;;  %v11641_v4 = vld [vmem:[#allocation3 + $0x69] sm:$0xff] }
 0x2f2   : > { %3846 = vst.msk [vmem:[#allocation3 + $0x99] sm:$0xff] %vm3788_vm4, %v3767_v62  ;;  %v11636_v2 = vld [vmem:[#allocation3 + $0x61] sm:$0xff] }
 0x2f3   : > { %3845 = vst.msk [vmem:[#allocation3 + $0x91] sm:$0xff] %vm3788_vm4, %v3766_v0  ;;  %v9362_v3 = vpop.f32.mrb[12].mxu0  ;;  %9404 = vmatprep.mubr.msk.f32.mxu1 %vm3788_vm4, %v11636_v2 }
 0x2f4   : > { %v3769_v5 = vmax.f32 %v9362_v3, 0.0  ;;  %v3625_v6 = vpop.f32.mrb[13].mxu0  ;;  %9405 = vmatmul.mubr.msk.f32.gmra.mrb[24].mxu1 %vm3788_vm4, %v11641_v4 }
 0x2f5   : > { %v3768_v7 = vmax.f32 %v3625_v6, 0.0  ;;  %v11651_v10 = vld [vmem:[#allocation3 + $0x81] sm:$0xff] }
 0x2f6   : > { %3848 = vst.msk [vmem:[#allocation3 + $0xb1] sm:$0xff] %vm3788_vm4, %v3769_v5  ;;  %v11646_v8 = vld [vmem:[#allocation3 + $0x79] sm:$0xff] }
 0x2f7   : > { %3847 = vst.msk [vmem:[#allocation3 + $0xa9] sm:$0xff] %vm3788_vm4, %v3768_v7  ;;  %v9365_v9 = vpop.f32.mrb[14].mxu0  ;;  %9407 = vmatprep.mubr.msk.f32.mxu1 %vm3788_vm4, %v11646_v8 }
 0x2f8   : > { %v3771_v26 = vmax.f32 %v9365_v9, 0.0  ;;  %v3635_v11 = vpop.f32.mrb[15].mxu0  ;;  %9408 = vmatmul.mubr.msk.f32.gmra.mrb[26].mxu1 %vm3788_vm4, %v11651_v10 }
 0x2f9   : > { %v3770_v12 = vmax.f32 %v3635_v11, 0.0  ;;  %v11661_v15 = vld [vmem:[#allocation3 + $0x99] sm:$0xff] }
 0x2fa   : > { %3850 = vst.msk [vmem:[#allocation3 + $0xc9] sm:$0xff] %vm3788_vm4, %v3771_v26  ;;  %v11656_v13 = vld [vmem:[#allocation3 + $0x91] sm:$0xff] }
 0x2fb   : > { %3849 = vst.msk [vmem:[#allocation3 + $0xc1] sm:$0xff] %vm3788_vm4, %v3770_v12  ;;  %v9368_v14 = vpop.f32.mrb[16].mxu0  ;;  %9410 = vmatprep.mubr.msk.f32.mxu1 %vm3788_vm4, %v11656_v13 }
 0x2fc   : > { %v9892_v16 = vadd.f32 %v9368_v14, %v11563_v20  ;;  %v3645_v19 = vpop.f32.mrb[17].mxu0  ;;  %9411 = vmatmul.mubr.msk.f32.gmra.mrb[28].mxu1 %vm3788_vm4, %v11661_v15 }
 0x2fd   : > { %v9893_v23 = vadd.f32 %v3645_v19, %v11565_v21  ;;  %v11671_v36 = vld [vmem:[#allocation3 + $0xb1] sm:$0xff] }
 0x2fe   : > { %v3773_v52 = vmax.f32 %v9892_v16, 0.0  ;;  %v11667_v54 = vld [vmem:[#allocation3 + $0xa9] sm:$0xff] }
 0x2ff   : > { %v3772_v35 = vmax.f32 %v9893_v23, 0.0  ;;  %v9371_v27 = vpop.f32.mrb[18].mxu0  ;;  %9413 = vmatprep.mubr.msk.f32.mxu1 %vm3788_vm4, %v11667_v54 }
 0x300   : > { %3852 = vst.msk [vmem:[#allocation3 + $0xe1] sm:$0xff] %vm3788_vm4, %v3773_v52  ;;  %v9894_v20 = vadd.f32 %v9371_v27, %v11567_v24  ;;  %v3655_v25 = vpop.f32.mrb[19].mxu0  ;;  %9414 = vmatmul.mubr.msk.f32.gmra.mrb[30].mxu1 %vm3788_vm4, %v11671_v36 }
 0x301   : > { %3851 = vst.msk [vmem:[#allocation3 + $0xd9] sm:$0xff] %vm3788_vm4, %v3772_v35  ;;  %v9895_v21 = vadd.f32 %v3655_v25, %v11569_v37  ;;  %v11683_v29 = vld [vmem:[#allocation3 + $0xc9] sm:$0xff] }
 0x302   : > { %v3775_v55 = vmax.f32 %v9894_v20, 0.0  ;;  %v11679_v56 = vld [vmem:[#allocation3 + $0xc1] sm:$0xff] }
 0x303   : > { %v3774_v57 = vmax.f32 %v9895_v21, 0.0  ;;  %v9374_v28 = vpop.f32.mrb[20].mxu0  ;;  %9416 = vmatprep.mubr.msk.f32.mxu1 %vm3788_vm4, %v11679_v56 }
 0x304   : > { %3854 = vst.msk [vmem:[#allocation3 + $0xf9] sm:$0xff] %vm3788_vm4, %v3775_v55  ;;  %v9896_v24 = vadd.f32 %v9374_v28, %v11571_v38  ;;  %v3665_v31 = vpop.f32.mrb[21].mxu0  ;;  %9417 = vmatmul.mubr.msk.f32.gmra.mrb[32].mxu1 %vm3788_vm4, %v11683_v29 }
 0x305   : > { %3853 = vst.msk [vmem:[#allocation3 + $0xf1] sm:$0xff] %vm3788_vm4, %v3774_v57  ;;  %v9897_v37 = vadd.f32 %v3665_v31, %v11573_v39  ;;  %v3867_v31 = vld [vmem:[#allocation3] sm:$0xff] }
 0x306   : > { %v3777_v32 = vmax.f32 %v9896_v24, 0.0 }
 0x307   : > { %v3776_v33 = vmax.f32 %v9897_v37, 0.0  ;;  %v9377_v34 = vpop.f32.mrb[22].mxu0  ;;  %v11699_v58 = vld [vmem:[#allocation3 + $0xe1] sm:$0xff] }
 0x308   : > { %3856 = vst.msk [vmem:[#allocation3 + $0x111] sm:$0xff] %vm3788_vm4, %v3777_v32  ;;  %v9898_v46 = vadd.f32 %v9377_v34, %v11575_v40  ;;  %v3675_v48 = vpop.f32.mrb[23].mxu0  ;;  %v11693_v49 = vld [vmem:[#allocation3 + $0xd9] sm:$0xff]  ;;  %v3868_v32 = vld [vmem:[#allocation3 + $0x8] sm:$0xff] }
 0x309   : > { %3855 = vst.msk [vmem:[#allocation3 + $0x109] sm:$0xff] %vm3788_vm4, %v3776_v33  ;;  %v9899_v38 = vadd.f32 %v3675_v48, %v11577_v41  ;;  %9419 = vmatprep.mubr.msk.f32.mxu1 %vm3788_vm4, %v11693_v49  ;;  %v11773_v33 = vld [vmem:[%s12592_s2 + $0x18] sm:$0xff]  ;;  %v11776_v34 = vld [vmem:[#allocation3 + $0x18] sm:$0xff]  ;;  %v11786_v48 = vld [vmem:[#allocation3 + $0x30] sm:$0xff] }
 0x30a   : > { %v3779_v39 = vmax.f32 %v9898_v46, 0.0  ;;  %9420 = vmatmul.mubr.msk.f32.gmra.mrb[34].mxu1 %vm3788_vm4, %v11699_v58  ;;  %v11782_v46 = vld [vmem:[#allocation3 + $0x20] sm:$0xff] }
 0x30b   : > { %v3778_v60 = vmax.f32 %v9899_v38, 0.0  ;;  %v9380_v62 = vpop.f32.mrb[24].mxu0  ;;  %v11711_v3 = vld [vmem:[#allocation3 + $0xf9] sm:$0xff] }
 0x30c   : > { %3858 = vst.msk [vmem:[#allocation3 + $0x129] sm:$0xff] %vm3788_vm4, %v3779_v39  ;;  %v9900_v40 = vadd.f32 %v9380_v62, %v11579_v42  ;;  %v3685_v63 = vpop.f32.mrb[25].mxu0  ;;  %v11705_v0 = vld [vmem:[#allocation3 + $0xf1] sm:$0xff]  ;;  %v11806_v62 = vld [vmem:[#allocation3 + $0x68] sm:$0xff] }
 0x30d   : > { %3857 = vst.msk [vmem:[#allocation3 + $0x121] sm:$0xff] %vm3788_vm4, %v3778_v60  ;;  %v9901_v41 = vadd.f32 %v3685_v63, %v11581_v43  ;;  %9422 = vmatprep.mubr.msk.f32.mxu1 %vm3788_vm4, %v11705_v0  ;;  %v11790_v38 = vld [vmem:[#allocation3 + $0x38] sm:$0xff]  ;;  %v11798_v39 = vld [vmem:[#allocation3 + $0x50] sm:$0xff]  ;;  %v11802_v60 = vld [vmem:[#allocation3 + $0x60] sm:$0xff] }
 0x30e   : > { %v3781_v5 = vmax.f32 %v9900_v40, 0.0  ;;  %9423 = vmatmul.mubr.msk.f32.gmra.mrb[36].mxu1 %vm3788_vm4, %v11711_v3  ;;  %v11810_v40 = vld [vmem:[#allocation3 + $0x78] sm:$0xff]  ;;  %v11814_v63 = vld [vmem:[#allocation3 + $0x80] sm:$0xff] }
 0x30f   : > { %v3780_v6 = vmax.f32 %v9901_v41, 0.0  ;;  %v9383_v7 = vpop.f32.mrb[26].mxu0  ;;  %v11723_v11 = vld [vmem:[#allocation3 + $0x111] sm:$0xff] }
 0x310   : > { %3860 = vst.msk [vmem:[#allocation3 + $0x141] sm:$0xff] %vm3788_vm4, %v3781_v5  ;;  %v9902_v42 = vadd.f32 %v9383_v7, %v11583_v44  ;;  %v3695_v9 = vpop.f32.mrb[27].mxu0  ;;  %v11717_v26 = vld [vmem:[#allocation3 + $0x109] sm:$0xff]  ;;  %v11822_v5 = vld [vmem:[#allocation3 + $0x98] sm:$0xff] }
 0x311   : > { %3859 = vst.msk [vmem:[#allocation3 + $0x139] sm:$0xff] %vm3788_vm4, %v3780_v6  ;;  %v9903_v43 = vadd.f32 %v3695_v9, %v11585_v50  ;;  %9425 = vmatprep.mubr.msk.f32.mxu1 %vm3788_vm4, %v11717_v26  ;;  %v11818_v41 = vld [vmem:[#allocation3 + $0x90] sm:$0xff]  ;;  %v11826_v6 = vld [vmem:[#allocation3 + $0xa8] sm:$0xff] }
 0x312   : > { %v3783_v12 = vmax.f32 %v9902_v42, 0.0  ;;  %9426 = vmatmul.mubr.msk.f32.gmra.mrb[38].mxu1 %vm3788_vm4, %v11723_v11  ;;  %v11830_v7 = vld [vmem:[#allocation3 + $0xb0] sm:$0xff]  ;;  %v11834_v42 = vld [vmem:[#allocation3 + $0xc0] sm:$0xff]  ;;  %v11838_v9 = vld [vmem:[#allocation3 + $0xc8] sm:$0xff] }
 0x313   : > { %v3782_v14 = vmax.f32 %v9903_v43, 0.0  ;;  %v9386_v16 = vpop.f32.mrb[28].mxu0  ;;  %v11735_v52 = vld [vmem:[#allocation3 + $0x129] sm:$0xff]  ;;  %v11842_v43 = vld [vmem:[#allocation3 + $0xd8] sm:$0xff] }
 0x314   : > { %3862 = vst.msk [vmem:[#allocation3 + $0x159] sm:$0xff] %vm3788_vm4, %v3783_v12  ;;  %v9904_v44 = vadd.f32 %v9386_v16, %v11587_v51  ;;  %v3705_v19 = vpop.f32.mrb[29].mxu0  ;;  %v11729_v23 = vld [vmem:[#allocation3 + $0x121] sm:$0xff]  ;;  %v11854_v16 = vld [vmem:[#allocation3 + $0xf8] sm:$0xff] }
 0x315   : > { %3861 = vst.msk [vmem:[#allocation3 + $0x151] sm:$0xff] %vm3788_vm4, %v3782_v14  ;;  %v9905_v50 = vadd.f32 %v3705_v19, %v11589_v53  ;;  %9428 = vmatprep.mubr.msk.f32.mxu1 %vm3788_vm4, %v11729_v23  ;;  %v11846_v12 = vld [vmem:[#allocation3 + $0xe0] sm:$0xff]  ;;  %v11850_v14 = vld [vmem:[#allocation3 + $0xf0] sm:$0xff] }
 0x316   : > { %v3785_v35 = vmax.f32 %v9904_v44, 0.0  ;;  %9429 = vmatmul.mubr.msk.f32.gmra.mrb[40].mxu1 %vm3788_vm4, %v11735_v52  ;;  %v11858_v44 = vld [vmem:[#allocation3 + $0x108] sm:$0xff]  ;;  %v11862_v19 = vld [vmem:[#allocation3 + $0x110] sm:$0xff] }
 0x317   : > { %v3784_v27 = vmax.f32 %v9905_v50, 0.0  ;;  %v9389_v20 = vpop.f32.mrb[30].mxu0  ;;  %v11747_v55 = vld [vmem:[#allocation3 + $0x141] sm:$0xff] }
 0x318   : > { %3864 = vst.msk [vmem:[#allocation3 + $0x171] sm:$0xff] %vm3788_vm4, %v3785_v35  ;;  %v9906_v51 = vadd.f32 %v9389_v20, %v11591_v17  ;;  %v3715_v25 = vpop.f32.mrb[31].mxu0  ;;  %v11741_v21 = vld [vmem:[#allocation3 + $0x139] sm:$0xff]  ;;  %v11870_v35 = vld [vmem:[#allocation3 + $0x128] sm:$0xff] }
 0x319   : > { %3863 = vst.msk [vmem:[#allocation3 + $0x169] sm:$0xff] %vm3788_vm4, %v3784_v27  ;;  %v9907_v53 = vadd.f32 %v3715_v25, %v11593_v18  ;;  %9431 = vmatprep.mubr.msk.f32.mxu1 %vm3788_vm4, %v11741_v21  ;;  %v11866_v50 = vld [vmem:[#allocation3 + $0x120] sm:$0xff]  ;;  %v11874_v27 = vld [vmem:[#allocation3 + $0x138] sm:$0xff] }
 0x31a   : > { %v3787_v57 = vmax.f32 %v9906_v51, 0.0  ;;  %9432 = vmatmul.mubr.msk.f32.gmra.mrb[42].mxu1 %vm3788_vm4, %v11747_v55  ;;  %v11878_v20 = vld [vmem:[#allocation3 + $0x140] sm:$0xff] }
 0x31b   : > { %v3786_v28 = vmax.f32 %v9907_v53, 0.0  ;;  %v11757_v18 = vld [vmem:[#allocation3 + $0x159] sm:$0xff] }
 0x31c   : > { %3866 = vst.msk [vmem:[#allocation3 + $0x189] sm:$0xff] %vm3788_vm4, %v3787_v57  ;;  %v11752_v17 = vld [vmem:[#allocation3 + $0x151] sm:$0xff]  ;;  %v4576_v57 = vld [vmem:[#allocation3 + $0x2] sm:$0xff] }
 0x31d   : > { %3865 = vst.msk [vmem:[#allocation3 + $0x181] sm:$0xff] %vm3788_vm4, %v3786_v28  ;;  %9434 = vmatprep.mubr.msk.f32.mxu1 %vm3788_vm4, %v11752_v17  ;;  %v11882_v51 = vld [vmem:[#allocation3 + $0x150] sm:$0xff]  ;;  %v11886_v25 = vld [vmem:[#allocation3 + $0x158] sm:$0xff] }
 0x31e   : > { %9435 = vmatmul.mubr.msk.f32.gmra.mrb[44].mxu1 %vm3788_vm4, %v11757_v18 }
 0x31f   : > { %v11765_v37 = vld [vmem:[#allocation3 + $0x171] sm:$0xff] }
 0x320   : > { %v11761_v24 = vld [vmem:[#allocation3 + $0x169] sm:$0xff]  ;;  %12812 = vst [vmem:[#allocation6_spill] sm:$0xff] %v11765_v37 }
 0x321   : > { %12811 = vst [vmem:[#allocation5_spill] sm:$0xff] %v11761_v24  ;;  %9437 = vmatprep.mubr.msk.f32.mxu1 %vm3788_vm4, %v11761_v24  ;;  %v11890_v53 = vld [vmem:[#allocation3 + $0x168] sm:$0xff]  ;;  %v11894_v28 = vld [vmem:[#allocation3 + $0x170] sm:$0xff] }
 0x322   : > { %9438 = vmatmul.mubr.msk.f32.gmra.mrb[46].mxu1 %vm3788_vm4, %v11765_v37  ;;  %v11905_v37 = vld [vmem:[#allocation3 + $0x1a] sm:$0xff]  ;;  %v11911_v24 = vld [vmem:[#allocation3 + $0x22] sm:$0xff] }
 0x323   : > { %9442 = vmatprep.mubr.msk.f32.mxu1 %vm3788_vm4, %v3867_v31  ;;  %v4577_v31 = vld [vmem:[#allocation3 + $0xa] sm:$0xff]  ;;  %12813 = vst [vmem:[#allocation24_spill] sm:$0xff] %v11905_v37  ;;  %12814 = vst [vmem:[#allocation25_spill] sm:$0xff] %v11911_v24 }
 0x326   : > { %9443 = vmatmul.mubr.msk.f32.vlgmr.msra.gmra.mrb[16].mxu1 %vm3788_vm4, %v3868_v32  ;;  %v11902_v32 = vld [vmem:[%s12592_s2 + $0x20] sm:$0xff] }
 0x327   : > { %9491 = vmatpush3.msra.mxu1 %v11598_v22  ;;  %9445 = vmatprep.mubr.msk.f32.mxu1 %vm3788_vm4, %v11776_v34  ;;  %v11794_v22 = vld [vmem:[#allocation3 + $0x48] sm:$0xff] }
 0x328   : > { %9540 = vmatprep.subr.mxu1 %v11773_v33 }
 0x32a   : > { %9446 = vmatmul.mubr.msk.f32.gmra.mrb[18].mxu1 %vm3788_vm4, %v11782_v46 }
 0x32b   : > { %9448 = vmatprep.mubr.msk.f32.mxu1 %vm3788_vm4, %v11786_v48 }
 0x32e   : > { %9449 = vmatmul.mubr.msk.f32.gmra.mrb[20].mxu1 %vm3788_vm4, %v11790_v38 }
 0x32f   : > { %9451 = vmatprep.mubr.msk.f32.mxu1 %vm3788_vm4, %v11794_v22 }
 0x332   : > { %9452 = vmatmul.mubr.msk.f32.gmra.mrb[22].mxu1 %vm3788_vm4, %v11798_v39 }
 0x333   : > { %9454 = vmatprep.mubr.msk.f32.mxu1 %vm3788_vm4, %v11802_v60 }
 0x336   : > { %9455 = vmatmul.mubr.msk.f32.gmra.mrb[24].mxu1 %vm3788_vm4, %v11806_v62 }
 0x337   : > { %9457 = vmatprep.mubr.msk.f32.mxu1 %vm3788_vm4, %v11810_v40 }
 0x33a   : > { %9458 = vmatmul.mubr.msk.f32.gmra.mrb[26].mxu1 %vm3788_vm4, %v11814_v63 }
 0x33b   : > { %9460 = vmatprep.mubr.msk.f32.mxu1 %vm3788_vm4, %v11818_v41 }
 0x33e   : > { %9461 = vmatmul.mubr.msk.f32.gmra.mrb[28].mxu1 %vm3788_vm4, %v11822_v5 }
 0x33f   : > { %9463 = vmatprep.mubr.msk.f32.mxu1 %vm3788_vm4, %v11826_v6 }
 0x342   : > { %9464 = vmatmul.mubr.msk.f32.gmra.mrb[30].mxu1 %vm3788_vm4, %v11830_v7 }
 0x343   : > { %9466 = vmatprep.mubr.msk.f32.mxu1 %vm3788_vm4, %v11834_v42 }
 0x346   : > { %9467 = vmatmul.mubr.msk.f32.gmra.mrb[32].mxu1 %vm3788_vm4, %v11838_v9 }
 0x347   : > { %9469 = vmatprep.mubr.msk.f32.mxu1 %vm3788_vm4, %v11842_v43 }
 0x34a   : > { %9470 = vmatmul.mubr.msk.f32.gmra.mrb[34].mxu1 %vm3788_vm4, %v11846_v12 }
 0x34b   : > { %9472 = vmatprep.mubr.msk.f32.mxu1 %vm3788_vm4, %v11850_v14 }
 0x34e   : > { %9473 = vmatmul.mubr.msk.f32.gmra.mrb[36].mxu1 %vm3788_vm4, %v11854_v16 }
 0x34f   : > { %9475 = vmatprep.mubr.msk.f32.mxu1 %vm3788_vm4, %v11858_v44 }
 0x352   : > { %9476 = vmatmul.mubr.msk.f32.gmra.mrb[38].mxu1 %vm3788_vm4, %v11862_v19 }
 0x353   : > { %9478 = vmatprep.mubr.msk.f32.mxu1 %vm3788_vm4, %v11866_v50 }
 0x356   : > { %9479 = vmatmul.mubr.msk.f32.gmra.mrb[40].mxu1 %vm3788_vm4, %v11870_v35 }
 0x357   : > { %9481 = vmatprep.mubr.msk.f32.mxu1 %vm3788_vm4, %v11874_v27 }
 0x35a   : > { %9482 = vmatmul.mubr.msk.f32.gmra.mrb[42].mxu1 %vm3788_vm4, %v11878_v20 }
 0x35b   : > { %9484 = vmatprep.mubr.msk.f32.mxu1 %vm3788_vm4, %v11882_v51 }
 0x35e   : > { %9485 = vmatmul.mubr.msk.f32.gmra.mrb[44].mxu1 %vm3788_vm4, %v11886_v25 }
 0x35f   : > { %9487 = vmatprep.mubr.msk.f32.mxu1 %vm3788_vm4, %v11890_v53 }
 0x362   : > { %9488 = vmatmul.mubr.msk.f32.gmra.mrb[46].mxu1 %vm3788_vm4, %v11894_v28 }
 0x363   : > { %9492 = vmatprep.mubr.msk.f32.mxu1 %vm3788_vm4, %v4576_v57  ;;  %v11915_v57 = vld [vmem:[#allocation3 + $0x32] sm:$0xff] }
 0x364   : > { %12815 = vst [vmem:[#allocation27_spill] sm:$0xff] %v11915_v57 }
 0x366   : > { %9493 = vmatmul.mubr.msk.f32.vlgmr.msra.gmra.mrb[16].mxu1 %vm3788_vm4, %v4577_v31  ;;  %v11919_v31 = vld [vmem:[#allocation3 + $0x3a] sm:$0xff] }
 0x367   : > { %9541 = vmatpush3.msra.mxu1 %v11773_v33  ;;  %9495 = vmatprep.mubr.msk.f32.mxu1 %vm3788_vm4, %v11905_v37  ;;  %12816 = vst [vmem:[#allocation29_spill] sm:$0xff] %v11919_v31  ;;  %v11923_v33 = vld [vmem:[#allocation3 + $0x4a] sm:$0xff]  ;;  %v11927_v37 = vld [vmem:[#allocation3 + $0x52] sm:$0xff] }
 0x368   : > { %9590 = vmatprep.subr.mxu1 %v11902_v32  ;;  %12817 = vst [vmem:[#allocation33_spill] sm:$0xff] %v11923_v33  ;;  %12818 = vst [vmem:[#allocation35_spill] sm:$0xff] %v11927_v37 }
 0x36a   : > { %9496 = vmatmul.mubr.msk.f32.gmra.mrb[18].mxu1 %vm3788_vm4, %v11911_v24  ;;  %v11931_v24 = vld [vmem:[#allocation3 + $0x62] sm:$0xff] }
 0x36b   : > { %9498 = vmatprep.mubr.msk.f32.mxu1 %vm3788_vm4, %v11915_v57  ;;  %12819 = vst [vmem:[#allocation28_spill] sm:$0xff] %v11931_v24  ;;  %v11935_v57 = vld [vmem:[#allocation3 + $0x6a] sm:$0xff] }
 0x36c   : > { %12820 = vst [vmem:[#allocation30_spill] sm:$0xff] %v11935_v57 }
 0x36e   : > { %9499 = vmatmul.mubr.msk.f32.gmra.mrb[20].mxu1 %vm3788_vm4, %v11919_v31  ;;  %v11939_v31 = vld [vmem:[#allocation3 + $0x7a] sm:$0xff] }
 0x36f   : > { %9501 = vmatprep.mubr.msk.f32.mxu1 %vm3788_vm4, %v11923_v33  ;;  %12821 = vst [vmem:[#allocation32_spill] sm:$0xff] %v11939_v31  ;;  %v11943_v33 = vld [vmem:[#allocation3 + $0x82] sm:$0xff] }
 0x370   : > { %12822 = vst [vmem:[#allocation34_spill] sm:$0xff] %v11943_v33 }
 0x372   : > { %9502 = vmatmul.mubr.msk.f32.gmra.mrb[22].mxu1 %vm3788_vm4, %v11927_v37  ;;  %v11947_v37 = vld [vmem:[#allocation3 + $0x92] sm:$0xff] }
 0x373   : > { %9504 = vmatprep.mubr.msk.f32.mxu1 %vm3788_vm4, %v11931_v24  ;;  %12823 = vst [vmem:[#allocation36_spill] sm:$0xff] %v11947_v37  ;;  %v11951_v24 = vld [vmem:[#allocation3 + $0x9a] sm:$0xff] }
 0x374   : > { %12824 = vst [vmem:[#allocation37_spill] sm:$0xff] %v11951_v24 }
 0x376   : > { %9505 = vmatmul.mubr.msk.f32.gmra.mrb[24].mxu1 %vm3788_vm4, %v11935_v57  ;;  %v11955_v57 = vld [vmem:[#allocation3 + $0xaa] sm:$0xff] }
 0x377   : > { %9507 = vmatprep.mubr.msk.f32.mxu1 %vm3788_vm4, %v11939_v31  ;;  %12825 = vst [vmem:[#allocation39_spill] sm:$0xff] %v11955_v57  ;;  %v11959_v31 = vld [vmem:[#allocation3 + $0xb2] sm:$0xff] }
 0x378   : > { %12826 = vst [vmem:[#allocation40_spill] sm:$0xff] %v11959_v31 }
 0x37a   : > { %9508 = vmatmul.mubr.msk.f32.gmra.mrb[26].mxu1 %vm3788_vm4, %v11943_v33  ;;  %v11963_v33 = vld [vmem:[#allocation3 + $0xc2] sm:$0xff] }
 0x37b   : > { %9510 = vmatprep.mubr.msk.f32.mxu1 %vm3788_vm4, %v11947_v37  ;;  %12827 = vst [vmem:[#allocation7_spill] sm:$0xff] %v11963_v33  ;;  %v11967_v37 = vld [vmem:[#allocation3 + $0xca] sm:$0xff] }
 0x37c   : > { %12828 = vst [vmem:[#allocation8_spill] sm:$0xff] %v11967_v37 }
 0x37e   : > { %9511 = vmatmul.mubr.msk.f32.gmra.mrb[28].mxu1 %vm3788_vm4, %v11951_v24  ;;  %v11971_v24 = vld [vmem:[#allocation3 + $0xda] sm:$0xff] }
 0x37f   : > { %9513 = vmatprep.mubr.msk.f32.mxu1 %vm3788_vm4, %v11955_v57  ;;  %12829 = vst [vmem:[#allocation9_spill] sm:$0xff] %v11971_v24  ;;  %v11975_v57 = vld [vmem:[#allocation3 + $0xe2] sm:$0xff] }
 0x380   : > { %12830 = vst [vmem:[#allocation10_spill] sm:$0xff] %v11975_v57 }
 0x382   : > { %9514 = vmatmul.mubr.msk.f32.gmra.mrb[30].mxu1 %vm3788_vm4, %v11959_v31  ;;  %v11979_v31 = vld [vmem:[#allocation3 + $0xf2] sm:$0xff] }
 0x383   : > { %9516 = vmatprep.mubr.msk.f32.mxu1 %vm3788_vm4, %v11963_v33  ;;  %12831 = vst [vmem:[#allocation11_spill] sm:$0xff] %v11979_v31  ;;  %v11983_v33 = vld [vmem:[#allocation3 + $0xfa] sm:$0xff] }
 0x384   : > { %12832 = vst [vmem:[#allocation12_spill] sm:$0xff] %v11983_v33 }
 0x386   : > { %9517 = vmatmul.mubr.msk.f32.gmra.mrb[32].mxu1 %vm3788_vm4, %v11967_v37  ;;  %v11987_v37 = vld [vmem:[#allocation3 + $0x10a] sm:$0xff] }
 0x387   : > { %9519 = vmatprep.mubr.msk.f32.mxu1 %vm3788_vm4, %v11971_v24  ;;  %12833 = vst [vmem:[#allocation13_spill] sm:$0xff] %v11987_v37  ;;  %v11991_v24 = vld [vmem:[#allocation3 + $0x112] sm:$0xff] }
 0x388   : > { %12834 = vst [vmem:[#allocation14_spill] sm:$0xff] %v11991_v24 }
 0x38a   : > { %9520 = vmatmul.mubr.msk.f32.gmra.mrb[34].mxu1 %vm3788_vm4, %v11975_v57  ;;  %v11995_v57 = vld [vmem:[#allocation3 + $0x122] sm:$0xff] }
 0x38b   : > { %9522 = vmatprep.mubr.msk.f32.mxu1 %vm3788_vm4, %v11979_v31  ;;  %12835 = vst [vmem:[#allocation15_spill] sm:$0xff] %v11995_v57  ;;  %v11999_v31 = vld [vmem:[#allocation3 + $0x12a] sm:$0xff] }
 0x38c   : > { %12836 = vst [vmem:[#allocation16_spill] sm:$0xff] %v11999_v31 }
 0x38e   : > { %9523 = vmatmul.mubr.msk.f32.gmra.mrb[36].mxu1 %vm3788_vm4, %v11983_v33  ;;  %v12003_v33 = vld [vmem:[#allocation3 + $0x13a] sm:$0xff] }
 0x38f   : > { %9525 = vmatprep.mubr.msk.f32.mxu1 %vm3788_vm4, %v11987_v37  ;;  %12837 = vst [vmem:[#allocation17_spill] sm:$0xff] %v12003_v33  ;;  %v12007_v37 = vld [vmem:[#allocation3 + $0x142] sm:$0xff] }
 0x392   : > { %9526 = vmatmul.mubr.msk.f32.gmra.mrb[38].mxu1 %vm3788_vm4, %v11991_v24  ;;  %v12011_v24 = vld [vmem:[#allocation3 + $0x152] sm:$0xff] }
 0x393   : > { %9528 = vmatprep.mubr.msk.f32.mxu1 %vm3788_vm4, %v11995_v57  ;;  %12838 = vst [vmem:[#allocation18_spill] sm:$0xff] %v12011_v24  ;;  %v12015_v57 = vld [vmem:[#allocation3 + $0x15a] sm:$0xff] }
 0x396   : > { %9529 = vmatmul.mubr.msk.f32.gmra.mrb[40].mxu1 %vm3788_vm4, %v11999_v31  ;;  %v12019_v31 = vld [vmem:[#allocation3 + $0x16a] sm:$0xff] }
 0x397   : > { %9531 = vmatprep.mubr.msk.f32.mxu1 %vm3788_vm4, %v12003_v33  ;;  %v12023_v33 = vld [vmem:[#allocation3 + $0x172] sm:$0xff] }
 0x398   : > { %12839 = vst [vmem:[#allocation19_spill] sm:$0xff] %v12023_v33 }
 0x39a   : > { %9532 = vmatmul.mubr.msk.f32.gmra.mrb[42].mxu1 %vm3788_vm4, %v12007_v37 }
 0x39b   : > { %9534 = vmatprep.mubr.msk.f32.mxu1 %vm3788_vm4, %v12011_v24  ;;  %v8144_v24 = vld [vmem:[%s12592_s2 + $0x28] sm:$0xff] }
 0x39e   : > { %9535 = vmatmul.mubr.msk.f32.gmra.mrb[44].mxu1 %vm3788_vm4, %v12015_v57 }
 0x39f   : > { %9537 = vmatprep.mubr.msk.f32.mxu1 %vm3788_vm4, %v12019_v31 }
 0x3a2   : > { %9538 = vmatmul.mubr.msk.f32.gmra.mrb[46].mxu1 %vm3788_vm4, %v12023_v33 }
 0x3a3   : > { %9542 = vmatprep.mubr.msk.f32.mxu1 %vm3788_vm4, %v11776_v34  ;;  %v12091_v34 = vld [vmem:[#allocation3 + $0x180] sm:$0xff] }
 0x3a6   : > { %9543 = vmatmul.mubr.msk.f32.vlgmr.msra.gmra.mrb[16].mxu1 %vm3788_vm4, %v11782_v46  ;;  %v12095_v46 = vld [vmem:[#allocation3 + $0x188] sm:$0xff] }
 0x3a7   : > { %9591 = vmatpush3.msra.mxu1 %v11902_v32  ;;  %9545 = vmatprep.mubr.msk.f32.mxu1 %vm3788_vm4, %v11786_v48  ;;  %v8177_v32 = vld [vmem:[%s12592_s2 + $0x30] sm:$0xff] }
 0x3a8   : > { %9640 = vmatprep.subr.mxu1 %v8144_v24 }
 0x3aa   : > { %9546 = vmatmul.mubr.msk.f32.gmra.mrb[18].mxu1 %vm3788_vm4, %v11790_v38 }
 0x3ab   : > { %9548 = vmatprep.mubr.msk.f32.mxu1 %vm3788_vm4, %v11794_v22 }
 0x3ae   : > { %9549 = vmatmul.mubr.msk.f32.gmra.mrb[20].mxu1 %vm3788_vm4, %v11798_v39 }
 0x3af   : > { %9551 = vmatprep.mubr.msk.f32.mxu1 %vm3788_vm4, %v11802_v60 }
 0x3b2   : > { %9552 = vmatmul.mubr.msk.f32.gmra.mrb[22].mxu1 %vm3788_vm4, %v11806_v62 }
 0x3b3   : > { %9554 = vmatprep.mubr.msk.f32.mxu1 %vm3788_vm4, %v11810_v40 }
 0x3b6   : > { %9555 = vmatmul.mubr.msk.f32.gmra.mrb[24].mxu1 %vm3788_vm4, %v11814_v63 }
 0x3b7   : > { %9557 = vmatprep.mubr.msk.f32.mxu1 %vm3788_vm4, %v11818_v41 }
 0x3ba   : > { %9558 = vmatmul.mubr.msk.f32.gmra.mrb[26].mxu1 %vm3788_vm4, %v11822_v5 }
 0x3bb   : > { %9560 = vmatprep.mubr.msk.f32.mxu1 %vm3788_vm4, %v11826_v6 }
 0x3be   : > { %9561 = vmatmul.mubr.msk.f32.gmra.mrb[28].mxu1 %vm3788_vm4, %v11830_v7 }
 0x3bf   : > { %9563 = vmatprep.mubr.msk.f32.mxu1 %vm3788_vm4, %v11834_v42 }
 0x3c2   : > { %9564 = vmatmul.mubr.msk.f32.gmra.mrb[30].mxu1 %vm3788_vm4, %v11838_v9 }
 0x3c3   : > { %9566 = vmatprep.mubr.msk.f32.mxu1 %vm3788_vm4, %v11842_v43 }
 0x3c6   : > { %9567 = vmatmul.mubr.msk.f32.gmra.mrb[32].mxu1 %vm3788_vm4, %v11846_v12 }
 0x3c7   : > { %9569 = vmatprep.mubr.msk.f32.mxu1 %vm3788_vm4, %v11850_v14 }
 0x3ca   : > { %9570 = vmatmul.mubr.msk.f32.gmra.mrb[34].mxu1 %vm3788_vm4, %v11854_v16 }
 0x3cb   : > { %9572 = vmatprep.mubr.msk.f32.mxu1 %vm3788_vm4, %v11858_v44 }
 0x3ce   : > { %9573 = vmatmul.mubr.msk.f32.gmra.mrb[36].mxu1 %vm3788_vm4, %v11862_v19 }
 0x3cf   : > { %9575 = vmatprep.mubr.msk.f32.mxu1 %vm3788_vm4, %v11866_v50 }
 0x3d2   : > { %9576 = vmatmul.mubr.msk.f32.gmra.mrb[38].mxu1 %vm3788_vm4, %v11870_v35 }
 0x3d3   : > { %9578 = vmatprep.mubr.msk.f32.mxu1 %vm3788_vm4, %v11874_v27 }
 0x3d6   : > { %9579 = vmatmul.mubr.msk.f32.gmra.mrb[40].mxu1 %vm3788_vm4, %v11878_v20 }
 0x3d7   : > { %9581 = vmatprep.mubr.msk.f32.mxu1 %vm3788_vm4, %v11882_v51 }
 0x3da   : > { %9582 = vmatmul.mubr.msk.f32.gmra.mrb[42].mxu1 %vm3788_vm4, %v11886_v25 }
 0x3db   : > { %9584 = vmatprep.mubr.msk.f32.mxu1 %vm3788_vm4, %v11890_v53 }
 0x3de   : > { %9585 = vmatmul.mubr.msk.f32.gmra.mrb[44].mxu1 %vm3788_vm4, %v11894_v28 }
 0x3df   : > { %9587 = vmatprep.mubr.msk.f32.mxu1 %vm3788_vm4, %v12091_v34 }
 0x3e2   : > { %9588 = vmatmul.mubr.msk.f32.gmra.mrb[46].mxu1 %vm3788_vm4, %v12095_v46 }
 0x3e3   : > { %9592 = vmatprep.mubr.msk.f32.mxu1 %vm3788_vm4, %v11606_v30  ;;  %v12840_v30 = vld [vmem:[#allocation5_spill] sm:$0xff] }
 0x3e6   : > { %9593 = vmatmul.mubr.msk.f32.vlgmr.msra.gmra.mrb[16].mxu1 %vm3788_vm4, %v11611_v1  ;;  %v12841_v1 = vld [vmem:[#allocation6_spill] sm:$0xff] }
 0x3e7   : > { %9641 = vmatpush3.msra.mxu1 %v8144_v24  ;;  %9595 = vmatprep.mubr.msk.f32.mxu1 %vm3788_vm4, %v11616_v45  ;;  %v12162_v45 = vld [vmem:[#allocation3 + $0x181] sm:$0xff]  ;;  %v10419_v24 = vld [vmem:[#allocation2 + $0x69] sm:$0xff] }
 0x3e8   : > { %9690 = vmatprep.subr.mxu1 %v8177_v32 }
 0x3ea   : > { %9596 = vmatmul.mubr.msk.f32.gmra.mrb[18].mxu1 %vm3788_vm4, %v11621_v47  ;;  %v12166_v47 = vld [vmem:[#allocation3 + $0x189] sm:$0xff] }
 0x3eb   : > { %9598 = vmatprep.mubr.msk.f32.mxu1 %vm3788_vm4, %v11626_v59  ;;  %v12842_v59 = vld [vmem:[#allocation24_spill] sm:$0xff] }
 0x3ee   : > { %9599 = vmatmul.mubr.msk.f32.gmra.mrb[20].mxu1 %vm3788_vm4, %v11631_v61  ;;  %v12175_v61 = vld [vmem:[%s12592_s2 + $0x38] sm:$0xff] }
 0x3ef   : > { %9601 = vmatprep.mubr.msk.f32.mxu1 %vm3788_vm4, %v11636_v2  ;;  %v12843_v2 = vld [vmem:[#allocation25_spill] sm:$0xff] }
 0x3f2   : > { %9602 = vmatmul.mubr.msk.f32.gmra.mrb[22].mxu1 %vm3788_vm4, %v11641_v4  ;;  %v12844_v4 = vld [vmem:[#allocation27_spill] sm:$0xff] }
 0x3f3   : > { %9604 = vmatprep.mubr.msk.f32.mxu1 %vm3788_vm4, %v11646_v8  ;;  %v7318_v8 = vld [vmem:[%s12593_s3] sm:$0xf] }
 0x3f4   : > { %9840 = vmatprep.subr.msk.mxu0 %vm472_vm0, %v7318_v8 }
 0x3f5   : > { %9841 = vmatpush3.msk.msra.mxu0 %vm472_vm0, %v7318_v8  ;;  %v10421_v8 = vld [vmem:[#allocation2 + $0x81] sm:$0xff] }
 0x3f6   : > { %9605 = vmatmul.mubr.msk.f32.gmra.mrb[24].mxu1 %vm3788_vm4, %v11651_v10  ;;  %v12845_v10 = vld [vmem:[#allocation29_spill] sm:$0xff] }
 0x3f7   : > { %9607 = vmatprep.mubr.msk.f32.mxu1 %vm3788_vm4, %v11656_v13  ;;  %v10413_v13 = vld [vmem:[#allocation2 + $0x21] sm:$0xff] }
 0x3f8   : > { %9843 = vmatmul.mubr.msk.f32.vlgmr.msra.gmra.mrb[32].mxu0 %vm198_vm1, %v10413_v13  ;;  %v12854_v13 = vld [vmem:[#allocation39_spill] sm:$0xff] }
 0x3fa   : > { %9608 = vmatmul.mubr.msk.f32.gmra.mrb[26].mxu1 %vm3788_vm4, %v11661_v15  ;;  %v12846_v15 = vld [vmem:[#allocation33_spill] sm:$0xff] }
 0x3fb   : > { %9610 = vmatprep.mubr.msk.f32.mxu1 %vm3788_vm4, %v11667_v54  ;;  %v10414_v54 = vld [vmem:[#allocation2 + $0x31] sm:$0xff] }
 0x3fc   : > { %9845 = vmatprep.mubr.msk.f32.mxu0 %vm198_vm1, %v10414_v54  ;;  %v10422_v54 = vld [vmem:[#allocation2 + $0x91] sm:$0xff] }
 0x3fe   : > { %9611 = vmatmul.mubr.msk.f32.gmra.mrb[28].mxu1 %vm3788_vm4, %v11671_v36  ;;  %v12847_v36 = vld [vmem:[#allocation35_spill] sm:$0xff] }
 0x3ff   : > { %9613 = vmatprep.mubr.msk.f32.mxu1 %vm3788_vm4, %v11679_v56  ;;  %v10415_v56 = vld [vmem:[#allocation2 + $0x39] sm:$0xff] }
 0x400   : > { %9846 = vmatmul.mubr.msk.f32.gmra.mrb[34].mxu0 %vm198_vm1, %v10415_v56  ;;  %v12855_v56 = vld [vmem:[#allocation40_spill] sm:$0xff] }
 0x402   : > { %9614 = vmatmul.mubr.msk.f32.gmra.mrb[30].mxu1 %vm3788_vm4, %v11683_v29  ;;  %v12848_v29 = vld [vmem:[#allocation28_spill] sm:$0xff] }
 0x403   : > { %9616 = vmatprep.mubr.msk.f32.mxu1 %vm3788_vm4, %v11693_v49  ;;  %v10416_v49 = vld [vmem:[#allocation2 + $0x49] sm:$0xff] }
 0x404   : > { %9848 = vmatprep.mubr.msk.f32.mxu0 %vm198_vm1, %v10416_v49  ;;  %v10423_v49 = vld [vmem:[#allocation2 + $0x99] sm:$0xff] }
 0x406   : > { %9617 = vmatmul.mubr.msk.f32.gmra.mrb[32].mxu1 %vm3788_vm4, %v11699_v58  ;;  %v12849_v58 = vld [vmem:[#allocation30_spill] sm:$0xff] }
 0x407   : > { %9619 = vmatprep.mubr.msk.f32.mxu1 %vm3788_vm4, %v11705_v0  ;;  %v10417_v0 = vld [vmem:[#allocation2 + $0x51] sm:$0xff] }
 0x408   : > { %9849 = vmatmul.mubr.msk.f32.gmra.mrb[36].mxu0 %vm198_vm1, %v10417_v0  ;;  %v12856_v0 = vld [vmem:[#allocation7_spill] sm:$0xff] }
 0x40a   : > { %9620 = vmatmul.mubr.msk.f32.gmra.mrb[34].mxu1 %vm3788_vm4, %v11711_v3  ;;  %v12850_v3 = vld [vmem:[#allocation32_spill] sm:$0xff] }
 0x40b   : > { %9622 = vmatprep.mubr.msk.f32.mxu1 %vm3788_vm4, %v11717_v26  ;;  %v10418_v26 = vld [vmem:[#allocation2 + $0x61] sm:$0xff] }
 0x40c   : > { %9851 = vmatprep.mubr.msk.f32.mxu0 %vm198_vm1, %v10418_v26  ;;  %v10424_v26 = vld [vmem:[#allocation2 + $0xa9] sm:$0xff] }
 0x40d   : > { %9852 = vmatmul.mubr.msk.f32.gmra.mrb[38].mxu0 %vm198_vm1, %v10419_v24  ;;  %v12857_v24 = vld [vmem:[#allocation8_spill] sm:$0xff] }
 0x40e   : > { %9623 = vmatmul.mubr.msk.f32.gmra.mrb[36].mxu1 %vm3788_vm4, %v11723_v11  ;;  %v12851_v11 = vld [vmem:[#allocation34_spill] sm:$0xff] }
 0x40f   : > { %9625 = vmatprep.mubr.msk.f32.mxu1 %vm3788_vm4, %v11729_v23 }
 0x412   : > { %9626 = vmatmul.mubr.msk.f32.gmra.mrb[38].mxu1 %vm3788_vm4, %v11735_v52 }
 0x413   : > { %9628 = vmatprep.mubr.msk.f32.mxu1 %vm3788_vm4, %v11741_v21 }
 0x416   : > { %9629 = vmatmul.mubr.msk.f32.gmra.mrb[40].mxu1 %vm3788_vm4, %v11747_v55 }
 0x417   : > { %9631 = vmatprep.mubr.msk.f32.mxu1 %vm3788_vm4, %v11752_v17 }
 0x41a   : > { %9632 = vmatmul.mubr.msk.f32.gmra.mrb[42].mxu1 %vm3788_vm4, %v11757_v18 }
 0x41b   : > { %9634 = vmatprep.mubr.msk.f32.mxu1 %vm3788_vm4, %v12840_v30 }
 0x41e   : > { %9635 = vmatmul.mubr.msk.f32.gmra.mrb[44].mxu1 %vm3788_vm4, %v12841_v1 }
 0x41f   : > { %9637 = vmatprep.mubr.msk.f32.mxu1 %vm3788_vm4, %v12162_v45 }
 0x422   : > { %9638 = vmatmul.mubr.msk.f32.gmra.mrb[46].mxu1 %vm3788_vm4, %v12166_v47 }
 0x423   : > { %9642 = vmatprep.mubr.msk.f32.mxu1 %vm3788_vm4, %v12842_v59  ;;  %v10420_v59 = vld [vmem:[#allocation2 + $0x79] sm:$0xff] }
 0x424   : > { %9854 = vmatprep.mubr.msk.f32.mxu0 %vm198_vm1, %v10420_v59  ;;  %v10425_v59 = vld [vmem:[#allocation2 + $0xb1] sm:$0xff] }
 0x425   : > { %9855 = vmatmul.mubr.msk.f32.gmra.mrb[40].mxu0 %vm198_vm1, %v10421_v8  ;;  %v12858_v8 = vld [vmem:[#allocation9_spill] sm:$0xff] }
 0x426   : > { %9643 = vmatmul.mubr.msk.f32.vlgmr.msra.gmra.mrb[16].mxu1 %vm3788_vm4, %v12843_v2  ;;  %v12853_v2 = vld [vmem:[#allocation37_spill] sm:$0xff]  ;;  %9857 = vmatprep.mubr.msk.f32.mxu0 %vm198_vm1, %v10422_v54 }
 0x427   : > { %9691 = vmatpush3.msra.mxu1 %v8177_v32  ;;  %9645 = vmatprep.mubr.msk.f32.mxu1 %vm3788_vm4, %v12844_v4  ;;  %v12852_v32 = vld [vmem:[#allocation36_spill] sm:$0xff] }
 0x428   : > { %9740 = vmatprep.subr.mxu1 %v12175_v61  ;;  %v10426_v54 = vld [vmem:[#allocation2 + $0xc1] sm:$0xff] }
 0x429   : > { %9858 = vmatmul.mubr.msk.f32.gmra.mrb[42].mxu0 %vm198_vm1, %v10423_v49  ;;  %v10427_v49 = vld [vmem:[#allocation2 + $0xc9] sm:$0xff] }
 0x42a   : > { %9646 = vmatmul.mubr.msk.f32.gmra.mrb[18].mxu1 %vm3788_vm4, %v12845_v10  ;;  %9860 = vmatprep.mubr.msk.f32.mxu0 %vm198_vm1, %v10424_v26  ;;  %v10428_v26 = vld [vmem:[#allocation2 + $0xd9] sm:$0xff] }
 0x42b   : > { %9648 = vmatprep.mubr.msk.f32.mxu1 %vm3788_vm4, %v12846_v15 }
 0x42d   : > { %9861 = vmatmul.mubr.msk.f32.gmra.mrb[44].mxu0 %vm198_vm1, %v10425_v59  ;;  %v10429_v59 = vld [vmem:[#allocation2 + $0xe1] sm:$0xff] }
 0x42e   : > { %9649 = vmatmul.mubr.msk.f32.gmra.mrb[20].mxu1 %vm3788_vm4, %v12847_v36  ;;  %9863 = vmatprep.mubr.msk.f32.mxu0 %vm198_vm1, %v10426_v54  ;;  %v10430_v54 = vld [vmem:[#allocation2 + $0xf1] sm:$0xff] }
 0x42f   : > { %9651 = vmatprep.mubr.msk.f32.mxu1 %vm3788_vm4, %v12848_v29 }
 0x431   : > { %9864 = vmatmul.mubr.msk.f32.gmra.mrb[46].mxu0 %vm198_vm1, %v10427_v49  ;;  %v10431_v49 = vld [vmem:[#allocation2 + $0xf9] sm:$0xff] }
 0x432   : > { %9652 = vmatmul.mubr.msk.f32.gmra.mrb[22].mxu1 %vm3788_vm4, %v12849_v58  ;;  %9866 = vmatprep.mubr.msk.f32.mxu0 %vm198_vm1, %v10428_v26  ;;  %v10432_v26 = vld [vmem:[#allocation2 + $0x109] sm:$0xff] }
 0x433   : > { %9654 = vmatprep.mubr.msk.f32.mxu1 %vm3788_vm4, %v12850_v3 }
 0x435   : > { %9867 = vmatmul.mubr.msk.f32.gmra.mrb[48].mxu0 %vm198_vm1, %v10429_v59  ;;  %v10433_v59 = vld [vmem:[#allocation2 + $0x111] sm:$0xff] }
 0x436   : > { %9655 = vmatmul.mubr.msk.f32.gmra.mrb[24].mxu1 %vm3788_vm4, %v12851_v11  ;;  %9869 = vmatprep.mubr.msk.f32.mxu0 %vm198_vm1, %v10430_v54  ;;  %v10434_v54 = vld [vmem:[#allocation2 + $0x121] sm:$0xff] }
 0x437   : > { %9657 = vmatprep.mubr.msk.f32.mxu1 %vm3788_vm4, %v12852_v32 }
 0x439   : > { %9870 = vmatmul.mubr.msk.f32.gmra.mrb[50].mxu0 %vm198_vm1, %v10431_v49  ;;  %v10435_v49 = vld [vmem:[#allocation2 + $0x129] sm:$0xff] }
 0x43a   : > { %9658 = vmatmul.mubr.msk.f32.gmra.mrb[26].mxu1 %vm3788_vm4, %v12853_v2  ;;  %9872 = vmatprep.mubr.msk.f32.mxu0 %vm198_vm1, %v10432_v26  ;;  %v10436_v26 = vld [vmem:[#allocation2 + $0x139] sm:$0xff] }
 0x43b   : > { %9660 = vmatprep.mubr.msk.f32.mxu1 %vm3788_vm4, %v12854_v13 }
 0x43d   : > { %9873 = vmatmul.mubr.msk.f32.gmra.mrb[52].mxu0 %vm198_vm1, %v10433_v59  ;;  %v10437_v59 = vld [vmem:[#allocation2 + $0x141] sm:$0xff] }
 0x43e   : > { %9661 = vmatmul.mubr.msk.f32.gmra.mrb[28].mxu1 %vm3788_vm4, %v12855_v56  ;;  %v12859_v56 = vld [vmem:[#allocation10_spill] sm:$0xff]  ;;  %9875 = vmatprep.mubr.msk.f32.mxu0 %vm198_vm1, %v10434_v54 }
 0x43f   : > { %9663 = vmatprep.mubr.msk.f32.mxu1 %vm3788_vm4, %v12856_v0  ;;  %v12860_v0 = vld [vmem:[#allocation11_spill] sm:$0xff] }
 0x440   : > { %v10438_v54 = vld [vmem:[#allocation2 + $0x151] sm:$0xff] }
 0x441   : > { %9876 = vmatmul.mubr.msk.f32.gmra.mrb[54].mxu0 %vm198_vm1, %v10435_v49  ;;  %v12267_v49 = vld [vmem:[#allocation3 + $0x182] sm:$0xff] }
 0x442   : > { %9664 = vmatmul.mubr.msk.f32.gmra.mrb[30].mxu1 %vm3788_vm4, %v12857_v24  ;;  %v12861_v24 = vld [vmem:[#allocation12_spill] sm:$0xff]  ;;  %9878 = vmatprep.mubr.msk.f32.mxu0 %vm198_vm1, %v10436_v26  ;;  %v10440_v26 = vld [vmem:[#allocation2 + $0x169] sm:$0xff] }
 0x443   : > { %9666 = vmatprep.mubr.msk.f32.mxu1 %vm3788_vm4, %v12858_v8  ;;  %v12862_v8 = vld [vmem:[#allocation13_spill] sm:$0xff] }
 0x445   : > { %9879 = vmatmul.mubr.msk.f32.gmra.mrb[56].mxu0 %vm198_vm1, %v10437_v59  ;;  %v12273_v59 = vld [vmem:[#allocation3 + $0x18a] sm:$0xff] }
 0x446   : > { %9667 = vmatmul.mubr.msk.f32.gmra.mrb[32].mxu1 %vm3788_vm4, %v12859_v56  ;;  %v12863_v56 = vld [vmem:[#allocation14_spill] sm:$0xff]  ;;  %9881 = vmatprep.mubr.msk.f32.mxu0 %vm198_vm1, %v10438_v54 }
 0x447   : > { %9669 = vmatprep.mubr.msk.f32.mxu1 %vm3788_vm4, %v12860_v0  ;;  %v12864_v0 = vld [vmem:[#allocation15_spill] sm:$0xff] }
 0x448   : > { %v10441_v54 = vld [vmem:[#allocation2 + $0x171] sm:$0xff] }
 0x44a   : > { %9670 = vmatmul.mubr.msk.f32.gmra.mrb[34].mxu1 %vm3788_vm4, %v12861_v24  ;;  %v12865_v24 = vld [vmem:[#allocation16_spill] sm:$0xff] }
 0x44b   : > { %9672 = vmatprep.mubr.msk.f32.mxu1 %vm3788_vm4, %v12862_v8  ;;  %v12866_v8 = vld [vmem:[#allocation17_spill] sm:$0xff] }
 0x44e   : > { %9673 = vmatmul.mubr.msk.f32.gmra.mrb[36].mxu1 %vm3788_vm4, %v12863_v56 }
 0x44f   : > { %9675 = vmatprep.mubr.msk.f32.mxu1 %vm3788_vm4, %v12864_v0  ;;  %v12867_v0 = vld [vmem:[#allocation18_spill] sm:$0xff] }
 0x452   : > { %9676 = vmatmul.mubr.msk.f32.gmra.mrb[38].mxu1 %vm3788_vm4, %v12865_v24 }
 0x453   : > { %9678 = vmatprep.mubr.msk.f32.mxu1 %vm3788_vm4, %v12866_v8 }
 0x456   : > { %9679 = vmatmul.mubr.msk.f32.gmra.mrb[40].mxu1 %vm3788_vm4, %v12007_v37 }
 0x457   : > { %9681 = vmatprep.mubr.msk.f32.mxu1 %vm3788_vm4, %v12867_v0  ;;  %v10439_v0 = vld [vmem:[#allocation2 + $0x159] sm:$0xff] }
 0x458   : > { %9882 = vmatmul.mubr.msk.f32.gmra.mrb[58].mxu0 %vm198_vm1, %v10439_v0  ;;  %v8243_v0 = vld [vmem:[%s12592_s2 + $0x40] sm:$0xff] }
 0x459   : > { %9884 = vmatprep.mubr.msk.f32.mxu0 %vm198_vm1, %v10440_v26  ;;  %v10443_v26 = vld [vmem:[#allocation2 + $0x189] sm:$0xff] }
 0x45a   : > { %9682 = vmatmul.mubr.msk.f32.gmra.mrb[42].mxu1 %vm3788_vm4, %v12015_v57 }
 0x45b   : > { %9684 = vmatprep.mubr.msk.f32.mxu1 %vm3788_vm4, %v12019_v31 }
 0x45c   : > { %9885 = vmatmul.mubr.msk.f32.gmra.mrb[60].mxu0 %vm198_vm1, %v10441_v54 }
 0x45e   : > { %9685 = vmatmul.mubr.msk.f32.gmra.mrb[44].mxu1 %vm3788_vm4, %v12023_v33  ;;  %v10442_v33 = vld [vmem:[#allocation2 + $0x181] sm:$0xff] }
 0x45f   : > { %9687 = vmatprep.mubr.msk.f32.mxu1 %vm3788_vm4, %v12267_v49  ;;  %9887 = vmatprep.mubr.msk.f32.mxu0 %vm198_vm1, %v10442_v33  ;;  %v12878_v33 = vld [vmem:[#allocation19_spill] sm:$0xff] }
 0x460   : > { %9888 = vmatmul.mubr.msk.f32.gmra.mrb[62].mxu0 %vm198_vm1, %v10443_v26 }
 0x462   : > { %9688 = vmatmul.mubr.msk.f32.gmra.mrb[46].mxu1 %vm3788_vm4, %v12273_v59 }
 0x463   : > { %9692 = vmatprep.mubr.msk.f32.mxu1 %vm3788_vm4, %v11786_v48  ;;  %v6155_v48 = vld [vmem:[#allocation3 + $0x198] sm:$0xff] }
 0x466   : > { %9693 = vmatmul.mubr.msk.f32.vlgmr.msra.gmra.mrb[16].mxu1 %vm3788_vm4, %v11790_v38  ;;  %v6156_v38 = vld [vmem:[#allocation3 + $0x1a0] sm:$0xff] }
 0x467   : > { %9741 = vmatpush3.msra.mxu1 %v12175_v61  ;;  %9695 = vmatprep.mubr.msk.f32.mxu1 %vm3788_vm4, %v11794_v22  ;;  %v6512_v22 = vld [vmem:[#allocation3 + $0x31] sm:$0xff] }
 0x468   : > { %9790 = vmatprep.subr.mxu1 %v8243_v0 }
 0x46a   : > { %9696 = vmatmul.mubr.msk.f32.gmra.mrb[18].mxu1 %vm3788_vm4, %v11798_v39  ;;  %v6513_v39 = vld [vmem:[#allocation3 + $0x39] sm:$0xff] }
 0x46b   : > { %9698 = vmatprep.mubr.msk.f32.mxu1 %vm3788_vm4, %v11802_v60  ;;  %v6514_v60 = vld [vmem:[#allocation3 + $0x49] sm:$0xff] }
 0x46e   : > { %9699 = vmatmul.mubr.msk.f32.gmra.mrb[20].mxu1 %vm3788_vm4, %v11806_v62  ;;  %v6515_v62 = vld [vmem:[#allocation3 + $0x51] sm:$0xff] }
 0x46f   : > { %9701 = vmatprep.mubr.msk.f32.mxu1 %vm3788_vm4, %v11810_v40  ;;  %v6516_v40 = vld [vmem:[#allocation3 + $0x61] sm:$0xff] }
 0x472   : > { %9702 = vmatmul.mubr.msk.f32.gmra.mrb[22].mxu1 %vm3788_vm4, %v11814_v63  ;;  %v6517_v63 = vld [vmem:[#allocation3 + $0x69] sm:$0xff] }
 0x473   : > { %9704 = vmatprep.mubr.msk.f32.mxu1 %vm3788_vm4, %v11818_v41  ;;  %v6518_v41 = vld [vmem:[#allocation3 + $0x79] sm:$0xff] }
 0x476   : > { %9705 = vmatmul.mubr.msk.f32.gmra.mrb[24].mxu1 %vm3788_vm4, %v11822_v5  ;;  %v6519_v5 = vld [vmem:[#allocation3 + $0x81] sm:$0xff] }
 0x477   : > { %9707 = vmatprep.mubr.msk.f32.mxu1 %vm3788_vm4, %v11826_v6  ;;  %v6520_v6 = vld [vmem:[#allocation3 + $0x91] sm:$0xff] }
 0x47a   : > { %9708 = vmatmul.mubr.msk.f32.gmra.mrb[26].mxu1 %vm3788_vm4, %v11830_v7  ;;  %v6521_v7 = vld [vmem:[#allocation3 + $0x99] sm:$0xff] }
 0x47b   : > { %9710 = vmatprep.mubr.msk.f32.mxu1 %vm3788_vm4, %v11834_v42  ;;  %v6522_v42 = vld [vmem:[#allocation3 + $0xa9] sm:$0xff] }
 0x47e   : > { %9711 = vmatmul.mubr.msk.f32.gmra.mrb[28].mxu1 %vm3788_vm4, %v11838_v9  ;;  %v6523_v9 = vld [vmem:[#allocation3 + $0xb1] sm:$0xff] }
 0x47f   : > { %9713 = vmatprep.mubr.msk.f32.mxu1 %vm3788_vm4, %v11842_v43  ;;  %v6524_v43 = vld [vmem:[#allocation3 + $0xc1] sm:$0xff] }
 0x482   : > { %9714 = vmatmul.mubr.msk.f32.gmra.mrb[30].mxu1 %vm3788_vm4, %v11846_v12  ;;  %v6525_v12 = vld [vmem:[#allocation3 + $0xc9] sm:$0xff] }
 0x483   : > { %9716 = vmatprep.mubr.msk.f32.mxu1 %vm3788_vm4, %v11850_v14  ;;  %v6526_v14 = vld [vmem:[#allocation3 + $0xd9] sm:$0xff] }
 0x486   : > { %9717 = vmatmul.mubr.msk.f32.gmra.mrb[32].mxu1 %vm3788_vm4, %v11854_v16  ;;  %v6527_v16 = vld [vmem:[#allocation3 + $0xe1] sm:$0xff] }
 0x487   : > { %9719 = vmatprep.mubr.msk.f32.mxu1 %vm3788_vm4, %v11858_v44  ;;  %v6528_v44 = vld [vmem:[#allocation3 + $0xf1] sm:$0xff] }
 0x48a   : > { %9720 = vmatmul.mubr.msk.f32.gmra.mrb[34].mxu1 %vm3788_vm4, %v11862_v19  ;;  %v6529_v19 = vld [vmem:[#allocation3 + $0xf9] sm:$0xff] }
 0x48b   : > { %9722 = vmatprep.mubr.msk.f32.mxu1 %vm3788_vm4, %v11866_v50  ;;  %v6530_v50 = vld [vmem:[#allocation3 + $0x109] sm:$0xff] }
 0x48e   : > { %9723 = vmatmul.mubr.msk.f32.gmra.mrb[36].mxu1 %vm3788_vm4, %v11870_v35  ;;  %v6531_v35 = vld [vmem:[#allocation3 + $0x111] sm:$0xff] }
 0x48f   : > { %9725 = vmatprep.mubr.msk.f32.mxu1 %vm3788_vm4, %v11874_v27  ;;  %v12872_v27 = vld [vmem:[#allocation10_spill] sm:$0xff] }
 0x492   : > { %9726 = vmatmul.mubr.msk.f32.gmra.mrb[38].mxu1 %vm3788_vm4, %v11878_v20  ;;  %v12873_v20 = vld [vmem:[#allocation11_spill] sm:$0xff] }
 0x493   : > { %9728 = vmatprep.mubr.msk.f32.mxu1 %vm3788_vm4, %v11882_v51  ;;  %v12874_v51 = vld [vmem:[#allocation12_spill] sm:$0xff] }
 0x496   : > { %9729 = vmatmul.mubr.msk.f32.gmra.mrb[40].mxu1 %vm3788_vm4, %v11886_v25  ;;  %v12875_v25 = vld [vmem:[#allocation13_spill] sm:$0xff] }
 0x497   : > { %9731 = vmatprep.mubr.msk.f32.mxu1 %vm3788_vm4, %v11890_v53  ;;  %v12876_v53 = vld [vmem:[#allocation15_spill] sm:$0xff] }
 0x49a   : > { %9732 = vmatmul.mubr.msk.f32.gmra.mrb[42].mxu1 %vm3788_vm4, %v11894_v28  ;;  %v12877_v28 = vld [vmem:[#allocation18_spill] sm:$0xff] }
 0x49b   : > { %9734 = vmatprep.mubr.msk.f32.mxu1 %vm3788_vm4, %v12091_v34  ;;  %v6929_v34 = vld [vmem:[#allocation3 + $0x19a] sm:$0xff] }
 0x49e   : > { %9735 = vmatmul.mubr.msk.f32.gmra.mrb[44].mxu1 %vm3788_vm4, %v12095_v46 }
 0x49f   : > { %9737 = vmatprep.mubr.msk.f32.mxu1 %vm3788_vm4, %v6155_v48 }
 0x4a2   : > { %9738 = vmatmul.mubr.msk.f32.gmra.mrb[46].mxu1 %vm3788_vm4, %v6156_v38 }
 0x4a3   : > { %9742 = vmatprep.mubr.msk.f32.mxu1 %vm3788_vm4, %v6512_v22 }
 0x4a6   : > { %9743 = vmatmul.mubr.msk.f32.vlgmr.msra.gmra.mrb[16].mxu1 %vm3788_vm4, %v6513_v39 }
 0x4a7   : > { %9791 = vmatpush3.msra.mxu1 %v8243_v0  ;;  %9745 = vmatprep.mubr.msk.f32.mxu1 %vm3788_vm4, %v6514_v60 }
 0x4aa   : > { %9746 = vmatmul.mubr.msk.f32.gmra.mrb[18].mxu1 %vm3788_vm4, %v6515_v62 }
 0x4ab   : > { %9748 = vmatprep.mubr.msk.f32.mxu1 %vm3788_vm4, %v6516_v40 }
 0x4ae   : > { %9749 = vmatmul.mubr.msk.f32.gmra.mrb[20].mxu1 %vm3788_vm4, %v6517_v63 }
 0x4af   : > { %9751 = vmatprep.mubr.msk.f32.mxu1 %vm3788_vm4, %v6518_v41 }
 0x4b2   : > { %9752 = vmatmul.mubr.msk.f32.gmra.mrb[22].mxu1 %vm3788_vm4, %v6519_v5 }
 0x4b3   : > { %9754 = vmatprep.mubr.msk.f32.mxu1 %vm3788_vm4, %v6520_v6 }
 0x4b6   : > { %9755 = vmatmul.mubr.msk.f32.gmra.mrb[24].mxu1 %vm3788_vm4, %v6521_v7 }
 0x4b7   : > { %9757 = vmatprep.mubr.msk.f32.mxu1 %vm3788_vm4, %v6522_v42 }
 0x4ba   : > { %9758 = vmatmul.mubr.msk.f32.gmra.mrb[26].mxu1 %vm3788_vm4, %v6523_v9 }
 0x4bb   : > { %9760 = vmatprep.mubr.msk.f32.mxu1 %vm3788_vm4, %v6524_v43 }
 0x4be   : > { %9761 = vmatmul.mubr.msk.f32.gmra.mrb[28].mxu1 %vm3788_vm4, %v6525_v12 }
 0x4bf   : > { %9763 = vmatprep.mubr.msk.f32.mxu1 %vm3788_vm4, %v6526_v14 }
 0x4c2   : > { %9764 = vmatmul.mubr.msk.f32.gmra.mrb[30].mxu1 %vm3788_vm4, %v6527_v16 }
 0x4c3   : > { %9766 = vmatprep.mubr.msk.f32.mxu1 %vm3788_vm4, %v6528_v44 }
 0x4c6   : > { %9767 = vmatmul.mubr.msk.f32.gmra.mrb[32].mxu1 %vm3788_vm4, %v6529_v19 }
 0x4c7   : > { %9769 = vmatprep.mubr.msk.f32.mxu1 %vm3788_vm4, %v6530_v50 }
 0x4ca   : > { %9770 = vmatmul.mubr.msk.f32.gmra.mrb[34].mxu1 %vm3788_vm4, %v6531_v35 }
 0x4cb   : > { %9772 = vmatprep.mubr.msk.f32.mxu1 %vm3788_vm4, %v11729_v23  ;;  %v6542_v23 = vld [vmem:[#allocation3 + $0x199] sm:$0xff]  ;;  %v9844_v46 = vpop.f32.mrb[32].mxu0 }
 0x4ce   : > { %9773 = vmatmul.mubr.msk.f32.gmra.mrb[36].mxu1 %vm3788_vm4, %v11735_v52  ;;  %v6543_v52 = vld [vmem:[#allocation3 + $0x1a1] sm:$0xff] }
 0x4cf   : > { %9775 = vmatprep.mubr.msk.f32.mxu1 %vm3788_vm4, %v11741_v21  ;;  %v12868_v21 = vld [vmem:[#allocation40_spill] sm:$0xff] }
 0x4d2   : > { %9776 = vmatmul.mubr.msk.f32.gmra.mrb[38].mxu1 %vm3788_vm4, %v11747_v55  ;;  %v12869_v55 = vld [vmem:[#allocation7_spill] sm:$0xff] }
 0x4d3   : > { %9778 = vmatprep.mubr.msk.f32.mxu1 %vm3788_vm4, %v11752_v17  ;;  %v12870_v17 = vld [vmem:[#allocation8_spill] sm:$0xff] }
 0x4d6   : > { %9779 = vmatmul.mubr.msk.f32.gmra.mrb[40].mxu1 %vm3788_vm4, %v11757_v18  ;;  %v12871_v18 = vld [vmem:[#allocation9_spill] sm:$0xff] }
 0x4d7   : > { %9781 = vmatprep.mubr.msk.f32.mxu1 %vm3788_vm4, %v12840_v30 }
 0x4da   : > { %9782 = vmatmul.mubr.msk.f32.gmra.mrb[42].mxu1 %vm3788_vm4, %v12841_v1 }
 0x4db   : > { %9784 = vmatprep.mubr.msk.f32.mxu1 %vm3788_vm4, %v12162_v45 }
 0x4de   : > { %9785 = vmatmul.mubr.msk.f32.gmra.mrb[44].mxu1 %vm3788_vm4, %v12166_v47 }
 0x4df   : > { %9787 = vmatprep.mubr.msk.f32.mxu1 %vm3788_vm4, %v6542_v23 }
 0x4e2   : > { %9788 = vmatmul.mubr.msk.f32.gmra.mrb[46].mxu1 %vm3788_vm4, %v6543_v52 }
 0x4e3   : > { %9792 = vmatprep.mubr.msk.f32.mxu1 %vm3788_vm4, %v12844_v4 }
 0x4e6   : > { %9793 = vmatmul.mubr.msk.f32.vlgmr.msra.gmra.mrb[16].mxu1 %vm3788_vm4, %v12845_v10 }
 0x4e7   : > { %9795 = vmatprep.mubr.msk.f32.mxu1 %vm3788_vm4, %v12846_v15 }
 0x4ea   : > { %9796 = vmatmul.mubr.msk.f32.gmra.mrb[18].mxu1 %vm3788_vm4, %v12847_v36 }
 0x4eb   : > { %9798 = vmatprep.mubr.msk.f32.mxu1 %vm3788_vm4, %v12848_v29 }
 0x4ee   : > { %9799 = vmatmul.mubr.msk.f32.gmra.mrb[20].mxu1 %vm3788_vm4, %v12849_v58 }
 0x4ef   : > { %9801 = vmatprep.mubr.msk.f32.mxu1 %vm3788_vm4, %v12850_v3 }
 0x4f2   : > { %9802 = vmatmul.mubr.msk.f32.gmra.mrb[22].mxu1 %vm3788_vm4, %v12851_v11 }
 0x4f3   : > { %9804 = vmatprep.mubr.msk.f32.mxu1 %vm3788_vm4, %v12852_v32 }
 0x4f6   : > { %9805 = vmatmul.mubr.msk.f32.gmra.mrb[24].mxu1 %vm3788_vm4, %v12853_v2 }
 0x4f7   : > { %9807 = vmatprep.mubr.msk.f32.mxu1 %vm3788_vm4, %v12854_v13 }
 0x4fa   : > { %9808 = vmatmul.mubr.msk.f32.gmra.mrb[26].mxu1 %vm3788_vm4, %v12868_v21 }
 0x4fb   : > { %9810 = vmatprep.mubr.msk.f32.mxu1 %vm3788_vm4, %v12869_v55 }
 0x4fe   : > { %9811 = vmatmul.mubr.msk.f32.gmra.mrb[28].mxu1 %vm3788_vm4, %v12870_v17 }
 0x4ff   : > { %9813 = vmatprep.mubr.msk.f32.mxu1 %vm3788_vm4, %v12871_v18 }
 0x502   : > { %9814 = vmatmul.mubr.msk.f32.gmra.mrb[30].mxu1 %vm3788_vm4, %v12872_v27 }
 0x503   : > { %9816 = vmatprep.mubr.msk.f32.mxu1 %vm3788_vm4, %v12873_v20 }
 0x506   : > { %9817 = vmatmul.mubr.msk.f32.gmra.mrb[32].mxu1 %vm3788_vm4, %v12874_v51 }
 0x507   : > { %9819 = vmatprep.mubr.msk.f32.mxu1 %vm3788_vm4, %v12875_v25 }
 0x50a   : > { %9820 = vmatmul.mubr.msk.f32.gmra.mrb[34].mxu1 %vm3788_vm4, %v12863_v56 }
 0x50b   : > { %9822 = vmatprep.mubr.msk.f32.mxu1 %vm3788_vm4, %v12876_v53 }
 0x50e   : > { %9823 = vmatmul.mubr.msk.f32.gmra.mrb[36].mxu1 %vm3788_vm4, %v12865_v24 }
 0x50f   : > { %9825 = vmatprep.mubr.msk.f32.mxu1 %vm3788_vm4, %v12866_v8 }
 0x512   : > { %9826 = vmatmul.mubr.msk.f32.gmra.mrb[38].mxu1 %vm3788_vm4, %v12007_v37  ;;  %v6930_v37 = vld [vmem:[#allocation3 + $0x1a2] sm:$0xff] }
 0x513   : > { %9828 = vmatprep.mubr.msk.f32.mxu1 %vm3788_vm4, %v12877_v28 }
 0x516   : > { %9829 = vmatmul.mubr.msk.f32.gmra.mrb[40].mxu1 %vm3788_vm4, %v12015_v57  ;;  %v7388_v57 = vpop.f32.mrb[33].mxu0 }
 0x517   : > { %9831 = vmatprep.mubr.msk.f32.mxu1 %vm3788_vm4, %v12019_v31  ;;  %v9847_v30 = vpop.f32.mrb[34].mxu0 }
 0x518   : > { %v7398_v1 = vpop.f32.mrb[35].mxu0 }
 0x519   : > { %v9850_v31 = vpop.f32.mrb[36].mxu0 }
 0x51a   : > { %9832 = vmatmul.mubr.msk.f32.gmra.mrb[42].mxu1 %vm3788_vm4, %v12878_v33  ;;  %v7408_v45 = vpop.f32.mrb[37].mxu0 }
 0x51b   : > { %9834 = vmatprep.mubr.msk.f32.mxu1 %vm3788_vm4, %v12267_v49  ;;  %v9853_v47 = vpop.f32.mrb[38].mxu0 }
 0x51c   : > { %v7418_v61 = vpop.f32.mrb[39].mxu0 }
 0x51d   : > { %v9856_v4 = vpop.f32.mrb[40].mxu0 }
 0x51e   : > { %9835 = vmatmul.mubr.msk.f32.gmra.mrb[44].mxu1 %vm3788_vm4, %v12273_v59  ;;  %v7428_v10 = vpop.f32.mrb[41].mxu0 }
 0x51f   : > { %9837 = vmatprep.mubr.msk.f32.mxu1 %vm3788_vm4, %v6929_v34  ;;  %v12450_v15 = vpop.f32.mrb[42].mxu0 }
 0x520   : > { %v12452_v36 = vpop.f32.mrb[43].mxu0 }
 0x521   : > { %v12454_v29 = vpop.f32.mrb[44].mxu0 }
 0x522   : > { %9838 = vmatmul.mubr.msk.f32.gmra.mrb[46].mxu1 %vm3788_vm4, %v6930_v37  ;;  %v12456_v58 = vpop.f32.mrb[45].mxu0 }
 0x523   : > { %v12458_v3 = vpop.f32.mrb[46].mxu0 }
 0x524   : > { %v12460_v11 = vpop.f32.mrb[47].mxu0 }
 0x525   : > { %v12462_v32 = vpop.f32.mrb[48].mxu0 }
 0x526   : > { %v12464_v2 = vpop.f32.mrb[49].mxu0 }
 0x527   : > { %v12466_v13 = vpop.f32.mrb[50].mxu0 }
 0x528   : > { %v12468_v56 = vpop.f32.mrb[51].mxu0 }
 0x529   : > { %v12470_v24 = vpop.f32.mrb[52].mxu0 }
 0x52a   : > { %v12472_v8 = vpop.f32.mrb[53].mxu0 }
 0x52b   : > { %v12474_v49 = vpop.f32.mrb[54].mxu0 }
 0x52c   : > { %v12476_v59 = vpop.f32.mrb[55].mxu0 }
 0x52d   : > { %v12478_v54 = vpop.f32.mrb[56].mxu0 }
 0x52e   : > { %v12480_v0 = vpop.f32.mrb[57].mxu0 }
 0x52f   : > { %v12482_v26 = vpop.f32.mrb[58].mxu0 }
 0x530   : > { %v12484_v48 = vpop.f32.mrb[59].mxu0 }
 0x531   : > { %v12486_v38 = vpop.f32.mrb[60].mxu0 }
 0x532   : > { %v12488_v22 = vpop.f32.mrb[61].mxu0 }
 0x533   : > { %v12490_v39 = vpop.f32.mrb[62].mxu0 }
 0x534   : > { %v12492_v60 = vpop.f32.mrb[63].mxu0 }
 0x5b9   : > { %v9794_v62 = vpop.f32.mrb[16].mxu1 }
 0x5ba   : > { %v7287_v40 = vmax.f32 %v9794_v62, 0.0  ;;  %v7095_v63 = vpop.f32.mrb[17].mxu1 }
 0x5bb   : > { %v7286_v41 = vmax.f32 %v7095_v63, 0.0 }
 0x5bc   : > { %v7548_v5 = vadd.f32 %v9844_v46, %v7287_v40 }
 0x5bd   : > { %v7547_v6 = vadd.f32 %v7388_v57, %v7286_v41  ;;  %v9797_v7 = vpop.f32.mrb[18].mxu1 }
 0x5be   : > { %7580 = vst.msk [vmem:[%s12499_s13 + $0x8] sm:$0xff] %vm3788_vm4, %v7548_v5  ;;  %v7289_v42 = vmax.f32 %v9797_v7, 0.0  ;;  %v7105_v9 = vpop.f32.mrb[19].mxu1 }
 0x5bf   : > { %7579 = vst.msk [vmem:[%s12499_s13] sm:$0xff] %vm3788_vm4, %v7547_v6  ;;  %v7288_v43 = vmax.f32 %v7105_v9, 0.0 }
 0x5c0   : > { %v7550_v12 = vadd.f32 %v9847_v30, %v7289_v42 }
 0x5c1   : > { %v7549_v14 = vadd.f32 %v7398_v1, %v7288_v43  ;;  %v9800_v16 = vpop.f32.mrb[20].mxu1 }
 0x5c2   : > { %7582 = vst.msk [vmem:[%s12499_s13 + $0x18] sm:$0xff] %vm3788_vm4, %v7550_v12  ;;  %v7291_v44 = vmax.f32 %v9800_v16, 0.0  ;;  %v7115_v19 = vpop.f32.mrb[21].mxu1 }
 0x5c3   : > { %7581 = vst.msk [vmem:[%s12499_s13 + $0x10] sm:$0xff] %vm3788_vm4, %v7549_v14  ;;  %v7290_v50 = vmax.f32 %v7115_v19, 0.0 }
 0x5c4   : > { %v7552_v35 = vadd.f32 %v9850_v31, %v7291_v44 }
 0x5c5   : > { %v7551_v23 = vadd.f32 %v7408_v45, %v7290_v50  ;;  %v9803_v52 = vpop.f32.mrb[22].mxu1 }
 0x5c6   : > { %7584 = vst.msk [vmem:[%s12499_s13 + $0x28] sm:$0xff] %vm3788_vm4, %v7552_v35  ;;  %v7293_v21 = vmax.f32 %v9803_v52, 0.0  ;;  %v7125_v55 = vpop.f32.mrb[23].mxu1 }
 0x5c7   : > { %7583 = vst.msk [vmem:[%s12499_s13 + $0x20] sm:$0xff] %vm3788_vm4, %v7551_v23  ;;  %v7292_v17 = vmax.f32 %v7125_v55, 0.0 }
 0x5c8   : > { %v7554_v18 = vadd.f32 %v9853_v47, %v7293_v21 }
 0x5c9   : > { %v7553_v27 = vadd.f32 %v7418_v61, %v7292_v17  ;;  %v9806_v20 = vpop.f32.mrb[24].mxu1 }
 0x5ca   : > { %7586 = vst.msk [vmem:[%s12499_s13 + $0x38] sm:$0xff] %vm3788_vm4, %v7554_v18  ;;  %v7295_v51 = vmax.f32 %v9806_v20, 0.0  ;;  %v7135_v25 = vpop.f32.mrb[25].mxu1 }
 0x5cb   : > { %7585 = vst.msk [vmem:[%s12499_s13 + $0x30] sm:$0xff] %vm3788_vm4, %v7553_v27  ;;  %v7294_v53 = vmax.f32 %v7135_v25, 0.0 }
 0x5cc   : > { %v7556_v28 = vadd.f32 %v9856_v4, %v7295_v51 }
 0x5cd   : > { %v7555_v33 = vadd.f32 %v7428_v10, %v7294_v53  ;;  %v9809_v34 = vpop.f32.mrb[26].mxu1 }
 0x5ce   : > { %7588 = vst.msk [vmem:[%s12499_s13 + $0x48] sm:$0xff] %vm3788_vm4, %v7556_v28  ;;  %v7297_v37 = vmax.f32 %v9809_v34, 0.0  ;;  %v7145_v46 = vpop.f32.mrb[27].mxu1 }
 0x5cf   : > { %7587 = vst.msk [vmem:[%s12499_s13 + $0x40] sm:$0xff] %vm3788_vm4, %v7555_v33  ;;  %v7296_v57 = vmax.f32 %v7145_v46, 0.0 }
 0x5d0   : > { %v7558_v30 = vadd.f32 %v12450_v15, %v7297_v37 }
 0x5d1   : > { %v7557_v1 = vadd.f32 %v12452_v36, %v7296_v57  ;;  %v9812_v31 = vpop.f32.mrb[28].mxu1 }
 0x5d2   : > { %7590 = vst.msk [vmem:[%s12499_s13 + $0x58] sm:$0xff] %vm3788_vm4, %v7558_v30  ;;  %v7299_v45 = vmax.f32 %v9812_v31, 0.0  ;;  %v7155_v47 = vpop.f32.mrb[29].mxu1 }
 0x5d3   : > { %7589 = vst.msk [vmem:[%s12499_s13 + $0x50] sm:$0xff] %vm3788_vm4, %v7557_v1  ;;  %v7298_v61 = vmax.f32 %v7155_v47, 0.0 }
 0x5d4   : > { %v7560_v4 = vadd.f32 %v12454_v29, %v7299_v45 }
 0x5d5   : > { %v7559_v10 = vadd.f32 %v12456_v58, %v7298_v61  ;;  %v9815_v62 = vpop.f32.mrb[30].mxu1 }
 0x5d6   : > { %7592 = vst.msk [vmem:[%s12499_s13 + $0x68] sm:$0xff] %vm3788_vm4, %v7560_v4  ;;  %v7301_v15 = vmax.f32 %v9815_v62, 0.0  ;;  %v7165_v36 = vpop.f32.mrb[31].mxu1 }
 0x5d7   : > { %7591 = vst.msk [vmem:[%s12499_s13 + $0x60] sm:$0xff] %vm3788_vm4, %v7559_v10  ;;  %v7300_v40 = vmax.f32 %v7165_v36, 0.0 }
 0x5d8   : > { %v7562_v63 = vadd.f32 %v12458_v3, %v7301_v15 }
 0x5d9   : > { %v7561_v41 = vadd.f32 %v12460_v11, %v7300_v40  ;;  %v9818_v5 = vpop.f32.mrb[32].mxu1 }
 0x5da   : > { %7594 = vst.msk [vmem:[%s12499_s13 + $0x78] sm:$0xff] %vm3788_vm4, %v7562_v63  ;;  %v7303_v29 = vmax.f32 %v9818_v5, 0.0  ;;  %v7175_v58 = vpop.f32.mrb[33].mxu1 }
 0x5db   : > { %7593 = vst.msk [vmem:[%s12499_s13 + $0x70] sm:$0xff] %vm3788_vm4, %v7561_v41  ;;  %v7302_v6 = vmax.f32 %v7175_v58, 0.0 }
 0x5dc   : > { %v7564_v7 = vadd.f32 %v12462_v32, %v7303_v29 }
 0x5dd   : > { %v7563_v42 = vadd.f32 %v12464_v2, %v7302_v6  ;;  %v9821_v9 = vpop.f32.mrb[34].mxu1 }
 0x5de   : > { %7596 = vst.msk [vmem:[%s12499_s13 + $0x88] sm:$0xff] %vm3788_vm4, %v7564_v7  ;;  %v7305_v3 = vmax.f32 %v9821_v9, 0.0  ;;  %v7185_v11 = vpop.f32.mrb[35].mxu1 }
 0x5df   : > { %7595 = vst.msk [vmem:[%s12499_s13 + $0x80] sm:$0xff] %vm3788_vm4, %v7563_v42  ;;  %v7304_v43 = vmax.f32 %v7185_v11, 0.0 }
 0x5e0   : > { %v7566_v12 = vadd.f32 %v12466_v13, %v7305_v3 }
 0x5e1   : > { %v7565_v14 = vadd.f32 %v12468_v56, %v7304_v43  ;;  %v9824_v16 = vpop.f32.mrb[36].mxu1 }
 0x5e2   : > { %7598 = vst.msk [vmem:[%s12499_s13 + $0x98] sm:$0xff] %vm3788_vm4, %v7566_v12  ;;  %v7307_v32 = vmax.f32 %v9824_v16, 0.0  ;;  %v7195_v2 = vpop.f32.mrb[37].mxu1 }
 0x5e3   : > { %7597 = vst.msk [vmem:[%s12499_s13 + $0x90] sm:$0xff] %vm3788_vm4, %v7565_v14  ;;  %v7306_v44 = vmax.f32 %v7195_v2, 0.0 }
 0x5e4   : > { %v7568_v19 = vadd.f32 %v12470_v24, %v7307_v32 }
 0x5e5   : > { %v7567_v50 = vadd.f32 %v12472_v8, %v7306_v44  ;;  %v9827_v35 = vpop.f32.mrb[38].mxu1 }
 0x5e6   : > { %7600 = vst.msk [vmem:[%s12499_s13 + $0xa8] sm:$0xff] %vm3788_vm4, %v7568_v19  ;;  %v7309_v13 = vmax.f32 %v9827_v35, 0.0  ;;  %v7205_v56 = vpop.f32.mrb[39].mxu1 }
 0x5e7   : > { %7599 = vst.msk [vmem:[%s12499_s13 + $0xa0] sm:$0xff] %vm3788_vm4, %v7567_v50  ;;  %v7308_v23 = vmax.f32 %v7205_v56, 0.0 }
 0x5e8   : > { %v7570_v52 = vadd.f32 %v12474_v49, %v7309_v13 }
 0x5e9   : > { %v7569_v21 = vadd.f32 %v12476_v59, %v7308_v23  ;;  %v9830_v55 = vpop.f32.mrb[40].mxu1 }
 0x5ea   : > { %7602 = vst.msk [vmem:[%s12499_s13 + $0xb8] sm:$0xff] %vm3788_vm4, %v7570_v52  ;;  %v7311_v24 = vmax.f32 %v9830_v55, 0.0  ;;  %v7215_v8 = vpop.f32.mrb[41].mxu1 }
 0x5eb   : > { %7601 = vst.msk [vmem:[%s12499_s13 + $0xb0] sm:$0xff] %vm3788_vm4, %v7569_v21  ;;  %v7310_v17 = vmax.f32 %v7215_v8, 0.0 }
 0x5ec   : > { %v7572_v18 = vadd.f32 %v12478_v54, %v7311_v24 }
 0x5ed   : > { %v7571_v27 = vadd.f32 %v12480_v0, %v7310_v17  ;;  %v9833_v20 = vpop.f32.mrb[42].mxu1 }
 0x5ee   : > { %7604 = vst.msk [vmem:[%s12499_s13 + $0xc8] sm:$0xff] %vm3788_vm4, %v7572_v18  ;;  %v7313_v49 = vmax.f32 %v9833_v20, 0.0  ;;  %v7225_v59 = vpop.f32.mrb[43].mxu1 }
 0x5ef   : > { %7603 = vst.msk [vmem:[%s12499_s13 + $0xc0] sm:$0xff] %vm3788_vm4, %v7571_v27  ;;  %v7312_v51 = vmax.f32 %v7225_v59, 0.0 }
 0x5f0   : > { %v7574_v25 = vadd.f32 %v12482_v26, %v7313_v49 }
 0x5f1   : > { %v7573_v53 = vadd.f32 %v12484_v48, %v7312_v51  ;;  %v9836_v28 = vpop.f32.mrb[44].mxu1 }
 0x5f2   : > { %7606 = vst.msk [vmem:[%s12499_s13 + $0xd8] sm:$0xff] %vm3788_vm4, %v7574_v25  ;;  %v7315_v54 = vmax.f32 %v9836_v28, 0.0  ;;  %v7235_v0 = vpop.f32.mrb[45].mxu1 }
 0x5f3   : > { %7605 = vst.msk [vmem:[%s12499_s13 + $0xd0] sm:$0xff] %vm3788_vm4, %v7573_v53  ;;  %v7314_v33 = vmax.f32 %v7235_v0, 0.0 }
 0x5f4   : > { %v7576_v34 = vadd.f32 %v12486_v38, %v7315_v54 }
 0x5f5   : > { %v7575_v37 = vadd.f32 %v12488_v22, %v7314_v33  ;;  %v9839_v46 = vpop.f32.mrb[46].mxu1 }
 0x5f6   : > { %7608 = vst.msk [vmem:[%s12499_s13 + $0xe8] sm:$0xff] %vm3788_vm4, %v7576_v34  ;;  %v7317_v26 = vmax.f32 %v9839_v46, 0.0  ;;  %v7245_v57 = vpop.f32.mrb[47].mxu1 }
 0x5f7   : > { %7607 = vst.msk [vmem:[%s12499_s13 + $0xe0] sm:$0xff] %vm3788_vm4, %v7575_v37  ;;  %v7316_v48 = vmax.f32 %v7245_v57, 0.0 }
 0x5f8   : > { %v7578_v30 = vadd.f32 %v12490_v39, %v7317_v26 }
 0x5f9   : > { %v7577_v1 = vadd.f32 %v12492_v60, %v7316_v48 }
 0x5fa   : > { %7610 = vst.msk [vmem:[%s12499_s13 + $0xf8] sm:$0xff] %vm3788_vm4, %v7578_v30 }
 0x5fb   : > { %7609 = vst.msk [vmem:[%s12499_s13 + $0xf0] sm:$0xff] %vm3788_vm4, %v7577_v1 }
 0x5fc PF: > { %s14_s15 = sadd.s32 1, %s10450_s15  }
 0x5fd   : > { %p11_p4 = scmp.ge.s32.totalorder %s14_s15, 4  }
 0x5ff   :  { %13 = sbr.rel (!%p11_p4) target bundleno = 1 (0x1), region = 88 }

</bundles_post_ra>
